<compile_context>
chip_gen: v5e
topology: v5e:2x2
jax: 0.10.0
libtpu: 0.0.40
codegen_flags: <defaults>
</compile_context>

<pallas_src>
import math
import jax
import jax.numpy as jnp
from jax import lax
from jax.experimental import pallas as pl
from jax.experimental.pallas import tpu as pltpu


def decoder_kernel(feat_ref, tok_ref, h0_ref, c0_ref, emb_ref,
                   wih_ref, whh_ref, b_ref, wo_ref, bo_ref,
                   out_ref, xp_sc, h_all_sc):
    B, H = feat_ref.shape
    V = emb_ref.shape[0]
    TB = tok_ref.shape[0]          # T * B
    T = TB // B
    S = T + 1

    # ---- hoisted input path (off the serial chain) -------------------------
    # Step 0 uses the visual features directly.
    xp_sc[0:B, :] = (jnp.dot(feat_ref[...], wih_ref[...],
                             preferred_element_type=jnp.float32) + b_ref[...])

    # Steps 1..T: embedding lookup for ALL tokens as one one-hot MXU matmul,
    # then one batched (T*B, H) x (H, 4H) input projection (+ fused bias).
    onehot = (lax.broadcasted_iota(jnp.int32, (TB, V), 1)
              == tok_ref[...]).astype(jnp.float32)                   # (TB, V)
    emb_x = jnp.dot(onehot, emb_ref[...],
                    preferred_element_type=jnp.float32)              # (TB, H)
    xp_sc[B:B + TB, :] = (jnp.dot(emb_x, wih_ref[...],
                                  preferred_element_type=jnp.float32)
                          + b_ref[...])

    # ---- serial LSTM recurrence: per step only z = xproj[t] + h @ W_hh -----
    h = h0_ref[...]
    c = c0_ref[...]
    for t in range(S):                       # static unroll, tiny per-step state
        z = xp_sc[pl.ds(t * B, B), :] + jnp.dot(
            h, whh_ref[...], preferred_element_type=jnp.float32)     # (B, 4H)
        i_g = jax.nn.sigmoid(z[:, 0:H])
        f_g = jax.nn.sigmoid(z[:, H:2 * H])
        g_g = jnp.tanh(z[:, 2 * H:3 * H])
        o_g = jax.nn.sigmoid(z[:, 3 * H:4 * H])
        c = f_g * c + i_g * g_g
        h = o_g * jnp.tanh(c)                # single EUP tanh, reused
        h_all_sc[pl.ds(t * B, B), :] = h

    # ---- deferred output projection: one (S*B, H) x (H, V) matmul ----------
    logits = jnp.dot(h_all_sc[...], wo_ref[...],
                     preferred_element_type=jnp.float32) + bo_ref[...]
    out_ref[...] = logits


def decoder_forward(features, caption_inputs, states, emb_table,
                    wih, whh, b, wo, bo):
    """Pallas implementation of Decoder.forward.

    features        : (B, H) f32
    caption_inputs  : (B, T) int token ids
    states          : (h0, c0), each (B, H) f32
    emb_table       : (V, H) f32
    wih, whh        : (H, 4H) f32 each (W_ih.T, W_hh.T), gate order i,f,g,o
    b               : (1, 4H) f32  fused bias (b_ih + b_hh)
    wo, bo          : (H, V) f32, (1, V) f32  output Linear
    returns         : (B, T+1, V) f32 decoder_outputs
    """
    h0, c0 = states
    B, H = features.shape
    T = caption_inputs.shape[1]
    S = T + 1
    V = emb_table.shape[0]
    TB = T * B

    # Tokens flattened step-major: row r = t*B + b  (token caption[b, t]).
    tok_flat = jnp.transpose(caption_inputs.astype(jnp.int32),
                             (1, 0)).reshape(TB, 1)

    grid_spec = pltpu.PrefetchScalarGridSpec(
        num_scalar_prefetch=0,
        grid=(1,),
        in_specs=[
            pl.BlockSpec((B, H), lambda i: (0, 0)),          # features
            pl.BlockSpec((TB, 1), lambda i: (0, 0)),          # all tokens, resident
            pl.BlockSpec((B, H), lambda i: (0, 0)),            # h0
            pl.BlockSpec((B, H), lambda i: (0, 0)),            # c0
            pl.BlockSpec((V, H), lambda i: (0, 0)),            # embedding table
            pl.BlockSpec((H, 4 * H), lambda i: (0, 0)),        # W_ih.T
            pl.BlockSpec((H, 4 * H), lambda i: (0, 0)),        # W_hh.T
            pl.BlockSpec((1, 4 * H), lambda i: (0, 0)),        # fused gate bias
            pl.BlockSpec((H, V), lambda i: (0, 0)),            # output weight
            pl.BlockSpec((1, V), lambda i: (0, 0)),            # output bias
        ],
        out_specs=pl.BlockSpec((S * B, V), lambda i: (0, 0)),  # lane-dense slab
        scratch_shapes=[pltpu.VMEM((S * B, 4 * H), jnp.float32),  # xproj
                        pltpu.VMEM((S * B, H), jnp.float32)],     # h history
    )

    out_flat = pl.pallas_call(
        decoder_kernel,
        out_shape=jax.ShapeDtypeStruct((S * B, V), jnp.float32),
        grid_spec=grid_spec,
        compiler_params=pltpu.CompilerParams(
            dimension_semantics=("arbitrary",)),
    )(features, tok_flat, h0, c0, emb_table, wih, whh, b, wo, bo)

    # (S*B, V) step-major -> (B, S, V); negligible at these shapes.
    return jnp.transpose(out_flat.reshape(S, B, V), (1, 0, 2))


def reference_forward(features, captions, states, emb, wih, whh, b, wo, bo):
    """Pure-JAX f32 reference mirroring the PyTorch module."""
    h, c = states
    B, T = captions.shape
    H = features.shape[1]
    hp = lax.Precision.HIGHEST
    outs = []
    for step in range(T + 1):
        x = features if step == 0 else emb[captions[:, step - 1]]
        z = (jnp.dot(x, wih, precision=hp)
             + jnp.dot(h, whh, precision=hp) + b)
        i_g = jax.nn.sigmoid(z[:, 0:H])
        f_g = jax.nn.sigmoid(z[:, H:2 * H])
        g_g = jnp.tanh(z[:, 2 * H:3 * H])
        o_g = jax.nn.sigmoid(z[:, 3 * H:4 * H])
        c = f_g * c + i_g * g_g
        h = o_g * jnp.tanh(c)
        outs.append(jnp.dot(h, wo, precision=hp) + bo)
    return jnp.stack(outs, axis=1)                 # (B, T+1, V)


if __name__ == "__main__":
    # Small shapes consistent with the module: vocab (input_size)=256,
    # hidden_size=128, batch=8, caption length=7 -> seq_length=8.
    B, H, V, T = 8, 128, 256, 7
    S = T + 1

    key = jax.random.PRNGKey(0)
    ks = jax.random.split(key, 8)

    features = jax.random.normal(ks[0], (B, H), jnp.float32)
    captions = jax.random.randint(ks[1], (B, T), 0, V, dtype=jnp.int32)
    h0 = jnp.zeros((B, H), jnp.float32)            # Decoder.init_hidden
    c0 = jnp.zeros((B, H), jnp.float32)

    bound = 1.0 / math.sqrt(H)                     # nn.LSTMCell / Linear init bound
    emb = 0.1 * jax.random.normal(ks[2], (V, H), jnp.float32)
    wih = jax.random.uniform(ks[3], (H, 4 * H), jnp.float32, -bound, bound)
    whh = jax.random.uniform(ks[4], (H, 4 * H), jnp.float32, -bound, bound)
    b = jax.random.uniform(ks[5], (1, 4 * H), jnp.float32, -bound, bound)
    wo = jax.random.uniform(ks[6], (H, V), jnp.float32, -bound, bound)
    bo = jax.random.uniform(ks[7], (1, V), jnp.float32, -bound, bound)

    out = decoder_forward(features, captions, (h0, c0), emb, wih, whh, b, wo, bo)
    out = jax.block_until_ready(out)

    ref = reference_forward(features, captions, (h0, c0), emb, wih, whh, b, wo, bo)
    assert out.shape == (B, S, V)
    max_err = float(jnp.max(jnp.abs(out - ref)))
    assert jnp.allclose(out, ref, atol=1e-2, rtol=1e-2), max_err

    print("KERNEL_OK")
</pallas_src>

<mosaic_0001>
module attributes {stable_mosaic.version = 11 : i64} {
  func.func @decoder_kernel(%arg0: i32, %arg1: memref<8x128xf32, #tpu.memory_space<vmem>>, %arg2: memref<56x1xi32, #tpu.memory_space<vmem>>, %arg3: memref<8x128xf32, #tpu.memory_space<vmem>>, %arg4: memref<8x128xf32, #tpu.memory_space<vmem>>, %arg5: memref<256x128xf32, #tpu.memory_space<vmem>>, %arg6: memref<128x512xf32, #tpu.memory_space<vmem>>, %arg7: memref<128x512xf32, #tpu.memory_space<vmem>>, %arg8: memref<1x512xf32, #tpu.memory_space<vmem>>, %arg9: memref<128x256xf32, #tpu.memory_space<vmem>>, %arg10: memref<1x256xf32, #tpu.memory_space<vmem>>, %arg11: memref<64x256xf32, #tpu.memory_space<vmem>>, %arg12: memref<64x512xf32, #tpu.memory_space<vmem>>, %arg13: memref<64x128xf32, #tpu.memory_space<vmem>>) attributes {dimension_semantics = [#tpu.dimension_semantics<arbitrary>], iteration_bounds = array<i64: 1>, scalar_prefetch = 0 : i64, scratch_operands = 2 : i64, tpu.core_type = #tpu.core_type<tc>, window_params = [{pipeline_mode = #tpu.pipeline_mode<synchronous>, transform_indices = @transform_0, window_bounds = array<i64: 8, 128>}, {pipeline_mode = #tpu.pipeline_mode<synchronous>, transform_indices = @transform_1, window_bounds = array<i64: 56, 1>}, {pipeline_mode = #tpu.pipeline_mode<synchronous>, transform_indices = @transform_2, window_bounds = array<i64: 8, 128>}, {pipeline_mode = #tpu.pipeline_mode<synchronous>, transform_indices = @transform_3, window_bounds = array<i64: 8, 128>}, {pipeline_mode = #tpu.pipeline_mode<synchronous>, transform_indices = @transform_4, window_bounds = array<i64: 256, 128>}, {pipeline_mode = #tpu.pipeline_mode<synchronous>, transform_indices = @transform_5, window_bounds = array<i64: 128, 512>}, {pipeline_mode = #tpu.pipeline_mode<synchronous>, transform_indices = @transform_6, window_bounds = array<i64: 128, 512>}, {pipeline_mode = #tpu.pipeline_mode<synchronous>, transform_indices = @transform_7, window_bounds = array<i64: 1, 512>}, {pipeline_mode = #tpu.pipeline_mode<synchronous>, transform_indices = @transform_8, window_bounds = array<i64: 128, 256>}, {pipeline_mode = #tpu.pipeline_mode<synchronous>, transform_indices = @transform_9, window_bounds = array<i64: 1, 256>}, {pipeline_mode = #tpu.pipeline_mode<synchronous>, transform_indices = @transform_10, window_bounds = array<i64: 64, 256>}]} {
    %c0 = arith.constant 0 : index
    %c0_0 = arith.constant 0 : index
    %0 = vector.load %arg1[%c0, %c0_0] : memref<8x128xf32, #tpu.memory_space<vmem>>, vector<8x128xf32>
    %c0_1 = arith.constant 0 : index
    %c0_2 = arith.constant 0 : index
    %1 = vector.load %arg6[%c0_1, %c0_2] : memref<128x512xf32, #tpu.memory_space<vmem>>, vector<128x512xf32>
    %cst = arith.constant dense<0.000000e+00> : vector<8x512xf32>
    %2 = tpu.matmul %0, %1, %cst {dimension_numbers = #tpu.dot_dimension_numbers<[1], [0], [0], [1], [0, 0, 1, 1], [], []>} : vector<8x128xf32>, vector<128x512xf32>, vector<8x512xf32> -> vector<8x512xf32>
    %c0_3 = arith.constant 0 : index
    %c0_4 = arith.constant 0 : index
    %3 = vector.load %arg8[%c0_3, %c0_4] : memref<1x512xf32, #tpu.memory_space<vmem>>, vector<1x512xf32>
    %4 = vector.broadcast %3 : vector<1x512xf32> to vector<8x512xf32>
    %5 = arith.addf %2, %4 : vector<8x512xf32>
    %c0_5 = arith.constant 0 : index
    %c0_6 = arith.constant 0 : index
    %6 = vector.load %arg12[%c0_5, %c0_6] : memref<64x512xf32, #tpu.memory_space<vmem>>, vector<8x512xf32>
    tpu.vector_store %arg12[%c0_5, %c0_6], %5 {strides = array<i32>} : memref<64x512xf32, #tpu.memory_space<vmem>>, vector<8x512xf32>,
    %7 = tpu.iota {dimensions = array<i32: 1>} : vector<56x256xi32>
    %c0_7 = arith.constant 0 : index
    %c0_8 = arith.constant 0 : index
    %8 = vector.load %arg2[%c0_7, %c0_8] : memref<56x1xi32, #tpu.memory_space<vmem>>, vector<56x1xi32>
    %9 = vector.broadcast %8 : vector<56x1xi32> to vector<56x256xi32>
    %10 = arith.cmpi eq, %7, %9 : vector<56x256xi32>
    %11 = arith.extui %10 : vector<56x256xi1> to vector<56x256xi32>
    %12 = arith.sitofp %11 : vector<56x256xi32> to vector<56x256xf32>
    %c0_9 = arith.constant 0 : index
    %c0_10 = arith.constant 0 : index
    %13 = vector.load %arg5[%c0_9, %c0_10] : memref<256x128xf32, #tpu.memory_space<vmem>>, vector<256x128xf32>
    %cst_11 = arith.constant dense<0.000000e+00> : vector<56x128xf32>
    %14 = tpu.matmul %12, %13, %cst_11 {dimension_numbers = #tpu.dot_dimension_numbers<[1], [0], [0], [1], [0, 0, 1, 1], [], []>} : vector<56x256xf32>, vector<256x128xf32>, vector<56x128xf32> -> vector<56x128xf32>
    %c0_12 = arith.constant 0 : index
    %c0_13 = arith.constant 0 : index
    %15 = vector.load %arg6[%c0_12, %c0_13] : memref<128x512xf32, #tpu.memory_space<vmem>>, vector<128x512xf32>
    %cst_14 = arith.constant dense<0.000000e+00> : vector<56x512xf32>
    %16 = tpu.matmul %14, %15, %cst_14 {dimension_numbers = #tpu.dot_dimension_numbers<[1], [0], [0], [1], [0, 0, 1, 1], [], []>} : vector<56x128xf32>, vector<128x512xf32>, vector<56x512xf32> -> vector<56x512xf32>
    %c0_15 = arith.constant 0 : index
    %c0_16 = arith.constant 0 : index
    %17 = vector.load %arg8[%c0_15, %c0_16] : memref<1x512xf32, #tpu.memory_space<vmem>>, vector<1x512xf32>
    %18 = vector.broadcast %17 : vector<1x512xf32> to vector<56x512xf32>
    %19 = arith.addf %16, %18 : vector<56x512xf32>
    %c8 = arith.constant 8 : index
    %c0_17 = arith.constant 0 : index
    %20 = vector.load %arg12[%c8, %c0_17] : memref<64x512xf32, #tpu.memory_space<vmem>>, vector<56x512xf32>
    tpu.vector_store %arg12[%c8, %c0_17], %19 {strides = array<i32>} : memref<64x512xf32, #tpu.memory_space<vmem>>, vector<56x512xf32>,
    %c0_18 = arith.constant 0 : index
    %c0_19 = arith.constant 0 : index
    %21 = vector.load %arg3[%c0_18, %c0_19] : memref<8x128xf32, #tpu.memory_space<vmem>>, vector<8x128xf32>
    %c0_20 = arith.constant 0 : index
    %c0_21 = arith.constant 0 : index
    %22 = vector.load %arg4[%c0_20, %c0_21] : memref<8x128xf32, #tpu.memory_space<vmem>>, vector<8x128xf32>
    %c0_22 = arith.constant 0 : index
    %c0_23 = arith.constant 0 : index
    %23 = vector.load %arg12[%c0_22, %c0_23] : memref<64x512xf32, #tpu.memory_space<vmem>>, vector<8x512xf32>
    %c0_24 = arith.constant 0 : index
    %c0_25 = arith.constant 0 : index
    %24 = vector.load %arg7[%c0_24, %c0_25] : memref<128x512xf32, #tpu.memory_space<vmem>>, vector<128x512xf32>
    %cst_26 = arith.constant dense<0.000000e+00> : vector<8x512xf32>
    %25 = tpu.matmul %21, %24, %cst_26 {dimension_numbers = #tpu.dot_dimension_numbers<[1], [0], [0], [1], [0, 0, 1, 1], [], []>} : vector<8x128xf32>, vector<128x512xf32>, vector<8x512xf32> -> vector<8x512xf32>
    %26 = arith.addf %23, %25 : vector<8x512xf32>
    %27 = vector.extract_strided_slice %26 {offsets = [0, 0], sizes = [8, 128], strides = [1, 1]} : vector<8x512xf32> to vector<8x128xf32>
    %28 = arith.negf %27 : vector<8x128xf32>
    %29 = math.exp %28 : vector<8x128xf32>
    %cst_27 = arith.constant 1.000000e+00 : f32
    %30 = vector.broadcast %cst_27 : f32 to vector<8x128xf32>
    %31 = arith.addf %30, %29 : vector<8x128xf32>
    %32 = arith.divf %30, %31 : vector<8x128xf32>
    %33 = vector.extract_strided_slice %26 {offsets = [0, 128], sizes = [8, 128], strides = [1, 1]} : vector<8x512xf32> to vector<8x128xf32>
    %34 = arith.negf %33 : vector<8x128xf32>
    %35 = math.exp %34 : vector<8x128xf32>
    %cst_28 = arith.constant 1.000000e+00 : f32
    %36 = vector.broadcast %cst_28 : f32 to vector<8x128xf32>
    %37 = arith.addf %36, %35 : vector<8x128xf32>
    %38 = arith.divf %36, %37 : vector<8x128xf32>
    %39 = vector.extract_strided_slice %26 {offsets = [0, 256], sizes = [8, 128], strides = [1, 1]} : vector<8x512xf32> to vector<8x128xf32>
    %40 = math.tanh %39 : vector<8x128xf32>
    %41 = vector.extract_strided_slice %26 {offsets = [0, 384], sizes = [8, 128], strides = [1, 1]} : vector<8x512xf32> to vector<8x128xf32>
    %42 = arith.negf %41 : vector<8x128xf32>
    %43 = math.exp %42 : vector<8x128xf32>
    %cst_29 = arith.constant 1.000000e+00 : f32
    %44 = vector.broadcast %cst_29 : f32 to vector<8x128xf32>
    %45 = arith.addf %44, %43 : vector<8x128xf32>
    %46 = arith.divf %44, %45 : vector<8x128xf32>
    %47 = arith.mulf %38, %22 : vector<8x128xf32>
    %48 = arith.mulf %32, %40 : vector<8x128xf32>
    %49 = arith.addf %47, %48 : vector<8x128xf32>
    %50 = math.tanh %49 : vector<8x128xf32>
    %51 = arith.mulf %46, %50 : vector<8x128xf32>
    %c0_30 = arith.constant 0 : index
    %c0_31 = arith.constant 0 : index
    %52 = vector.load %arg13[%c0_30, %c0_31] : memref<64x128xf32, #tpu.memory_space<vmem>>, vector<8x128xf32>
    tpu.vector_store %arg13[%c0_30, %c0_31], %51 {strides = array<i32>} : memref<64x128xf32, #tpu.memory_space<vmem>>, vector<8x128xf32>,
    %c8_32 = arith.constant 8 : index
    %c0_33 = arith.constant 0 : index
    %53 = vector.load %arg12[%c8_32, %c0_33] : memref<64x512xf32, #tpu.memory_space<vmem>>, vector<8x512xf32>
    %c0_34 = arith.constant 0 : index
    %c0_35 = arith.constant 0 : index
    %54 = vector.load %arg7[%c0_34, %c0_35] : memref<128x512xf32, #tpu.memory_space<vmem>>, vector<128x512xf32>
    %cst_36 = arith.constant dense<0.000000e+00> : vector<8x512xf32>
    %55 = tpu.matmul %51, %54, %cst_36 {dimension_numbers = #tpu.dot_dimension_numbers<[1], [0], [0], [1], [0, 0, 1, 1], [], []>} : vector<8x128xf32>, vector<128x512xf32>, vector<8x512xf32> -> vector<8x512xf32>
    %56 = arith.addf %53, %55 : vector<8x512xf32>
    %57 = vector.extract_strided_slice %56 {offsets = [0, 0], sizes = [8, 128], strides = [1, 1]} : vector<8x512xf32> to vector<8x128xf32>
    %58 = arith.negf %57 : vector<8x128xf32>
    %59 = math.exp %58 : vector<8x128xf32>
    %cst_37 = arith.constant 1.000000e+00 : f32
    %60 = vector.broadcast %cst_37 : f32 to vector<8x128xf32>
    %61 = arith.addf %60, %59 : vector<8x128xf32>
    %62 = arith.divf %60, %61 : vector<8x128xf32>
    %63 = vector.extract_strided_slice %56 {offsets = [0, 128], sizes = [8, 128], strides = [1, 1]} : vector<8x512xf32> to vector<8x128xf32>
    %64 = arith.negf %63 : vector<8x128xf32>
    %65 = math.exp %64 : vector<8x128xf32>
    %cst_38 = arith.constant 1.000000e+00 : f32
    %66 = vector.broadcast %cst_38 : f32 to vector<8x128xf32>
    %67 = arith.addf %66, %65 : vector<8x128xf32>
    %68 = arith.divf %66, %67 : vector<8x128xf32>
    %69 = vector.extract_strided_slice %56 {offsets = [0, 256], sizes = [8, 128], strides = [1, 1]} : vector<8x512xf32> to vector<8x128xf32>
    %70 = math.tanh %69 : vector<8x128xf32>
    %71 = vector.extract_strided_slice %56 {offsets = [0, 384], sizes = [8, 128], strides = [1, 1]} : vector<8x512xf32> to vector<8x128xf32>
    %72 = arith.negf %71 : vector<8x128xf32>
    %73 = math.exp %72 : vector<8x128xf32>
    %cst_39 = arith.constant 1.000000e+00 : f32
    %74 = vector.broadcast %cst_39 : f32 to vector<8x128xf32>
    %75 = arith.addf %74, %73 : vector<8x128xf32>
    %76 = arith.divf %74, %75 : vector<8x128xf32>
    %77 = arith.mulf %68, %49 : vector<8x128xf32>
    %78 = arith.mulf %62, %70 : vector<8x128xf32>
    %79 = arith.addf %77, %78 : vector<8x128xf32>
    %80 = math.tanh %79 : vector<8x128xf32>
    %81 = arith.mulf %76, %80 : vector<8x128xf32>
    %c8_40 = arith.constant 8 : index
    %c0_41 = arith.constant 0 : index
    %82 = vector.load %arg13[%c8_40, %c0_41] : memref<64x128xf32, #tpu.memory_space<vmem>>, vector<8x128xf32>
    tpu.vector_store %arg13[%c8_40, %c0_41], %81 {strides = array<i32>} : memref<64x128xf32, #tpu.memory_space<vmem>>, vector<8x128xf32>,
    %c16 = arith.constant 16 : index
    %c0_42 = arith.constant 0 : index
    %83 = vector.load %arg12[%c16, %c0_42] : memref<64x512xf32, #tpu.memory_space<vmem>>, vector<8x512xf32>
    %c0_43 = arith.constant 0 : index
    %c0_44 = arith.constant 0 : index
    %84 = vector.load %arg7[%c0_43, %c0_44] : memref<128x512xf32, #tpu.memory_space<vmem>>, vector<128x512xf32>
    %cst_45 = arith.constant dense<0.000000e+00> : vector<8x512xf32>
    %85 = tpu.matmul %81, %84, %cst_45 {dimension_numbers = #tpu.dot_dimension_numbers<[1], [0], [0], [1], [0, 0, 1, 1], [], []>} : vector<8x128xf32>, vector<128x512xf32>, vector<8x512xf32> -> vector<8x512xf32>
    %86 = arith.addf %83, %85 : vector<8x512xf32>
    %87 = vector.extract_strided_slice %86 {offsets = [0, 0], sizes = [8, 128], strides = [1, 1]} : vector<8x512xf32> to vector<8x128xf32>
    %88 = arith.negf %87 : vector<8x128xf32>
    %89 = math.exp %88 : vector<8x128xf32>
    %cst_46 = arith.constant 1.000000e+00 : f32
    %90 = vector.broadcast %cst_46 : f32 to vector<8x128xf32>
    %91 = arith.addf %90, %89 : vector<8x128xf32>
    %92 = arith.divf %90, %91 : vector<8x128xf32>
    %93 = vector.extract_strided_slice %86 {offsets = [0, 128], sizes = [8, 128], strides = [1, 1]} : vector<8x512xf32> to vector<8x128xf32>
    %94 = arith.negf %93 : vector<8x128xf32>
    %95 = math.exp %94 : vector<8x128xf32>
    %cst_47 = arith.constant 1.000000e+00 : f32
    %96 = vector.broadcast %cst_47 : f32 to vector<8x128xf32>
    %97 = arith.addf %96, %95 : vector<8x128xf32>
    %98 = arith.divf %96, %97 : vector<8x128xf32>
    %99 = vector.extract_strided_slice %86 {offsets = [0, 256], sizes = [8, 128], strides = [1, 1]} : vector<8x512xf32> to vector<8x128xf32>
    %100 = math.tanh %99 : vector<8x128xf32>
    %101 = vector.extract_strided_slice %86 {offsets = [0, 384], sizes = [8, 128], strides = [1, 1]} : vector<8x512xf32> to vector<8x128xf32>
    %102 = arith.negf %101 : vector<8x128xf32>
    %103 = math.exp %102 : vector<8x128xf32>
    %cst_48 = arith.constant 1.000000e+00 : f32
    %104 = vector.broadcast %cst_48 : f32 to vector<8x128xf32>
    %105 = arith.addf %104, %103 : vector<8x128xf32>
    %106 = arith.divf %104, %105 : vector<8x128xf32>
    %107 = arith.mulf %98, %79 : vector<8x128xf32>
    %108 = arith.mulf %92, %100 : vector<8x128xf32>
    %109 = arith.addf %107, %108 : vector<8x128xf32>
    %110 = math.tanh %109 : vector<8x128xf32>
    %111 = arith.mulf %106, %110 : vector<8x128xf32>
    %c16_49 = arith.constant 16 : index
    %c0_50 = arith.constant 0 : index
    %112 = vector.load %arg13[%c16_49, %c0_50] : memref<64x128xf32, #tpu.memory_space<vmem>>, vector<8x128xf32>
    tpu.vector_store %arg13[%c16_49, %c0_50], %111 {strides = array<i32>} : memref<64x128xf32, #tpu.memory_space<vmem>>, vector<8x128xf32>,
    %c24 = arith.constant 24 : index
    %c0_51 = arith.constant 0 : index
    %113 = vector.load %arg12[%c24, %c0_51] : memref<64x512xf32, #tpu.memory_space<vmem>>, vector<8x512xf32>
    %c0_52 = arith.constant 0 : index
    %c0_53 = arith.constant 0 : index
    %114 = vector.load %arg7[%c0_52, %c0_53] : memref<128x512xf32, #tpu.memory_space<vmem>>, vector<128x512xf32>
    %cst_54 = arith.constant dense<0.000000e+00> : vector<8x512xf32>
    %115 = tpu.matmul %111, %114, %cst_54 {dimension_numbers = #tpu.dot_dimension_numbers<[1], [0], [0], [1], [0, 0, 1, 1], [], []>} : vector<8x128xf32>, vector<128x512xf32>, vector<8x512xf32> -> vector<8x512xf32>
    %116 = arith.addf %113, %115 : vector<8x512xf32>
    %117 = vector.extract_strided_slice %116 {offsets = [0, 0], sizes = [8, 128], strides = [1, 1]} : vector<8x512xf32> to vector<8x128xf32>
    %118 = arith.negf %117 : vector<8x128xf32>
    %119 = math.exp %118 : vector<8x128xf32>
    %cst_55 = arith.constant 1.000000e+00 : f32
    %120 = vector.broadcast %cst_55 : f32 to vector<8x128xf32>
    %121 = arith.addf %120, %119 : vector<8x128xf32>
    %122 = arith.divf %120, %121 : vector<8x128xf32>
    %123 = vector.extract_strided_slice %116 {offsets = [0, 128], sizes = [8, 128], strides = [1, 1]} : vector<8x512xf32> to vector<8x128xf32>
    %124 = arith.negf %123 : vector<8x128xf32>
    %125 = math.exp %124 : vector<8x128xf32>
    %cst_56 = arith.constant 1.000000e+00 : f32
    %126 = vector.broadcast %cst_56 : f32 to vector<8x128xf32>
    %127 = arith.addf %126, %125 : vector<8x128xf32>
    %128 = arith.divf %126, %127 : vector<8x128xf32>
    %129 = vector.extract_strided_slice %116 {offsets = [0, 256], sizes = [8, 128], strides = [1, 1]} : vector<8x512xf32> to vector<8x128xf32>
    %130 = math.tanh %129 : vector<8x128xf32>
    %131 = vector.extract_strided_slice %116 {offsets = [0, 384], sizes = [8, 128], strides = [1, 1]} : vector<8x512xf32> to vector<8x128xf32>
    %132 = arith.negf %131 : vector<8x128xf32>
    %133 = math.exp %132 : vector<8x128xf32>
    %cst_57 = arith.constant 1.000000e+00 : f32
    %134 = vector.broadcast %cst_57 : f32 to vector<8x128xf32>
    %135 = arith.addf %134, %133 : vector<8x128xf32>
    %136 = arith.divf %134, %135 : vector<8x128xf32>
    %137 = arith.mulf %128, %109 : vector<8x128xf32>
    %138 = arith.mulf %122, %130 : vector<8x128xf32>
    %139 = arith.addf %137, %138 : vector<8x128xf32>
    %140 = math.tanh %139 : vector<8x128xf32>
    %141 = arith.mulf %136, %140 : vector<8x128xf32>
    %c24_58 = arith.constant 24 : index
    %c0_59 = arith.constant 0 : index
    %142 = vector.load %arg13[%c24_58, %c0_59] : memref<64x128xf32, #tpu.memory_space<vmem>>, vector<8x128xf32>
    tpu.vector_store %arg13[%c24_58, %c0_59], %141 {strides = array<i32>} : memref<64x128xf32, #tpu.memory_space<vmem>>, vector<8x128xf32>,
    %c32 = arith.constant 32 : index
    %c0_60 = arith.constant 0 : index
    %143 = vector.load %arg12[%c32, %c0_60] : memref<64x512xf32, #tpu.memory_space<vmem>>, vector<8x512xf32>
    %c0_61 = arith.constant 0 : index
    %c0_62 = arith.constant 0 : index
    %144 = vector.load %arg7[%c0_61, %c0_62] : memref<128x512xf32, #tpu.memory_space<vmem>>, vector<128x512xf32>
    %cst_63 = arith.constant dense<0.000000e+00> : vector<8x512xf32>
    %145 = tpu.matmul %141, %144, %cst_63 {dimension_numbers = #tpu.dot_dimension_numbers<[1], [0], [0], [1], [0, 0, 1, 1], [], []>} : vector<8x128xf32>, vector<128x512xf32>, vector<8x512xf32> -> vector<8x512xf32>
    %146 = arith.addf %143, %145 : vector<8x512xf32>
    %147 = vector.extract_strided_slice %146 {offsets = [0, 0], sizes = [8, 128], strides = [1, 1]} : vector<8x512xf32> to vector<8x128xf32>
    %148 = arith.negf %147 : vector<8x128xf32>
    %149 = math.exp %148 : vector<8x128xf32>
    %cst_64 = arith.constant 1.000000e+00 : f32
    %150 = vector.broadcast %cst_64 : f32 to vector<8x128xf32>
    %151 = arith.addf %150, %149 : vector<8x128xf32>
    %152 = arith.divf %150, %151 : vector<8x128xf32>
    %153 = vector.extract_strided_slice %146 {offsets = [0, 128], sizes = [8, 128], strides = [1, 1]} : vector<8x512xf32> to vector<8x128xf32>
    %154 = arith.negf %153 : vector<8x128xf32>
    %155 = math.exp %154 : vector<8x128xf32>
    %cst_65 = arith.constant 1.000000e+00 : f32
    %156 = vector.broadcast %cst_65 : f32 to vector<8x128xf32>
    %157 = arith.addf %156, %155 : vector<8x128xf32>
    %158 = arith.divf %156, %157 : vector<8x128xf32>
    %159 = vector.extract_strided_slice %146 {offsets = [0, 256], sizes = [8, 128], strides = [1, 1]} : vector<8x512xf32> to vector<8x128xf32>
    %160 = math.tanh %159 : vector<8x128xf32>
    %161 = vector.extract_strided_slice %146 {offsets = [0, 384], sizes = [8, 128], strides = [1, 1]} : vector<8x512xf32> to vector<8x128xf32>
    %162 = arith.negf %161 : vector<8x128xf32>
    %163 = math.exp %162 : vector<8x128xf32>
    %cst_66 = arith.constant 1.000000e+00 : f32
    %164 = vector.broadcast %cst_66 : f32 to vector<8x128xf32>
    %165 = arith.addf %164, %163 : vector<8x128xf32>
    %166 = arith.divf %164, %165 : vector<8x128xf32>
    %167 = arith.mulf %158, %139 : vector<8x128xf32>
    %168 = arith.mulf %152, %160 : vector<8x128xf32>
    %169 = arith.addf %167, %168 : vector<8x128xf32>
    %170 = math.tanh %169 : vector<8x128xf32>
    %171 = arith.mulf %166, %170 : vector<8x128xf32>
    %c32_67 = arith.constant 32 : index
    %c0_68 = arith.constant 0 : index
    %172 = vector.load %arg13[%c32_67, %c0_68] : memref<64x128xf32, #tpu.memory_space<vmem>>, vector<8x128xf32>
    tpu.vector_store %arg13[%c32_67, %c0_68], %171 {strides = array<i32>} : memref<64x128xf32, #tpu.memory_space<vmem>>, vector<8x128xf32>,
    %c40 = arith.constant 40 : index
    %c0_69 = arith.constant 0 : index
    %173 = vector.load %arg12[%c40, %c0_69] : memref<64x512xf32, #tpu.memory_space<vmem>>, vector<8x512xf32>
    %c0_70 = arith.constant 0 : index
    %c0_71 = arith.constant 0 : index
    %174 = vector.load %arg7[%c0_70, %c0_71] : memref<128x512xf32, #tpu.memory_space<vmem>>, vector<128x512xf32>
    %cst_72 = arith.constant dense<0.000000e+00> : vector<8x512xf32>
    %175 = tpu.matmul %171, %174, %cst_72 {dimension_numbers = #tpu.dot_dimension_numbers<[1], [0], [0], [1], [0, 0, 1, 1], [], []>} : vector<8x128xf32>, vector<128x512xf32>, vector<8x512xf32> -> vector<8x512xf32>
    %176 = arith.addf %173, %175 : vector<8x512xf32>
    %177 = vector.extract_strided_slice %176 {offsets = [0, 0], sizes = [8, 128], strides = [1, 1]} : vector<8x512xf32> to vector<8x128xf32>
    %178 = arith.negf %177 : vector<8x128xf32>
    %179 = math.exp %178 : vector<8x128xf32>
    %cst_73 = arith.constant 1.000000e+00 : f32
    %180 = vector.broadcast %cst_73 : f32 to vector<8x128xf32>
    %181 = arith.addf %180, %179 : vector<8x128xf32>
    %182 = arith.divf %180, %181 : vector<8x128xf32>
    %183 = vector.extract_strided_slice %176 {offsets = [0, 128], sizes = [8, 128], strides = [1, 1]} : vector<8x512xf32> to vector<8x128xf32>
    %184 = arith.negf %183 : vector<8x128xf32>
    %185 = math.exp %184 : vector<8x128xf32>
    %cst_74 = arith.constant 1.000000e+00 : f32
    %186 = vector.broadcast %cst_74 : f32 to vector<8x128xf32>
    %187 = arith.addf %186, %185 : vector<8x128xf32>
    %188 = arith.divf %186, %187 : vector<8x128xf32>
    %189 = vector.extract_strided_slice %176 {offsets = [0, 256], sizes = [8, 128], strides = [1, 1]} : vector<8x512xf32> to vector<8x128xf32>
    %190 = math.tanh %189 : vector<8x128xf32>
    %191 = vector.extract_strided_slice %176 {offsets = [0, 384], sizes = [8, 128], strides = [1, 1]} : vector<8x512xf32> to vector<8x128xf32>
    %192 = arith.negf %191 : vector<8x128xf32>
    %193 = math.exp %192 : vector<8x128xf32>
    %cst_75 = arith.constant 1.000000e+00 : f32
    %194 = vector.broadcast %cst_75 : f32 to vector<8x128xf32>
    %195 = arith.addf %194, %193 : vector<8x128xf32>
    %196 = arith.divf %194, %195 : vector<8x128xf32>
    %197 = arith.mulf %188, %169 : vector<8x128xf32>
    %198 = arith.mulf %182, %190 : vector<8x128xf32>
    %199 = arith.addf %197, %198 : vector<8x128xf32>
    %200 = math.tanh %199 : vector<8x128xf32>
    %201 = arith.mulf %196, %200 : vector<8x128xf32>
    %c40_76 = arith.constant 40 : index
    %c0_77 = arith.constant 0 : index
    %202 = vector.load %arg13[%c40_76, %c0_77] : memref<64x128xf32, #tpu.memory_space<vmem>>, vector<8x128xf32>
    tpu.vector_store %arg13[%c40_76, %c0_77], %201 {strides = array<i32>} : memref<64x128xf32, #tpu.memory_space<vmem>>, vector<8x128xf32>,
    %c48 = arith.constant 48 : index
    %c0_78 = arith.constant 0 : index
    %203 = vector.load %arg12[%c48, %c0_78] : memref<64x512xf32, #tpu.memory_space<vmem>>, vector<8x512xf32>
    %c0_79 = arith.constant 0 : index
    %c0_80 = arith.constant 0 : index
    %204 = vector.load %arg7[%c0_79, %c0_80] : memref<128x512xf32, #tpu.memory_space<vmem>>, vector<128x512xf32>
    %cst_81 = arith.constant dense<0.000000e+00> : vector<8x512xf32>
    %205 = tpu.matmul %201, %204, %cst_81 {dimension_numbers = #tpu.dot_dimension_numbers<[1], [0], [0], [1], [0, 0, 1, 1], [], []>} : vector<8x128xf32>, vector<128x512xf32>, vector<8x512xf32> -> vector<8x512xf32>
    %206 = arith.addf %203, %205 : vector<8x512xf32>
    %207 = vector.extract_strided_slice %206 {offsets = [0, 0], sizes = [8, 128], strides = [1, 1]} : vector<8x512xf32> to vector<8x128xf32>
    %208 = arith.negf %207 : vector<8x128xf32>
    %209 = math.exp %208 : vector<8x128xf32>
    %cst_82 = arith.constant 1.000000e+00 : f32
    %210 = vector.broadcast %cst_82 : f32 to vector<8x128xf32>
    %211 = arith.addf %210, %209 : vector<8x128xf32>
    %212 = arith.divf %210, %211 : vector<8x128xf32>
    %213 = vector.extract_strided_slice %206 {offsets = [0, 128], sizes = [8, 128], strides = [1, 1]} : vector<8x512xf32> to vector<8x128xf32>
    %214 = arith.negf %213 : vector<8x128xf32>
    %215 = math.exp %214 : vector<8x128xf32>
    %cst_83 = arith.constant 1.000000e+00 : f32
    %216 = vector.broadcast %cst_83 : f32 to vector<8x128xf32>
    %217 = arith.addf %216, %215 : vector<8x128xf32>
    %218 = arith.divf %216, %217 : vector<8x128xf32>
    %219 = vector.extract_strided_slice %206 {offsets = [0, 256], sizes = [8, 128], strides = [1, 1]} : vector<8x512xf32> to vector<8x128xf32>
    %220 = math.tanh %219 : vector<8x128xf32>
    %221 = vector.extract_strided_slice %206 {offsets = [0, 384], sizes = [8, 128], strides = [1, 1]} : vector<8x512xf32> to vector<8x128xf32>
    %222 = arith.negf %221 : vector<8x128xf32>
    %223 = math.exp %222 : vector<8x128xf32>
    %cst_84 = arith.constant 1.000000e+00 : f32
    %224 = vector.broadcast %cst_84 : f32 to vector<8x128xf32>
    %225 = arith.addf %224, %223 : vector<8x128xf32>
    %226 = arith.divf %224, %225 : vector<8x128xf32>
    %227 = arith.mulf %218, %199 : vector<8x128xf32>
    %228 = arith.mulf %212, %220 : vector<8x128xf32>
    %229 = arith.addf %227, %228 : vector<8x128xf32>
    %230 = math.tanh %229 : vector<8x128xf32>
    %231 = arith.mulf %226, %230 : vector<8x128xf32>
    %c48_85 = arith.constant 48 : index
    %c0_86 = arith.constant 0 : index
    %232 = vector.load %arg13[%c48_85, %c0_86] : memref<64x128xf32, #tpu.memory_space<vmem>>, vector<8x128xf32>
    tpu.vector_store %arg13[%c48_85, %c0_86], %231 {strides = array<i32>} : memref<64x128xf32, #tpu.memory_space<vmem>>, vector<8x128xf32>,
    %c56 = arith.constant 56 : index
    %c0_87 = arith.constant 0 : index
    %233 = vector.load %arg12[%c56, %c0_87] : memref<64x512xf32, #tpu.memory_space<vmem>>, vector<8x512xf32>
    %c0_88 = arith.constant 0 : index
    %c0_89 = arith.constant 0 : index
    %234 = vector.load %arg7[%c0_88, %c0_89] : memref<128x512xf32, #tpu.memory_space<vmem>>, vector<128x512xf32>
    %cst_90 = arith.constant dense<0.000000e+00> : vector<8x512xf32>
    %235 = tpu.matmul %231, %234, %cst_90 {dimension_numbers = #tpu.dot_dimension_numbers<[1], [0], [0], [1], [0, 0, 1, 1], [], []>} : vector<8x128xf32>, vector<128x512xf32>, vector<8x512xf32> -> vector<8x512xf32>
    %236 = arith.addf %233, %235 : vector<8x512xf32>
    %237 = vector.extract_strided_slice %236 {offsets = [0, 0], sizes = [8, 128], strides = [1, 1]} : vector<8x512xf32> to vector<8x128xf32>
    %238 = arith.negf %237 : vector<8x128xf32>
    %239 = math.exp %238 : vector<8x128xf32>
    %cst_91 = arith.constant 1.000000e+00 : f32
    %240 = vector.broadcast %cst_91 : f32 to vector<8x128xf32>
    %241 = arith.addf %240, %239 : vector<8x128xf32>
    %242 = arith.divf %240, %241 : vector<8x128xf32>
    %243 = vector.extract_strided_slice %236 {offsets = [0, 128], sizes = [8, 128], strides = [1, 1]} : vector<8x512xf32> to vector<8x128xf32>
    %244 = arith.negf %243 : vector<8x128xf32>
    %245 = math.exp %244 : vector<8x128xf32>
    %cst_92 = arith.constant 1.000000e+00 : f32
    %246 = vector.broadcast %cst_92 : f32 to vector<8x128xf32>
    %247 = arith.addf %246, %245 : vector<8x128xf32>
    %248 = arith.divf %246, %247 : vector<8x128xf32>
    %249 = vector.extract_strided_slice %236 {offsets = [0, 256], sizes = [8, 128], strides = [1, 1]} : vector<8x512xf32> to vector<8x128xf32>
    %250 = math.tanh %249 : vector<8x128xf32>
    %251 = vector.extract_strided_slice %236 {offsets = [0, 384], sizes = [8, 128], strides = [1, 1]} : vector<8x512xf32> to vector<8x128xf32>
    %252 = arith.negf %251 : vector<8x128xf32>
    %253 = math.exp %252 : vector<8x128xf32>
    %cst_93 = arith.constant 1.000000e+00 : f32
    %254 = vector.broadcast %cst_93 : f32 to vector<8x128xf32>
    %255 = arith.addf %254, %253 : vector<8x128xf32>
    %256 = arith.divf %254, %255 : vector<8x128xf32>
    %257 = arith.mulf %248, %229 : vector<8x128xf32>
    %258 = arith.mulf %242, %250 : vector<8x128xf32>
    %259 = arith.addf %257, %258 : vector<8x128xf32>
    %260 = math.tanh %259 : vector<8x128xf32>
    %261 = arith.mulf %256, %260 : vector<8x128xf32>
    %c56_94 = arith.constant 56 : index
    %c0_95 = arith.constant 0 : index
    %262 = vector.load %arg13[%c56_94, %c0_95] : memref<64x128xf32, #tpu.memory_space<vmem>>, vector<8x128xf32>
    tpu.vector_store %arg13[%c56_94, %c0_95], %261 {strides = array<i32>} : memref<64x128xf32, #tpu.memory_space<vmem>>, vector<8x128xf32>,
    %c0_96 = arith.constant 0 : index
    %c0_97 = arith.constant 0 : index
    %263 = vector.load %arg13[%c0_96, %c0_97] : memref<64x128xf32, #tpu.memory_space<vmem>>, vector<64x128xf32>
    %c0_98 = arith.constant 0 : index
    %c0_99 = arith.constant 0 : index
    %264 = vector.load %arg9[%c0_98, %c0_99] : memref<128x256xf32, #tpu.memory_space<vmem>>, vector<128x256xf32>
    %cst_100 = arith.constant dense<0.000000e+00> : vector<64x256xf32>
    %265 = tpu.matmul %263, %264, %cst_100 {dimension_numbers = #tpu.dot_dimension_numbers<[1], [0], [0], [1], [0, 0, 1, 1], [], []>} : vector<64x128xf32>, vector<128x256xf32>, vector<64x256xf32> -> vector<64x256xf32>
    %c0_101 = arith.constant 0 : index
    %c0_102 = arith.constant 0 : index
    %266 = vector.load %arg10[%c0_101, %c0_102] : memref<1x256xf32, #tpu.memory_space<vmem>>, vector<1x256xf32>
    %267 = vector.broadcast %266 : vector<1x256xf32> to vector<64x256xf32>
    %268 = arith.addf %265, %267 : vector<64x256xf32>
    %c0_103 = arith.constant 0 : index
    %c0_104 = arith.constant 0 : index
    %269 = vector.load %arg11[%c0_103, %c0_104] : memref<64x256xf32, #tpu.memory_space<vmem>>, vector<64x256xf32>
    tpu.vector_store %arg11[%c0_103, %c0_104], %268 {strides = array<i32>} : memref<64x256xf32, #tpu.memory_space<vmem>>, vector<64x256xf32>,
    return
  }
  func.func @transform_0(%arg0: i32) -> (i32, i32) {
    %c0_i32 = arith.constant 0 : i32
    %c0_i32_0 = arith.constant 0 : i32
    %c0_i32_1 = arith.constant 0 : i32
    return %c0_i32, %c0_i32_0 : i32, i32
  }
  func.func @transform_1(%arg0: i32) -> (i32, i32) {
    %c0_i32 = arith.constant 0 : i32
    %c0_i32_0 = arith.constant 0 : i32
    %c0_i32_1 = arith.constant 0 : i32
    return %c0_i32, %c0_i32_0 : i32, i32
  }
  func.func @transform_2(%arg0: i32) -> (i32, i32) {
    %c0_i32 = arith.constant 0 : i32
    %c0_i32_0 = arith.constant 0 : i32
    %c0_i32_1 = arith.constant 0 : i32
    return %c0_i32, %c0_i32_0 : i32, i32
  }
  func.func @transform_3(%arg0: i32) -> (i32, i32) {
    %c0_i32 = arith.constant 0 : i32
    %c0_i32_0 = arith.constant 0 : i32
    %c0_i32_1 = arith.constant 0 : i32
    return %c0_i32, %c0_i32_0 : i32, i32
  }
  func.func @transform_4(%arg0: i32) -> (i32, i32) {
    %c0_i32 = arith.constant 0 : i32
    %c0_i32_0 = arith.constant 0 : i32
    %c0_i32_1 = arith.constant 0 : i32
    return %c0_i32, %c0_i32_0 : i32, i32
  }
  func.func @transform_5(%arg0: i32) -> (i32, i32) {
    %c0_i32 = arith.constant 0 : i32
    %c0_i32_0 = arith.constant 0 : i32
    %c0_i32_1 = arith.constant 0 : i32
    return %c0_i32, %c0_i32_0 : i32, i32
  }
  func.func @transform_6(%arg0: i32) -> (i32, i32) {
    %c0_i32 = arith.constant 0 : i32
    %c0_i32_0 = arith.constant 0 : i32
    %c0_i32_1 = arith.constant 0 : i32
    return %c0_i32, %c0_i32_0 : i32, i32
  }
  func.func @transform_7(%arg0: i32) -> (i32, i32) {
    %c0_i32 = arith.constant 0 : i32
    %c0_i32_0 = arith.constant 0 : i32
    %c0_i32_1 = arith.constant 0 : i32
    return %c0_i32, %c0_i32_0 : i32, i32
  }
  func.func @transform_8(%arg0: i32) -> (i32, i32) {
    %c0_i32 = arith.constant 0 : i32
    %c0_i32_0 = arith.constant 0 : i32
    %c0_i32_1 = arith.constant 0 : i32
    return %c0_i32, %c0_i32_0 : i32, i32
  }
  func.func @transform_9(%arg0: i32) -> (i32, i32) {
    %c0_i32 = arith.constant 0 : i32
    %c0_i32_0 = arith.constant 0 : i32
    %c0_i32_1 = arith.constant 0 : i32
    return %c0_i32, %c0_i32_0 : i32, i32
  }
  func.func @transform_10(%arg0: i32) -> (i32, i32) {
    %c0_i32 = arith.constant 0 : i32
    %c0_i32_0 = arith.constant 0 : i32
    %c0_i32_1 = arith.constant 0 : i32
    return %c0_i32, %c0_i32_0 : i32, i32
  }
}

</mosaic_0001>

<bundles_post_ra>
// kernel: tpu_custom_call.1
= control target key start
LH: loop header
LB: loop body
LE: loop exit
PB: predicated region body
PF: predicated region fallthrough
CT: control target
= control target key end

     0   :  { %15 = vsyncpa [#allocation5], 0  ;;  %s4278_s0 = inlined_call_operand.vmem [shape: f32[8,128], index: 0, kind: input, shape index: {}]   ;;  %s4279_s1 = inlined_call_operand.vmem [shape: s32[56,1], index: 1, kind: input, shape index: {}]   ;;  %s4280_s2 = inlined_call_operand.vmem [shape: f32[8,128], index: 2, kind: input, shape index: {}]   ;;  %s4281_s3 = inlined_call_operand.vmem [shape: f32[8,128], index: 3, kind: input, shape index: {}]   ;;  %s4282_s4 = inlined_call_operand.hbm [shape: f32[256,128], index: 4, kind: input, shape index: {}]   ;;  %s4283_s5 = inlined_call_operand.hbm [shape: f32[128,512], index: 5, kind: input, shape index: {}]   ;;  %s4284_s6 = inlined_call_operand.hbm [shape: f32[128,512], index: 6, kind: input, shape index: {}]   ;;  %s4285_s7 = inlined_call_operand.vmem [shape: f32[1,512], index: 7, kind: input, shape index: {}]   ;;  %s4286_s8 = inlined_call_operand.hbm [shape: f32[128,256], index: 8, kind: input, shape index: {}]   ;;  %s4287_s9 = inlined_call_operand.vmem [shape: f32[1,256], index: 9, kind: input, shape index: {}]   ;;  %s4288_s10 = inlined_call_operand.hbm [shape: f32[64,256], index: 10, kind: output, shape index: {}]  }
   0x1   :  { %16 = vsyncpa [#allocation8], 0 }
   0x2   :  { %17 = vsyncpa [#allocation11], 0  ;;  %s44_s15 = sshll.u32 %s4283_s5, 4  ;;  %s45_s15 = int_to_ptr.hbm [resolvable:$true] %s44_s15 }
   0x3   :  { %18 = vsyncpa [#allocation6], 0  ;;  %s2912_s16 = smov [#allocation7]   ;;  %s31_s20 = sshll.u32 %s4282_s4, 4  ;;  %s32_s20 = int_to_ptr.hbm [resolvable:$true] %s31_s20 }
   0x4   :  { %s46_s17 = sshll.u32 %s2912_s16, 4  ;;  %s2913_s21 = smov 512   ;;  %s47_s17 = int_to_ptr.vmem [resolvable:$true] %s46_s17 }
   0x5   :  { %s2914_s22 = smov 32   ;;  %s2915_s23 = smov [#allocation4]  }
   0x6   :  { %52 = dma.hbm_to_vmem [thread:$0]  %s45_s15, 8192, %s47_s17, [#allocation8], %s2913_s21, %s2913_s21, %s2914_s22  }
   0x7   :  { %s33_s24 = sshll.u32 %s2915_s23, 4  ;;  %s2916_s25 = smov 128   ;;  %s34_s24 = int_to_ptr.vmem [resolvable:$true] %s33_s24 }
   0x8   :  { %s2917_s26 = smov 8   ;;  %s57_s28 = sshll.u32 %s4284_s6, 4  ;;  %s58_s28 = int_to_ptr.hbm [resolvable:$true] %s57_s28 }
   0x9   :  { %39 = dma.hbm_to_vmem [thread:$0]  %s32_s20, 4096, %s34_s24, [#allocation5], %s2916_s25, %s2916_s25, %s2917_s26  }
   0xa   :  { %s2918_s29 = smov [#allocation9]   ;;  %s72_s12 = sshll.u32 %s4286_s8, 4  ;;  %s73_s12 = int_to_ptr.hbm [resolvable:$true] %s72_s12 }
   0xb   :  { %s59_s30 = sshll.u32 %s2918_s29, 4  ;;  %s2919_s13 = smov [#allocation10]   ;;  %s60_s30 = int_to_ptr.vmem [resolvable:$true] %s59_s30 }
   0xc   :  { %65 = dma.hbm_to_vmem [thread:$0]  %s58_s28, 8192, %s60_s30, [#allocation8], %s2913_s21, %s2913_s21, %s2914_s22  }
   0xd   :  { %s74_s14 = sshll.u32 %s2919_s13, 4  ;;  %s2920_s15 = smov 256   ;;  %s75_s14 = int_to_ptr.vmem [resolvable:$true] %s74_s14 }
   0xe   :  { %s2921_s16 = smov 16  }
   0xf   :  { %80 = dma.hbm_to_vmem [thread:$0]  %s73_s12, 4096, %s75_s14, [#allocation11], %s2920_s15, %s2920_s15, %s2921_s16  }
  0x10   :  { %2904 = dma.done.wait [#allocation5], 4096  }
  0x11   :  { %2905 = vsyncadd [#allocation5], 4294963200 }
  0x12   :  { %2906 = dma.done.wait [#allocation8], 16384  }
  0x13   :  { %2907 = vsyncadd [#allocation8], 4294950912 }
  0x14   :  { %2908 = dma.done.wait [#allocation11], 4096  }
  0x15   :  { %2909 = vsyncadd [#allocation11], 4294963200  ;;  %v2922_v0 = vmov 0   ;;  %v261_v1 = vld [vmem:[%s4279_s1] sm:$0xff]  ;;  %v263_v2 = vld [vmem:[%s4279_s1 + $0x10] sm:$0xff]  ;;  %v258_v40 = vlaneseq  ;;  %v2923_v44 = vmov 1.0  }
  0x16   :  { %2653 = vset.pattern.permute.xlu0 %v2922_v0  ;;  %2654 = vset.pattern.permute.xlu1 %v2922_v0  ;;  %v265_v3 = vld [vmem:[%s4279_s1 + $0x20] sm:$0xff]  ;;  %v346_v4 = vld [vmem:[#allocation4 + $0x78] sm:$0xff]  ;;  %v345_v6 = vld [vmem:[#allocation4 + $0x70] sm:$0xff]  ;;  %s2573_s17 = sshll.u32 %s4288_s10, 4  ;;  %s2574_s17 = int_to_ptr.hbm [resolvable:$true] %s2573_s17 }
  0x17   :  { %2655 = vset.pattern.permute.xlu2 %v2922_v0  ;;  %269 = vperm.xlu0 %2653, %v261_v1   ;;  %v362_v5 = vld [vmem:[#allocation4 + $0xf8] sm:$0xff]  ;;  %v361_v7 = vld [vmem:[#allocation4 + $0xf0] sm:$0xff]  ;;  %v344_v8 = vld [vmem:[#allocation4 + $0x68] sm:$0xff]  ;;  %v3016_v41 = vand.u32 127, %v258_v40 }
  0x18   :  { %275 = vperm.xlu1 %2654, %v263_v2   ;;  %281 = vperm.xlu2 %2655, %v265_v3   ;;  %v360_v9 = vld [vmem:[#allocation4 + $0xe8] sm:$0xff]  ;;  %v264_v11 = vld [vmem:[%s4279_s1 + $0x18] sm:$0xff]  ;;  %v343_v13 = vld [vmem:[#allocation4 + $0x60] sm:$0xff] }
  0x19   :  { %363 = vmatpush.msra.mxu0 %v346_v4  ;;  %401 = vmatpush.msra.mxu1 %v362_v5  ;;  %v262_v10 = vld [vmem:[%s4279_s1 + $0x8] sm:$0xff]  ;;  %v359_v14 = vld [vmem:[#allocation4 + $0xe0] sm:$0xff]  ;;  %v342_v15 = vld [vmem:[#allocation4 + $0x58] sm:$0xff]  ;;  %v3019_v42 = vadd.s32 128, %v3016_v41 }
  0x1a   :  { %v266_v12 = vld [vmem:[%s4279_s1 + $0x28] sm:$0xff]  ;;  %v358_v16 = vld [vmem:[#allocation4 + $0xd8] sm:$0xff]  ;;  %v341_v17 = vld [vmem:[#allocation4 + $0x50] sm:$0xff] }
  0x1b   :  { %364 = vmatpush.msra.mxu0 %v345_v6  ;;  %402 = vmatpush.msra.mxu1 %v361_v7  ;;  %v357_v18 = vld [vmem:[#allocation4 + $0xd0] sm:$0xff]  ;;  %v340_v19 = vld [vmem:[#allocation4 + $0x48] sm:$0xff]  ;;  %v339_v22 = vld [vmem:[#allocation4 + $0x40] sm:$0xff] }
  0x1c   :  { %v267_v20 = vld [vmem:[%s4279_s1 + $0x30] sm:$0xff]  ;;  %v356_v21 = vld [vmem:[#allocation4 + $0xc8] sm:$0xff]  ;;  %v355_v23 = vld [vmem:[#allocation4 + $0xc0] sm:$0xff] }
  0x1d   :  { %365 = vmatpush.msra.mxu0 %v344_v8  ;;  %403 = vmatpush.msra.mxu1 %v360_v9  ;;  %v338_v24 = vld [vmem:[#allocation4 + $0x38] sm:$0xff]  ;;  %v337_v26 = vld [vmem:[#allocation4 + $0x30] sm:$0xff]  ;;  %v336_v28 = vld [vmem:[#allocation4 + $0x28] sm:$0xff] }
  0x1e   :  { %v354_v25 = vld [vmem:[#allocation4 + $0xb8] sm:$0xff]  ;;  %v353_v27 = vld [vmem:[#allocation4 + $0xb0] sm:$0xff]  ;;  %v352_v29 = vld [vmem:[#allocation4 + $0xa8] sm:$0xff] }
  0x1f   :  { %272 = vperm.xlu0 %2653, %v262_v10   ;;  %366 = vmatpush.msra.mxu0 %v343_v13  ;;  %v335_v30 = vld [vmem:[#allocation4 + $0x20] sm:$0xff]  ;;  %v334_v32 = vld [vmem:[#allocation4 + $0x18] sm:$0xff]  ;;  %v333_v34 = vld [vmem:[#allocation4 + $0x10] sm:$0xff] }
  0x20   :  { %278 = vperm.xlu1 %2654, %v264_v11   ;;  %284 = vperm.xlu2 %2655, %v266_v12   ;;  %v351_v31 = vld [vmem:[#allocation4 + $0xa0] sm:$0xff]  ;;  %v350_v33 = vld [vmem:[#allocation4 + $0x98] sm:$0xff]  ;;  %v349_v35 = vld [vmem:[#allocation4 + $0x90] sm:$0xff] }
  0x21   :  { %404 = vmatpush.msra.mxu1 %v359_v14  ;;  %367 = vmatpush.msra.mxu0 %v342_v15  ;;  %v332_v36 = vld [vmem:[#allocation4 + $0x8] sm:$0xff]  ;;  %v331_v38 = vld [vmem:[#allocation4] sm:$0xff]  ;;  %v162_v10 = vld [vmem:[#allocation7 + $0x1f0] sm:$0xff] }
  0x22   :  { %v348_v37 = vld [vmem:[#allocation4 + $0x88] sm:$0xff]  ;;  %v347_v39 = vld [vmem:[#allocation4 + $0x80] sm:$0xff]  ;;  %v163_v11 = vld [vmem:[#allocation7 + $0x1f8] sm:$0xff] }
  0x23   :  { %405 = vmatpush.msra.mxu1 %v358_v16  ;;  %368 = vmatpush.msra.mxu0 %v341_v17  ;;  %v3025_v45 = vld [vmem:[#allocation7 + $0x1e0] sm:$0xff]  ;;  %v3027_v46 = vld [vmem:[#allocation7 + $0x1e8] sm:$0xff]  ;;  %v158_v15 = vld [vmem:[#allocation7 + $0x1d0] sm:$0xff] }
  0x24   :  { %v3029_v47 = vld [vmem:[#allocation7 + $0x1c0] sm:$0xff]  ;;  %174 = vmatpush.msra.mxu2 %v3025_v45  ;;  %194 = vmatpush.msra.mxu3 %v3027_v46  ;;  %v3033_v48 = vld [vmem:[#allocation7 + $0x1c8] sm:$0xff]  ;;  %v159_v16 = vld [vmem:[#allocation7 + $0x1d8] sm:$0xff] }
  0x25   :  { %406 = vmatpush.msra.mxu1 %v357_v18  ;;  %369 = vmatpush.msra.mxu0 %v340_v19  ;;  %v3035_v49 = vld [vmem:[#allocation7 + $0x1a0] sm:$0xff]  ;;  %v3037_v50 = vld [vmem:[#allocation7 + $0x1a8] sm:$0xff]  ;;  %v154_v19 = vld [vmem:[#allocation7 + $0x1b0] sm:$0xff] }
  0x26   :  { %175 = vmatpush.msra.mxu2 %v3029_v47  ;;  %195 = vmatpush.msra.mxu3 %v3033_v48  ;;  %v3047_v52 = vld [vmem:[#allocation7 + $0x180] sm:$0xff]  ;;  %v3049_v53 = vld [vmem:[#allocation7 + $0x188] sm:$0xff]  ;;  %v122_v40 = vld [vmem:[#allocation7 + $0xb0] sm:$0xff] }
  0x27   :  { %287 = vperm.xlu0 %2653, %v267_v20   ;;  %407 = vmatpush.msra.mxu1 %v356_v21  ;;  %v3051_v54 = vld [vmem:[#allocation7 + $0x160] sm:$0xff]  ;;  %v3055_v55 = vld [vmem:[#allocation7 + $0x168] sm:$0xff]  ;;  %v155_v20 = vld [vmem:[#allocation7 + $0x1b8] sm:$0xff] }
  0x28   :  { %370 = vmatpush.msra.mxu0 %v339_v22  ;;  %176 = vmatpush.msra.mxu2 %v3035_v49  ;;  %v3057_v57 = vld [vmem:[#allocation7 + $0x140] sm:$0xff]  ;;  %v3059_v58 = vld [vmem:[#allocation7 + $0x148] sm:$0xff] }
  0x29   :  { %408 = vmatpush.msra.mxu1 %v355_v23  ;;  %196 = vmatpush.msra.mxu3 %v3037_v50  ;;  %v3063_v59 = vld [vmem:[#allocation7 + $0x120] sm:$0xff]  ;;  %v3065_v60 = vld [vmem:[#allocation7 + $0x128] sm:$0xff] }
  0x2a   :  { %371 = vmatpush.msra.mxu0 %v338_v24  ;;  %177 = vmatpush.msra.mxu2 %v3047_v52  ;;  %v3075_v61 = vld [vmem:[#allocation7 + $0x100] sm:$0xff]  ;;  %v3077_v62 = vld [vmem:[#allocation7 + $0x108] sm:$0xff] }
  0x2b   :  { %409 = vmatpush.msra.mxu1 %v354_v25  ;;  %197 = vmatpush.msra.mxu3 %v3049_v53  ;;  %v3079_v63 = vld [vmem:[#allocation7 + $0xe0] sm:$0xff]  ;;  %v3083_v0 = vld [vmem:[#allocation7 + $0xe8] sm:$0xff]  ;;  %v150_v25 = vld [vmem:[#allocation7 + $0x190] sm:$0xff] }
  0x2c   :  { %372 = vmatpush.msra.mxu0 %v337_v26  ;;  %178 = vmatpush.msra.mxu2 %v3051_v54  ;;  %v3085_v1 = vld [vmem:[#allocation7 + $0xc0] sm:$0xff]  ;;  %v3087_v2 = vld [vmem:[#allocation7 + $0xc8] sm:$0xff]  ;;  %v151_v26 = vld [vmem:[#allocation7 + $0x198] sm:$0xff] }
  0x2d   :  { %410 = vmatpush.msra.mxu1 %v353_v27  ;;  %198 = vmatpush.msra.mxu3 %v3055_v55  ;;  %v3091_v4 = vld [vmem:[#allocation7 + $0xa0] sm:$0xff]  ;;  %v3093_v5 = vld [vmem:[#allocation7 + $0xa8] sm:$0xff]  ;;  %v146_v27 = vld [vmem:[#allocation7 + $0x170] sm:$0xff] }
  0x2e   :  { %373 = vmatpush.msra.mxu0 %v336_v28  ;;  %179 = vmatpush.msra.mxu2 %v3057_v57  ;;  %v3097_v6 = vld [vmem:[#allocation7 + $0x80] sm:$0xff]  ;;  %v3099_v7 = vld [vmem:[#allocation7 + $0x88] sm:$0xff]  ;;  %v147_v28 = vld [vmem:[#allocation7 + $0x178] sm:$0xff] }
  0x2f   :  { %411 = vmatpush.msra.mxu1 %v352_v29  ;;  %199 = vmatpush.msra.mxu3 %v3059_v58  ;;  %v3107_v8 = vld [vmem:[#allocation7 + $0x60] sm:$0xff]  ;;  %v3109_v9 = vld [vmem:[#allocation7 + $0x68] sm:$0xff]  ;;  %v142_v29 = vld [vmem:[#allocation7 + $0x150] sm:$0xff] }
  0x30   :  { %374 = vmatpush.msra.mxu0 %v335_v30  ;;  %180 = vmatpush.msra.mxu2 %v3063_v59  ;;  %v3113_v13 = vld [vmem:[#allocation7 + $0x40] sm:$0xff]  ;;  %v3115_v14 = vld [vmem:[#allocation7 + $0x48] sm:$0xff]  ;;  %v143_v30 = vld [vmem:[#allocation7 + $0x158] sm:$0xff] }
  0x31   :  { %412 = vmatpush.msra.mxu1 %v351_v31  ;;  %200 = vmatpush.msra.mxu3 %v3065_v60  ;;  %v3119_v17 = vld [vmem:[#allocation7 + $0x20] sm:$0xff]  ;;  %v3121_v18 = vld [vmem:[#allocation7 + $0x28] sm:$0xff]  ;;  %v138_v31 = vld [vmem:[#allocation7 + $0x130] sm:$0xff] }
  0x32   :  { %375 = vmatpush.msra.mxu0 %v334_v32  ;;  %181 = vmatpush.msra.mxu2 %v3075_v61  ;;  %v3127_v21 = vld [vmem:[#allocation7] sm:$0xff]  ;;  %v3129_v22 = vld [vmem:[#allocation7 + $0x8] sm:$0xff]  ;;  %v139_v32 = vld [vmem:[#allocation7 + $0x138] sm:$0xff] }
  0x33   :  { %413 = vmatpush.msra.mxu1 %v350_v33  ;;  %201 = vmatpush.msra.mxu3 %v3077_v62  ;;  %v3140_v23 = vld [vmem:[%s4278_s0] sm:$0xff] }
  0x34   :  { %376 = vmatpush.msra.mxu0 %v333_v34  ;;  %182 = vmatpush.msra.mxu2 %v3079_v63  ;;  %v134_v34 = vld [vmem:[#allocation7 + $0x110] sm:$0xff] }
  0x35   :  { %414 = vmatpush.msra.mxu1 %v349_v35  ;;  %202 = vmatpush.msra.mxu3 %v3083_v0  ;;  %v135_v35 = vld [vmem:[#allocation7 + $0x118] sm:$0xff] }
  0x36   :  { %377 = vmatpush.msra.mxu0 %v332_v36  ;;  %183 = vmatpush.msra.mxu2 %v3085_v1  ;;  %v130_v36 = vld [vmem:[#allocation7 + $0xf0] sm:$0xff] }
  0x37   :  { %415 = vmatpush.msra.mxu1 %v348_v37  ;;  %203 = vmatpush.msra.mxu3 %v3087_v2  ;;  %v131_v37 = vld [vmem:[#allocation7 + $0xf8] sm:$0xff] }
  0x38   :  { %378 = vmatpush.msra.mxu0 %v331_v38  ;;  %184 = vmatpush.msra.mxu2 %v3091_v4  ;;  %v126_v38 = vld [vmem:[#allocation7 + $0xd0] sm:$0xff] }
  0x39   :  { %416 = vmatpush.msra.mxu1 %v347_v39  ;;  %204 = vmatpush.msra.mxu3 %v3093_v5  ;;  %v127_v39 = vld [vmem:[#allocation7 + $0xd8] sm:$0xff] }
  0x3a   :  { %185 = vmatpush.msra.mxu2 %v3097_v6  ;;  %589 = vmatpush.msrb.mxu0 %v162_v10 }
  0x3b   :  { %205 = vmatpush.msra.mxu3 %v3099_v7  ;;  %627 = vmatpush.msrb.mxu1 %v163_v11 }
  0x3c   :  { %186 = vmatpush.msra.mxu2 %v3107_v8  ;;  %590 = vmatpush.msrb.mxu0 %v158_v15 }
  0x3d   :  { %206 = vmatpush.msra.mxu3 %v3109_v9  ;;  %628 = vmatpush.msrb.mxu1 %v159_v16 }
  0x3e   :  { %187 = vmatpush.msra.mxu2 %v3113_v13  ;;  %591 = vmatpush.msrb.mxu0 %v154_v19 }
  0x3f   :  { %207 = vmatpush.msra.mxu3 %v3115_v14  ;;  %629 = vmatpush.msrb.mxu1 %v155_v20 }
  0x40   :  { %188 = vmatpush.msra.mxu2 %v3119_v17  ;;  %592 = vmatpush.msrb.mxu0 %v150_v25 }
  0x41   :  { %208 = vmatpush.msra.mxu3 %v3121_v18  ;;  %630 = vmatpush.msrb.mxu1 %v151_v26 }
  0x42   :  { %189 = vmatpush.msra.mxu2 %v3127_v21  ;;  %593 = vmatpush.msrb.mxu0 %v146_v27 }
  0x43   :  { %209 = vmatpush.msra.mxu3 %v3129_v22  ;;  %190 = vmatmul.f32.vlgmr.msra.gmra.mxu2 %v3140_v23 }
  0x44   :  { %214 = vmatpush.msrb.mxu2 %v162_v10  ;;  %210 = vmatmul.f32.vlgmr.msra.gmra.mxu3 %v3140_v23  ;;  %v106_v10 = vld [vmem:[#allocation7 + $0x30] sm:$0xff] }
  0x45   :  { %234 = vmatpush.msrb.mxu3 %v163_v11  ;;  %631 = vmatpush.msrb.mxu1 %v147_v28  ;;  %v107_v11 = vld [vmem:[#allocation7 + $0x38] sm:$0xff] }
  0x46   :  { %215 = vmatpush.msrb.mxu2 %v158_v15  ;;  %594 = vmatpush.msrb.mxu0 %v142_v29  ;;  %v103_v15 = vld [vmem:[#allocation7 + $0x18] sm:$0xff] }
  0x47   :  { %235 = vmatpush.msrb.mxu3 %v159_v16  ;;  %632 = vmatpush.msrb.mxu1 %v143_v30 }
  0x48   :  { %216 = vmatpush.msrb.mxu2 %v154_v19  ;;  %595 = vmatpush.msrb.mxu0 %v138_v31  ;;  %v703_v19 = vld [vmem:[#allocation9 + $0x20] sm:$0xff] }
  0x49   :  { %236 = vmatpush.msrb.mxu3 %v155_v20  ;;  %633 = vmatpush.msrb.mxu1 %v139_v32  ;;  %v704_v20 = vld [vmem:[#allocation9 + $0x28] sm:$0xff] }
  0x4a   :  { %217 = vmatpush.msrb.mxu2 %v150_v25  ;;  %596 = vmatpush.msrb.mxu0 %v134_v34  ;;  %v3198_v25 = vld [vmem:[#allocation9 + $0x1d0] sm:$0xff] }
  0x4b   :  { %237 = vmatpush.msrb.mxu3 %v151_v26  ;;  %634 = vmatpush.msrb.mxu1 %v135_v35  ;;  %v3200_v26 = vld [vmem:[#allocation9 + $0x1d8] sm:$0xff] }
  0x4c   :  { %218 = vmatpush.msrb.mxu2 %v146_v27  ;;  %597 = vmatpush.msrb.mxu0 %v130_v36 }
  0x4d   :  { %238 = vmatpush.msrb.mxu3 %v147_v28  ;;  %635 = vmatpush.msrb.mxu1 %v131_v37 }
  0x4e   :  { %219 = vmatpush.msrb.mxu2 %v142_v29  ;;  %598 = vmatpush.msrb.mxu0 %v126_v38  ;;  %v3206_v29 = vld [vmem:[#allocation9 + $0x1b0] sm:$0xff] }
  0x4f   :  { %239 = vmatpush.msrb.mxu3 %v143_v30  ;;  %636 = vmatpush.msrb.mxu1 %v127_v39  ;;  %v3208_v30 = vld [vmem:[#allocation9 + $0x1b8] sm:$0xff] }
  0x50   :  { %220 = vmatpush.msrb.mxu2 %v138_v31  ;;  %599 = vmatpush.msrb.mxu0 %v122_v40 }
  0x51   :  { %240 = vmatpush.msrb.mxu3 %v139_v32  ;;  %v3212_v32 = vld [vmem:[#allocation9 + $0x190] sm:$0xff] }
  0x52   :  { %221 = vmatpush.msrb.mxu2 %v134_v34  ;;  %v3216_v34 = vld [vmem:[#allocation9 + $0x170] sm:$0xff] }
  0x53   :  { %241 = vmatpush.msrb.mxu3 %v135_v35  ;;  %v3218_v35 = vld [vmem:[#allocation9 + $0x178] sm:$0xff] }
  0x54   :  { %222 = vmatpush.msrb.mxu2 %v130_v36  ;;  %v3222_v36 = vld [vmem:[#allocation9 + $0x150] sm:$0xff] }
  0x55   :  { %242 = vmatpush.msrb.mxu3 %v131_v37  ;;  %v3224_v37 = vld [vmem:[#allocation9 + $0x158] sm:$0xff] }
  0x56   :  { %223 = vmatpush.msrb.mxu2 %v126_v38 }
  0x57   :  { %243 = vmatpush.msrb.mxu3 %v127_v39 }
  0x58   :  { %224 = vmatpush.msrb.mxu2 %v122_v40 }
  0x72   :  { %v282_v12 = vpop.permute.xlu2 %281 }
  0x73   :  { %vm297_vm8 = vcmp.eq.s32.totalorder %v3016_v41, %v282_v12  ;;  %vm298_vm9 = vcmp.eq.s32.totalorder %v3019_v42, %v282_v12  ;;  %v102_v12 = vld [vmem:[#allocation7 + $0x10] sm:$0xff] }
  0x7a   :  { %v285_v24 = vpop.permute.xlu2 %284 }
  0x7b   :  { %vm299_vm10 = vcmp.eq.s32.totalorder %v3016_v41, %v285_v24  ;;  %vm300_vm11 = vcmp.eq.s32.totalorder %v3019_v42, %v285_v24  ;;  %v3196_v24 = vld [vmem:[#allocation9 + $0x1f8] sm:$0xff] }
  0x89   :  { %v270_v43 = vpop.permute.xlu0 %269 }
  0x8a   :  { %vm289_vm0 = vcmp.eq.s32.totalorder %v3016_v41, %v270_v43  ;;  %vm290_vm1 = vcmp.eq.s32.totalorder %v3019_v42, %v270_v43  ;;  %v276_v56 = vpop.permute.xlu1 %275  ;;  %v119_v43 = vld [vmem:[#allocation7 + $0x98] sm:$0xff] }
  0x8b   :  { %2602 = vmatmul.msk.f32.vlgmr.msra.gmra.mxu0 %vm289_vm0, %v2923_v44  ;;  %2609 = vmatmul.msk.f32.vlgmr.msra.gmra.mxu1 %vm290_vm1, %v2923_v44  ;;  %vm293_vm4 = vcmp.eq.s32.totalorder %v3016_v41, %v276_v56  ;;  %vm294_vm5 = vcmp.eq.s32.totalorder %v3019_v42, %v276_v56  ;;  %v110_v56 = vld [vmem:[#allocation7 + $0x50] sm:$0xff] }
  0x91   :  { %v273_v51 = vpop.permute.xlu0 %272 }
  0x92   :  { %vm291_vm2 = vcmp.eq.s32.totalorder %v3016_v41, %v273_v51  ;;  %vm292_vm3 = vcmp.eq.s32.totalorder %v3019_v42, %v273_v51  ;;  %v279_v3 = vpop.permute.xlu1 %278  ;;  %v115_v51 = vld [vmem:[#allocation7 + $0x78] sm:$0xff] }
  0x93   :  { %2603 = vmatmul.msk.f32.gmra.mxu0 %vm291_vm2, %v2923_v44  ;;  %2610 = vmatmul.msk.f32.gmra.mxu1 %vm292_vm3, %v2923_v44  ;;  %vm295_vm6 = vcmp.eq.s32.totalorder %v3016_v41, %v279_v3  ;;  %vm296_vm7 = vcmp.eq.s32.totalorder %v3019_v42, %v279_v3  ;;  %v111_v3 = vld [vmem:[#allocation7 + $0x58] sm:$0xff] }
  0x99   :  { %v288_v33 = vpop.permute.xlu0 %287 }
  0x9a   :  { %vm301_vm12 = vcmp.eq.s32.totalorder %v3016_v41, %v288_v33  ;;  %vm302_vm13 = vcmp.eq.s32.totalorder %v3019_v42, %v288_v33  ;;  %v123_v41 = vld [vmem:[#allocation7 + $0xb8] sm:$0xff]  ;;  %v118_v42 = vld [vmem:[#allocation7 + $0x90] sm:$0xff] }
  0x9b   :  { %2604 = vmatmul.msk.f32.gmra.mxu0 %vm293_vm4, %v2923_v44  ;;  %2611 = vmatmul.msk.f32.gmra.mxu1 %vm294_vm5, %v2923_v44  ;;  %v3214_v33 = vld [vmem:[#allocation9 + $0x198] sm:$0xff] }
  0x9c   :  { %637 = vmatpush.msrb.mxu1 %v123_v41  ;;  %244 = vmatpush.msrb.mxu3 %v123_v41  ;;  %v3232_v41 = vld [vmem:[#allocation9 + $0x130] sm:$0xff] }
  0x9d   :  { %600 = vmatpush.msrb.mxu0 %v118_v42  ;;  %225 = vmatpush.msrb.mxu2 %v118_v42  ;;  %v3234_v42 = vld [vmem:[#allocation9 + $0x138] sm:$0xff] }
  0x9e   :  { %638 = vmatpush.msrb.mxu1 %v119_v43  ;;  %245 = vmatpush.msrb.mxu3 %v119_v43  ;;  %v3236_v43 = vld [vmem:[#allocation9 + $0x110] sm:$0xff] }
  0xa0   :  { %639 = vmatpush.msrb.mxu1 %v115_v51  ;;  %246 = vmatpush.msrb.mxu3 %v115_v51  ;;  %v3242_v51 = vld [vmem:[#allocation9 + $0xf0] sm:$0xff] }
  0xa2   :  { %640 = vmatpush.msrb.mxu1 %v111_v3  ;;  %247 = vmatpush.msrb.mxu3 %v111_v3 }
  0xa3   :  { %2605 = vmatmul.msk.f32.gmra.mxu0 %vm295_vm6, %v2923_v44  ;;  %2612 = vmatmul.msk.f32.gmra.mxu1 %vm296_vm7, %v2923_v44 }
  0xa4   :  { %641 = vmatpush.msrb.mxu1 %v107_v11  ;;  %248 = vmatpush.msrb.mxu3 %v107_v11 }
  0xa6   :  { %642 = vmatpush.msrb.mxu1 %v103_v15  ;;  %249 = vmatpush.msrb.mxu3 %v103_v15  ;;  %v3252_v15 = vld [vmem:[#allocation9 + $0xd8] sm:$0xff] }
  0xa7   :  { %250 = vmatmul.f32.vlgmr.msrb.gmra.mxu3 %v3140_v23 }
  0xa8   :  { %551 = vmatpush.msra.mxu3 %v3027_v46  ;;  %v3188_v46 = vld [vmem:[#allocation9 + $0x1e8] sm:$0xff] }
  0xa9   :  { %999 = vmatpush.msra.mxu1 %v3188_v46 }
  0xaa   :  { %552 = vmatpush.msra.mxu3 %v3033_v48  ;;  %v756_v48 = vld [vmem:[#allocation9 + $0x1c8] sm:$0xff] }
  0xab   :  { %2606 = vmatmul.msk.f32.gmra.mxu0 %vm297_vm8, %v2923_v44  ;;  %2613 = vmatmul.msk.f32.gmra.mxu1 %vm298_vm9, %v2923_v44 }
  0xac   :  { %553 = vmatpush.msra.mxu3 %v3037_v50  ;;  %1000 = vmatpush.msra.mxu1 %v756_v48  ;;  %v752_v50 = vld [vmem:[#allocation9 + $0x1a8] sm:$0xff] }
  0xae   :  { %554 = vmatpush.msra.mxu3 %v3049_v53  ;;  %v748_v53 = vld [vmem:[#allocation9 + $0x188] sm:$0xff]  ;;  %1001 = vmatpush.msra.mxu1 %v752_v50 }
  0xb0   :  { %555 = vmatpush.msra.mxu3 %v3055_v55  ;;  %v744_v55 = vld [vmem:[#allocation9 + $0x168] sm:$0xff]  ;;  %1002 = vmatpush.msra.mxu1 %v748_v53 }
  0xb2   :  { %556 = vmatpush.msra.mxu3 %v3059_v58  ;;  %v740_v58 = vld [vmem:[#allocation9 + $0x148] sm:$0xff]  ;;  %1003 = vmatpush.msra.mxu1 %v744_v55 }
  0xb3   :  { %2607 = vmatmul.msk.f32.gmra.mxu0 %vm299_vm10, %v2923_v44  ;;  %2614 = vmatmul.msk.f32.gmra.mxu1 %vm300_vm11, %v2923_v44 }
  0xb4   :  { %557 = vmatpush.msra.mxu3 %v3065_v60  ;;  %v736_v60 = vld [vmem:[#allocation9 + $0x128] sm:$0xff]  ;;  %1004 = vmatpush.msra.mxu1 %v740_v58 }
  0xb6   :  { %558 = vmatpush.msra.mxu3 %v3077_v62  ;;  %v732_v62 = vld [vmem:[#allocation9 + $0x108] sm:$0xff]  ;;  %1005 = vmatpush.msra.mxu1 %v736_v60 }
  0xb8   :  { %559 = vmatpush.msra.mxu3 %v3083_v0  ;;  %v728_v0 = vld [vmem:[#allocation9 + $0xe8] sm:$0xff]  ;;  %1006 = vmatpush.msra.mxu1 %v732_v62 }
  0xba   :  { %560 = vmatpush.msra.mxu3 %v3087_v2  ;;  %v724_v2 = vld [vmem:[#allocation9 + $0xc8] sm:$0xff]  ;;  %1007 = vmatpush.msra.mxu1 %v728_v0 }
  0xbb   :  { %2608 = vmatmul.msk.f32.gmra.mxu0 %vm301_vm12, %v2923_v44  ;;  %2615 = vmatmul.msk.f32.gmra.mxu1 %vm302_vm13, %v2923_v44  ;;  %v114_v44 = vld [vmem:[#allocation7 + $0x70] sm:$0xff] }
  0xbc   :  { %601 = vmatpush.msrb.mxu0 %v114_v44  ;;  %226 = vmatpush.msrb.mxu2 %v114_v44  ;;  %v3238_v44 = vld [vmem:[#allocation9 + $0x118] sm:$0xff] }
  0xbd   :  { %561 = vmatpush.msra.mxu3 %v3093_v5  ;;  %v720_v5 = vld [vmem:[#allocation9 + $0xa8] sm:$0xff]  ;;  %1008 = vmatpush.msra.mxu1 %v724_v2 }
  0xbe   :  { %602 = vmatpush.msrb.mxu0 %v110_v56  ;;  %227 = vmatpush.msrb.mxu2 %v110_v56  ;;  %v3244_v56 = vld [vmem:[#allocation9 + $0xf8] sm:$0xff] }
  0xbf   :  { %562 = vmatpush.msra.mxu3 %v3099_v7  ;;  %v716_v7 = vld [vmem:[#allocation9 + $0x88] sm:$0xff]  ;;  %1009 = vmatpush.msra.mxu1 %v720_v5 }
  0xc0   :  { %603 = vmatpush.msrb.mxu0 %v106_v10  ;;  %228 = vmatpush.msrb.mxu2 %v106_v10 }
  0xc1   :  { %563 = vmatpush.msra.mxu3 %v3109_v9  ;;  %v712_v9 = vld [vmem:[#allocation9 + $0x68] sm:$0xff]  ;;  %1010 = vmatpush.msra.mxu1 %v716_v7 }
  0xc2   :  { %604 = vmatpush.msrb.mxu0 %v102_v12  ;;  %229 = vmatpush.msrb.mxu2 %v102_v12  ;;  %v3250_v12 = vld [vmem:[#allocation9 + $0xd0] sm:$0xff] }
  0xc3   :  { %230 = vmatmul.f32.vlgmr.msrb.gmra.mxu2 %v3140_v23  ;;  %564 = vmatpush.msra.mxu3 %v3115_v14  ;;  %v708_v14 = vld [vmem:[#allocation9 + $0x48] sm:$0xff]  ;;  %v3194_v23 = vld [vmem:[#allocation9 + $0x1f0] sm:$0xff] }
  0xc4   :  { %513 = vmatpush.msra.mxu2 %v3025_v45  ;;  %v3186_v45 = vld [vmem:[#allocation9 + $0x1e0] sm:$0xff]  ;;  %1011 = vmatpush.msra.mxu1 %v712_v9 }
  0xc5   :  { %565 = vmatpush.msra.mxu3 %v3121_v18  ;;  %979 = vmatpush.msra.mxu0 %v3186_v45 }
  0xc6   :  { %514 = vmatpush.msra.mxu2 %v3029_v47  ;;  %v755_v47 = vld [vmem:[#allocation9 + $0x1c0] sm:$0xff]  ;;  %1012 = vmatpush.msra.mxu1 %v708_v14 }
  0xc7   :  { %566 = vmatpush.msra.mxu3 %v3129_v22  ;;  %980 = vmatpush.msra.mxu0 %v755_v47  ;;  %v700_v22 = vld [vmem:[#allocation9 + $0x8] sm:$0xff] }
  0xc8   :  { %515 = vmatpush.msra.mxu2 %v3035_v49  ;;  %v751_v49 = vld [vmem:[#allocation9 + $0x1a0] sm:$0xff]  ;;  %1013 = vmatpush.msra.mxu1 %v704_v20 }
  0xc9   :  { %783 = vmatpush.msrb.mxu3 %v3188_v46  ;;  %981 = vmatpush.msra.mxu0 %v751_v49 }
  0xca   :  { %516 = vmatpush.msra.mxu2 %v3047_v52  ;;  %v747_v52 = vld [vmem:[#allocation9 + $0x180] sm:$0xff]  ;;  %1014 = vmatpush.msra.mxu1 %v700_v22 }
  0xcb   :  { %784 = vmatpush.msrb.mxu3 %v756_v48  ;;  %982 = vmatpush.msra.mxu0 %v747_v52  ;;  %v3262_v48 = vld [vmem:[#allocation9 + $0x98] sm:$0xff] }
  0xcc   :  { %517 = vmatpush.msra.mxu2 %v3051_v54  ;;  %v743_v54 = vld [vmem:[#allocation9 + $0x160] sm:$0xff] }
  0xcd   :  { %785 = vmatpush.msrb.mxu3 %v752_v50  ;;  %983 = vmatpush.msra.mxu0 %v743_v54 }
  0xce   :  { %518 = vmatpush.msra.mxu2 %v3057_v57  ;;  %v739_v57 = vld [vmem:[#allocation9 + $0x140] sm:$0xff] }
  0xcf   :  { %786 = vmatpush.msrb.mxu3 %v748_v53  ;;  %984 = vmatpush.msra.mxu0 %v739_v57  ;;  %v3268_v53 = vld [vmem:[#allocation9 + $0x70] sm:$0xff] }
  0xd0   :  { %519 = vmatpush.msra.mxu2 %v3063_v59  ;;  %v735_v59 = vld [vmem:[#allocation9 + $0x120] sm:$0xff] }
  0xd1   :  { %787 = vmatpush.msrb.mxu3 %v744_v55  ;;  %985 = vmatpush.msra.mxu0 %v735_v59  ;;  %v3272_v55 = vld [vmem:[#allocation9 + $0x50] sm:$0xff] }
  0xd2   :  { %520 = vmatpush.msra.mxu2 %v3075_v61  ;;  %v731_v61 = vld [vmem:[#allocation9 + $0x100] sm:$0xff] }
  0xd3   :  { %788 = vmatpush.msrb.mxu3 %v740_v58  ;;  %986 = vmatpush.msra.mxu0 %v731_v61  ;;  %v3278_v58 = vld [vmem:[#allocation9 + $0x30] sm:$0xff] }
  0xd4   :  { %521 = vmatpush.msra.mxu2 %v3079_v63  ;;  %v727_v63 = vld [vmem:[#allocation9 + $0xe0] sm:$0xff] }
  0xd5   :  { %789 = vmatpush.msrb.mxu3 %v736_v60  ;;  %987 = vmatpush.msra.mxu0 %v727_v63 }
  0xd6   :  { %522 = vmatpush.msra.mxu2 %v3085_v1  ;;  %v723_v1 = vld [vmem:[#allocation9 + $0xc0] sm:$0xff] }
  0xd7   :  { %790 = vmatpush.msrb.mxu3 %v732_v62  ;;  %988 = vmatpush.msra.mxu0 %v723_v1 }
  0xd8   :  { %523 = vmatpush.msra.mxu2 %v3091_v4  ;;  %v719_v4 = vld [vmem:[#allocation9 + $0xa0] sm:$0xff] }
  0xd9   :  { %791 = vmatpush.msrb.mxu3 %v728_v0  ;;  %989 = vmatpush.msra.mxu0 %v719_v4  ;;  %v3288_v0 = vld [vmem:[#allocation9 + $0x18] sm:$0xff] }
  0xda   :  { %524 = vmatpush.msra.mxu2 %v3097_v6  ;;  %v715_v6 = vld [vmem:[#allocation9 + $0x80] sm:$0xff] }
  0xdb   :  { %792 = vmatpush.msrb.mxu3 %v724_v2  ;;  %990 = vmatpush.msra.mxu0 %v715_v6 }
  0xdc   :  { %525 = vmatpush.msra.mxu2 %v3107_v8  ;;  %v711_v8 = vld [vmem:[#allocation9 + $0x60] sm:$0xff] }
  0xdd   :  { %793 = vmatpush.msrb.mxu3 %v720_v5  ;;  %991 = vmatpush.msra.mxu0 %v711_v8  ;;  %v693_v5 = vld [vmem:[%s4280_s2] sm:$0xff] }
  0xde   :  { %526 = vmatpush.msra.mxu2 %v3113_v13  ;;  %v707_v13 = vld [vmem:[#allocation9 + $0x40] sm:$0xff] }
  0xdf   :  { %794 = vmatpush.msrb.mxu3 %v716_v7  ;;  %992 = vmatpush.msra.mxu0 %v707_v13  ;;  %v3355_v7 = vpop.f32.mrf.mxu3 }
  0xe0   :  { %527 = vmatpush.msra.mxu2 %v3119_v17 }
  0xe1   :  { %795 = vmatpush.msrb.mxu3 %v712_v9  ;;  %993 = vmatpush.msra.mxu0 %v703_v19 }
  0xe2   :  { %528 = vmatpush.msra.mxu2 %v3127_v21  ;;  %v699_v21 = vld [vmem:[#allocation9] sm:$0xff] }
  0xe3   :  { %796 = vmatpush.msrb.mxu3 %v708_v14  ;;  %994 = vmatpush.msra.mxu0 %v699_v21 }
  0xe4   :  { %763 = vmatpush.msrb.mxu2 %v3186_v45 }
  0xe5   :  { %797 = vmatpush.msrb.mxu3 %v704_v20 }
  0xe6   :  { %764 = vmatpush.msrb.mxu2 %v755_v47  ;;  %v3260_v47 = vld [vmem:[#allocation9 + $0x90] sm:$0xff] }
  0xe7   :  { %798 = vmatpush.msrb.mxu3 %v700_v22 }
  0xe8   :  { %765 = vmatpush.msrb.mxu2 %v751_v49 }
  0xea   :  { %766 = vmatpush.msrb.mxu2 %v747_v52 }
  0xec   :  { %767 = vmatpush.msrb.mxu2 %v743_v54  ;;  %v3270_v54 = vld [vmem:[#allocation9 + $0x78] sm:$0xff] }
  0xee   :  { %768 = vmatpush.msrb.mxu2 %v739_v57  ;;  %v3274_v57 = vld [vmem:[#allocation9 + $0x58] sm:$0xff] }
  0xf0   :  { %769 = vmatpush.msrb.mxu2 %v735_v59  ;;  %v3280_v59 = vld [vmem:[#allocation9 + $0x38] sm:$0xff] }
  0xf2   :  { %770 = vmatpush.msrb.mxu2 %v731_v61 }
  0xf4   :  { %771 = vmatpush.msrb.mxu2 %v727_v63  ;;  %v3286_v63 = vld [vmem:[#allocation9 + $0x10] sm:$0xff] }
  0xf6   :  { %772 = vmatpush.msrb.mxu2 %v723_v1 }
  0xf8   :  { %773 = vmatpush.msrb.mxu2 %v719_v4 }
  0xfa   :  { %774 = vmatpush.msrb.mxu2 %v715_v6  ;;  %v3353_v6 = vpop.f32.mrf.mxu2 }
  0xfc   :  { %775 = vmatpush.msrb.mxu2 %v711_v8 }
  0xfe   :  { %776 = vmatpush.msrb.mxu2 %v707_v13 }
 0x100   :  { %777 = vmatpush.msrb.mxu2 %v703_v19 }
 0x102   :  { %778 = vmatpush.msrb.mxu2 %v699_v21 }
 0x108   :  { %v380_v16 = vpop.f32.mrf.mxu0  ;;  %v418_v17 = vpop.f32.mrf.mxu1 }
 0x109   :  { %v419_v18 = vadd.f32 %v418_v17, %v380_v16  ;;  %v503_v16 = vld [vmem:[%s4285_s7] sm:$0xf] }
 0x10a   :  { %v3378_v19 = vperm.slane %v503_v16, 2  ;;  %v3380_v20 = vperm.slane %v503_v16, 3 }
 0x10b   :  { %529 = vmatmul.f32.vlgmr.msra.gmra.mxu2 %v419_v18  ;;  %567 = vmatmul.f32.vlgmr.msra.gmra.mxu3 %v419_v18 }
 0x10c   :  { %605 = vmatmul.f32.vlgmr.msrb.gmra.mxu0 %v419_v18  ;;  %643 = vmatmul.f32.vlgmr.msrb.gmra.mxu1 %v419_v18  ;;  %4318 = vst [vmem:[#allocation17_spill] sm:$0xff] %v3378_v19 }
 0x10d   :  { %803 = vmatpush.msra.mxu2 %v3194_v23  ;;  %823 = vmatpush.msra.mxu3 %v3196_v24  ;;  %4319 = vst [vmem:[#allocation18_spill] sm:$0xff] %v3380_v20 }
 0x10e   :  { %1195 = vmatpush.msrb.mxu0 %v3186_v45  ;;  %1215 = vmatpush.msrb.mxu1 %v3188_v46  ;;  %v3254_v45 = vld [vmem:[#allocation9 + $0xb0] sm:$0xff]  ;;  %v3256_v46 = vld [vmem:[#allocation9 + $0xb8] sm:$0xff] }
 0x10f   :  { %804 = vmatpush.msra.mxu2 %v3198_v25  ;;  %824 = vmatpush.msra.mxu3 %v3200_v26 }
 0x110   :  { %v383_v27 = vpop.f32.mrf.mxu0  ;;  %v421_v28 = vpop.f32.mrf.mxu1 }
 0x111   :  { %v422_v31 = vadd.f32 %v421_v28, %v383_v27  ;;  %805 = vmatpush.msra.mxu2 %v3206_v29  ;;  %825 = vmatpush.msra.mxu3 %v3208_v30 }
 0x113   :  { %532 = vmatmul.f32.gmra.mxu2 %v422_v31  ;;  %570 = vmatmul.f32.gmra.mxu3 %v422_v31 }
 0x114   :  { %608 = vmatmul.f32.gmra.mxu0 %v422_v31  ;;  %646 = vmatmul.f32.gmra.mxu1 %v422_v31 }
 0x115   :  { %806 = vmatpush.msra.mxu2 %v3212_v32  ;;  %826 = vmatpush.msra.mxu3 %v3214_v33 }
 0x117   :  { %807 = vmatpush.msra.mxu2 %v3216_v34  ;;  %827 = vmatpush.msra.mxu3 %v3218_v35 }
 0x118   :  { %v386_v38 = vpop.f32.mrf.mxu0  ;;  %v424_v39 = vpop.f32.mrf.mxu1 }
 0x119   :  { %v425_v40 = vadd.f32 %v424_v39, %v386_v38  ;;  %808 = vmatpush.msra.mxu2 %v3222_v36  ;;  %828 = vmatpush.msra.mxu3 %v3224_v37 }
 0x11b   :  { %535 = vmatmul.f32.gmra.mxu2 %v425_v40  ;;  %573 = vmatmul.f32.gmra.mxu3 %v425_v40 }
 0x11c   :  { %611 = vmatmul.f32.gmra.mxu0 %v425_v40  ;;  %649 = vmatmul.f32.gmra.mxu1 %v425_v40 }
 0x11d   :  { %809 = vmatpush.msra.mxu2 %v3232_v41  ;;  %829 = vmatpush.msra.mxu3 %v3234_v42 }
 0x11f   :  { %810 = vmatpush.msra.mxu2 %v3236_v43  ;;  %830 = vmatpush.msra.mxu3 %v3238_v44 }
 0x120   :  { %v389_v3 = vpop.f32.mrf.mxu0  ;;  %v427_v10 = vpop.f32.mrf.mxu1 }
 0x121   :  { %v428_v11 = vadd.f32 %v427_v10, %v389_v3  ;;  %811 = vmatpush.msra.mxu2 %v3242_v51  ;;  %831 = vmatpush.msra.mxu3 %v3244_v56 }
 0x123   :  { %538 = vmatmul.f32.gmra.mxu2 %v428_v11  ;;  %576 = vmatmul.f32.gmra.mxu3 %v428_v11 }
 0x124   :  { %614 = vmatmul.f32.gmra.mxu0 %v428_v11  ;;  %652 = vmatmul.f32.gmra.mxu1 %v428_v11 }
 0x125   :  { %812 = vmatpush.msra.mxu2 %v3250_v12  ;;  %832 = vmatpush.msra.mxu3 %v3252_v15 }
 0x127   :  { %813 = vmatpush.msra.mxu2 %v3254_v45  ;;  %833 = vmatpush.msra.mxu3 %v3256_v46 }
 0x128   :  { %v392_v49 = vpop.f32.mrf.mxu0  ;;  %v430_v50 = vpop.f32.mrf.mxu1 }
 0x129   :  { %v431_v52 = vadd.f32 %v430_v50, %v392_v49  ;;  %814 = vmatpush.msra.mxu2 %v3260_v47  ;;  %834 = vmatpush.msra.mxu3 %v3262_v48 }
 0x12a   :  { %v3365_v9 = vpop.f32.mrf.mxu3 }
 0x12b   :  { %541 = vmatmul.f32.gmra.mxu2 %v431_v52  ;;  %579 = vmatmul.f32.gmra.mxu3 %v431_v52 }
 0x12c   :  { %617 = vmatmul.f32.gmra.mxu0 %v431_v52  ;;  %655 = vmatmul.f32.gmra.mxu1 %v431_v52 }
 0x12d   :  { %815 = vmatpush.msra.mxu2 %v3268_v53  ;;  %835 = vmatpush.msra.mxu3 %v3270_v54 }
 0x12f   :  { %816 = vmatpush.msra.mxu2 %v3272_v55  ;;  %836 = vmatpush.msra.mxu3 %v3274_v57 }
 0x130   :  { %v395_v60 = vpop.f32.mrf.mxu0  ;;  %v433_v61 = vpop.f32.mrf.mxu1 }
 0x131   :  { %v434_v62 = vadd.f32 %v433_v61, %v395_v60  ;;  %817 = vmatpush.msra.mxu2 %v3278_v58  ;;  %837 = vmatpush.msra.mxu3 %v3280_v59 }
 0x133   :  { %544 = vmatmul.f32.gmra.mxu2 %v434_v62  ;;  %582 = vmatmul.f32.gmra.mxu3 %v434_v62 }
 0x134   :  { %620 = vmatmul.f32.gmra.mxu0 %v434_v62  ;;  %658 = vmatmul.f32.gmra.mxu1 %v434_v62 }
 0x135   :  { %818 = vmatpush.msra.mxu2 %v3286_v63  ;;  %838 = vmatpush.msra.mxu3 %v3288_v0 }
 0x138   :  { %v398_v1 = vpop.f32.mrf.mxu0  ;;  %v436_v2 = vpop.f32.mrf.mxu1 }
 0x139   :  { %v437_v4 = vadd.f32 %v436_v2, %v398_v1 }
 0x13b   :  { %547 = vmatmul.f32.gmra.mxu2 %v437_v4  ;;  %585 = vmatmul.f32.gmra.mxu3 %v437_v4 }
 0x13c   :  { %623 = vmatmul.f32.gmra.mxu0 %v437_v4  ;;  %661 = vmatmul.f32.gmra.mxu1 %v437_v4 }
 0x143   :  { %779 = vmatmul.f32.vlgmr.msrb.gmra.mxu2 %v693_v5  ;;  %799 = vmatmul.f32.vlgmr.msrb.gmra.mxu3 %v693_v5 }
 0x144   :  { %1019 = vmatpush.msrb.mxu2 %v3194_v23  ;;  %1039 = vmatpush.msrb.mxu3 %v3196_v24 }
 0x146   :  { %1020 = vmatpush.msrb.mxu2 %v3198_v25  ;;  %1040 = vmatpush.msrb.mxu3 %v3200_v26  ;;  %v3363_v8 = vpop.f32.mrf.mxu2 }
 0x148   :  { %1021 = vmatpush.msrb.mxu2 %v3206_v29  ;;  %1041 = vmatpush.msrb.mxu3 %v3208_v30 }
 0x14a   :  { %1022 = vmatpush.msrb.mxu2 %v3212_v32  ;;  %1042 = vmatpush.msrb.mxu3 %v3214_v33 }
 0x14b   :  { %819 = vmatmul.f32.vlgmr.msra.gmra.mxu2 %v693_v5  ;;  %839 = vmatmul.f32.vlgmr.msra.gmra.mxu3 %v693_v5 }
 0x14c   :  { %1023 = vmatpush.msrb.mxu2 %v3216_v34  ;;  %1043 = vmatpush.msrb.mxu3 %v3218_v35 }
 0x14e   :  { %1024 = vmatpush.msrb.mxu2 %v3222_v36  ;;  %1044 = vmatpush.msrb.mxu3 %v3224_v37 }
 0x150   :  { %1025 = vmatpush.msrb.mxu2 %v3232_v41  ;;  %1045 = vmatpush.msrb.mxu3 %v3234_v42 }
 0x152   :  { %1026 = vmatpush.msrb.mxu2 %v3236_v43  ;;  %1046 = vmatpush.msrb.mxu3 %v3238_v44 }
 0x154   :  { %1027 = vmatpush.msrb.mxu2 %v3242_v51  ;;  %1047 = vmatpush.msrb.mxu3 %v3244_v56 }
 0x156   :  { %1028 = vmatpush.msrb.mxu2 %v3250_v12  ;;  %1048 = vmatpush.msrb.mxu3 %v3252_v15 }
 0x158   :  { %1029 = vmatpush.msrb.mxu2 %v3254_v45  ;;  %1049 = vmatpush.msrb.mxu3 %v3256_v46 }
 0x15a   :  { %1030 = vmatpush.msrb.mxu2 %v3260_v47  ;;  %1050 = vmatpush.msrb.mxu3 %v3262_v48 }
 0x15c   :  { %1031 = vmatpush.msrb.mxu2 %v3268_v53  ;;  %1051 = vmatpush.msrb.mxu3 %v3270_v54 }
 0x15e   :  { %1032 = vmatpush.msrb.mxu2 %v3272_v55  ;;  %1052 = vmatpush.msrb.mxu3 %v3274_v57 }
 0x160   :  { %1033 = vmatpush.msrb.mxu2 %v3278_v58  ;;  %1053 = vmatpush.msrb.mxu3 %v3280_v59 }
 0x162   :  { %1034 = vmatpush.msrb.mxu2 %v3286_v63  ;;  %1054 = vmatpush.msrb.mxu3 %v3288_v0 }
 0x164   :  { %1235 = vmatpush.msra.mxu2 %v3194_v23  ;;  %1255 = vmatpush.msra.mxu3 %v3196_v24 }
 0x166   :  { %1236 = vmatpush.msra.mxu2 %v3198_v25  ;;  %1256 = vmatpush.msra.mxu3 %v3200_v26  ;;  %v3388_v25 = vperm.slane %v503_v16, 0  ;;  %v3390_v26 = vperm.slane %v503_v16, 1 }
 0x168   :  { %1237 = vmatpush.msra.mxu2 %v3206_v29  ;;  %1257 = vmatpush.msra.mxu3 %v3208_v30 }
 0x16a   :  { %1238 = vmatpush.msra.mxu2 %v3212_v32  ;;  %1258 = vmatpush.msra.mxu3 %v3214_v33 }
 0x16c   :  { %1239 = vmatpush.msra.mxu2 %v3216_v34  ;;  %1259 = vmatpush.msra.mxu3 %v3218_v35 }
 0x16e   :  { %1240 = vmatpush.msra.mxu2 %v3222_v36  ;;  %1260 = vmatpush.msra.mxu3 %v3224_v37 }
 0x170   :  { %1241 = vmatpush.msra.mxu2 %v3232_v41  ;;  %1261 = vmatpush.msra.mxu3 %v3234_v42 }
 0x172   :  { %1242 = vmatpush.msra.mxu2 %v3236_v43  ;;  %1262 = vmatpush.msra.mxu3 %v3238_v44 }
 0x174   :  { %1243 = vmatpush.msra.mxu2 %v3242_v51  ;;  %1263 = vmatpush.msra.mxu3 %v3244_v56 }
 0x176   :  { %1244 = vmatpush.msra.mxu2 %v3250_v12  ;;  %1264 = vmatpush.msra.mxu3 %v3252_v15 }
 0x178   :  { %1245 = vmatpush.msra.mxu2 %v3254_v45  ;;  %1265 = vmatpush.msra.mxu3 %v3256_v46 }
 0x17a   :  { %1246 = vmatpush.msra.mxu2 %v3260_v47  ;;  %1266 = vmatpush.msra.mxu3 %v3262_v48 }
 0x17c   :  { %1247 = vmatpush.msra.mxu2 %v3268_v53  ;;  %1267 = vmatpush.msra.mxu3 %v3270_v54 }
 0x17e   :  { %1248 = vmatpush.msra.mxu2 %v3272_v55  ;;  %1268 = vmatpush.msra.mxu3 %v3274_v57 }
 0x180   :  { %1249 = vmatpush.msra.mxu2 %v3278_v58  ;;  %1269 = vmatpush.msra.mxu3 %v3280_v59  ;;  %v164_v58 = vld [vmem:[%s4285_s7] sm:$0xf] }
 0x182   :  { %1250 = vmatpush.msra.mxu2 %v3286_v63  ;;  %1270 = vmatpush.msra.mxu3 %v3288_v0  ;;  %v166_v63 = vperm.slane %v164_v58, 0  ;;  %v167_v0 = vperm.slane %v164_v58, 1 }
 0x184   :  { %v192_v1 = vadd.f32 %v3353_v6, %v166_v63  ;;  %v212_v2 = vadd.f32 %v3355_v7, %v167_v0  ;;  %v168_v7 = vperm.slane %v164_v58, 2 }
 0x189   :  { %v3367_v13 = vpop.f32.mrf.mxu0  ;;  %v3369_v14 = vpop.f32.mrf.mxu1 }
 0x18e   :  { %v3374_v17 = vpop.f32.mrf.mxu2  ;;  %v3376_v18 = vpop.f32.mrf.mxu3 }
 0x191   :  { %v609_v21 = vpop.f32.mrf.mxu0  ;;  %v647_v22 = vpop.f32.mrf.mxu1 }
 0x192   :  { %v3383_v23 = vadd.f32 %v609_v21, %v3378_v19  ;;  %v3386_v24 = vadd.f32 %v647_v22, %v3380_v20  ;;  %v169_v22 = vperm.slane %v164_v58, 3 }
 0x196   :  { %v533_v27 = vpop.f32.mrf.mxu2  ;;  %v571_v28 = vpop.f32.mrf.mxu3 }
 0x197   :  { %v3393_v29 = vadd.f32 %v533_v27, %v3388_v25  ;;  %v3396_v30 = vadd.f32 %v571_v28, %v3390_v26 }
 0x199   :  { %v612_v31 = vpop.f32.mrf.mxu0  ;;  %v650_v32 = vpop.f32.mrf.mxu1 }
 0x19a   :  { %v3399_v33 = vadd.f32 %v612_v31, %v3378_v19  ;;  %v3402_v34 = vadd.f32 %v650_v32, %v3380_v20  ;;  %v252_v31 = vadd.f32 %v3365_v9, %v169_v22  ;;  %v694_v22 = vld [vmem:[%s4281_s3] sm:$0xff] }
 0x19c   :  { %4320 = vst [vmem:[#allocation19_spill] sm:$0xff] %v3399_v33 }
 0x19d   :  { %4321 = vst [vmem:[#allocation20_spill] sm:$0xff] %v3402_v34  ;;  %v3669_v34 = vld [vmem:[#allocation9 + $0xb0] sm:$0xff] }
 0x19e   :  { %v536_v35 = vpop.f32.mrf.mxu2  ;;  %v574_v36 = vpop.f32.mrf.mxu3 }
 0x19f   :  { %v3405_v37 = vadd.f32 %v536_v35, %v3388_v25  ;;  %v3408_v38 = vadd.f32 %v574_v36, %v3390_v26 }
 0x1a1   :  { %4322 = vst [vmem:[#allocation21_spill] sm:$0xff] %v3405_v37  ;;  %v615_v39 = vpop.f32.mrf.mxu0  ;;  %v653_v40 = vpop.f32.mrf.mxu1 }
 0x1a2   :  { %4323 = vst [vmem:[#allocation22_spill] sm:$0xff] %v3408_v38  ;;  %v3411_v41 = vadd.f32 %v615_v39, %v3378_v19  ;;  %v3414_v42 = vadd.f32 %v653_v40, %v3380_v20  ;;  %v3671_v38 = vld [vmem:[#allocation9 + $0xb8] sm:$0xff] }
 0x1a4   :  { %4324 = vst [vmem:[#allocation23_spill] sm:$0xff] %v3411_v41 }
 0x1a5   :  { %4325 = vst [vmem:[#allocation24_spill] sm:$0xff] %v3414_v42 }
 0x1a6   :  { %v539_v43 = vpop.f32.mrf.mxu2  ;;  %v577_v44 = vpop.f32.mrf.mxu3 }
 0x1a7   :  { %v3417_v51 = vadd.f32 %v539_v43, %v3388_v25  ;;  %v3420_v56 = vadd.f32 %v577_v44, %v3390_v26 }
 0x1a9   :  { %4326 = vst [vmem:[#allocation25_spill] sm:$0xff] %v3417_v51  ;;  %v618_v3 = vpop.f32.mrf.mxu0  ;;  %v656_v10 = vpop.f32.mrf.mxu1 }
 0x1aa   :  { %4327 = vst [vmem:[#allocation26_spill] sm:$0xff] %v3420_v56  ;;  %v3423_v11 = vadd.f32 %v618_v3, %v3378_v19  ;;  %v3426_v12 = vadd.f32 %v656_v10, %v3380_v20  ;;  %v232_v3 = vadd.f32 %v3363_v8, %v168_v7 }
 0x1ac   :  { %4328 = vst [vmem:[#allocation27_spill] sm:$0xff] %v3423_v11 }
 0x1ad   :  { %4329 = vst [vmem:[#allocation28_spill] sm:$0xff] %v3426_v12 }
 0x1ae   :  { %v542_v15 = vpop.f32.mrf.mxu2  ;;  %v580_v45 = vpop.f32.mrf.mxu3 }
 0x1af   :  { %v3429_v46 = vadd.f32 %v542_v15, %v3388_v25  ;;  %v3432_v47 = vadd.f32 %v580_v45, %v3390_v26 }
 0x1b1   :  { %4330 = vst [vmem:[#allocation29_spill] sm:$0xff] %v3429_v46  ;;  %v621_v48 = vpop.f32.mrf.mxu0  ;;  %v659_v49 = vpop.f32.mrf.mxu1 }
 0x1b2   :  { %4331 = vst [vmem:[#allocation30_spill] sm:$0xff] %v3432_v47  ;;  %v3435_v50 = vadd.f32 %v621_v48, %v3378_v19  ;;  %v3438_v52 = vadd.f32 %v659_v49, %v3380_v20 }
 0x1b4   :  { %4332 = vst [vmem:[#allocation31_spill] sm:$0xff] %v3435_v50 }
 0x1b5   :  { %4333 = vst [vmem:[#allocation32_spill] sm:$0xff] %v3438_v52 }
 0x1b6   :  { %v545_v53 = vpop.f32.mrf.mxu2  ;;  %v583_v54 = vpop.f32.mrf.mxu3 }
 0x1b7   :  { %v3441_v55 = vadd.f32 %v545_v53, %v3388_v25  ;;  %v3444_v57 = vadd.f32 %v583_v54, %v3390_v26 }
 0x1b9   :  { %4334 = vst [vmem:[#allocation33_spill] sm:$0xff] %v3441_v55 }
 0x1ba   :  { %4335 = vst [vmem:[#allocation34_spill] sm:$0xff] %v3444_v57 }
 0x1be   :  { %v548_v59 = vpop.f32.mrf.mxu2  ;;  %v586_v60 = vpop.f32.mrf.mxu3 }
 0x1bf   :  { %v3450_v61 = vadd.f32 %v548_v59, %v3388_v25  ;;  %v3453_v62 = vadd.f32 %v586_v60, %v3390_v26 }
 0x1c1   :  { %4336 = vst [vmem:[#allocation35_spill] sm:$0xff] %v3450_v61 }
 0x1c2   :  { %4337 = vst [vmem:[#allocation36_spill] sm:$0xff] %v3453_v62 }
 0x1c6   :  { %v780_v4 = vpop.f32.mrf.mxu2  ;;  %v800_v5 = vpop.f32.mrf.mxu3 }
 0x1c7   :  { %v843_v16 = vadd.f32 %v780_v4, %v192_v1  ;;  %v844_v21 = vadd.f32 %v800_v5, %v212_v2 }
 0x1c9   :  { %v2616_v27 = vmul.f32 -1.442695, %v843_v16  ;;  %v2617_v28 = vmul.f32 -1.442695, %v844_v21 }
 0x1cb   :  { %2656 = vpow2.f32 %v2616_v27 }
 0x1cc   :  { %2658 = vpow2.f32 %v2617_v28 }
 0x1ce   :  { %v840_v32 = vpop.f32.mrf.mxu3  ;;  %v820_v44 = vpop.f32.mrf.mxu2 }
 0x1cf   :  { %v846_v35 = vadd.f32 %v840_v32, %v252_v31  ;;  %v845_v45 = vadd.f32 %v820_v44, %v232_v3 }
 0x1d1   :  { %v2657_v36 = vpop.eup %2656  ;;  %v2618_v39 = vmul.f32 -1.442695, %v846_v35 }
 0x1d2   :  { %v2659_v40 = vpop.eup %2658  ;;  %v850_v43 = vadd.f32 1.0, %v2657_v36 }
 0x1d3   :  { %v869_v6 = vadd.f32 1.0, %v2659_v40  ;;  %2660 = vpow2.f32 %v2618_v39 }
 0x1d4   :  { %2662 = vrcp.f32 %v850_v43  ;;  %v862_v60 = vand.u32 2147483648, %v850_v43  ;;  %v860_v58 = vand.u32 2147483647, %v850_v43  ;;  %vm856_vm0 = vweird.f32 %v850_v43 }
 0x1d5   :  { %2664 = vrcp.f32 %v869_v6  ;;  %v881_v63 = vand.u32 2147483648, %v869_v6  ;;  %v879_v2 = vand.u32 2147483647, %v869_v6  ;;  %vm875_vm1 = vweird.f32 %v869_v6 }
 0x1d6   :  { %v863_v5 = vor.u32 1.1754944e-38, %v862_v60  ;;  %vm861_vm4 = vcmp.eq.f32.partialorder %v860_v58, 8.507059e+37  ;;  %v3479_v60 = vld [vmem:[#allocation9 + $0x1a8] sm:$0xff]  ;;  %v3489_v58 = vld [vmem:[#allocation9 + $0x160] sm:$0xff] }
 0x1d7   :  { %v882_v21 = vor.u32 1.1754944e-38, %v881_v63  ;;  %vm880_vm5 = vcmp.eq.f32.partialorder %v879_v2, 8.507059e+37  ;;  %v3483_v63 = vld [vmem:[#allocation9 + $0x180] sm:$0xff]  ;;  %v3495_v2 = vpop.f32.mrf.mxu0 }
 0x1d8   :  { %4339 = vst [vmem:[#allocation38_spill] sm:$0xff] %v3495_v2 }
 0x1d9   :  { %v2661_v10 = vpop.eup %2660 }
 0x1da   :  { %v2663_v15 = vpop.eup %2662  ;;  %v889_v48 = vadd.f32 1.0, %v2661_v10 }
 0x1db   :  { %v2665_v49 = vpop.eup %2664  ;;  %v852_v9 = vmul.f32 %v2663_v15, %v850_v43  ;;  %vm857_vm14 = vweird.f32 %v2663_v15 }
 0x1dc   :  { %v871_v53 = vmul.f32 %v2665_v49, %v869_v6  ;;  %2666 = vrcp.f32 %v889_v48  ;;  %vm876_vm15 = vweird.f32 %v2665_v49  ;;  %vm858_vm2 = vmor %vm856_vm0, %vm857_vm14  ;;  %v901_v3 = vand.u32 2147483648, %v889_v48 }
 0x1dd   :  { %v853_v54 = vsub.f32 1.0, %v852_v9  ;;  %2668 = vtanh.f32 %v845_v45  ;;  %vm877_vm3 = vmor %vm875_vm1, %vm876_vm15  ;;  %vm895_vm7 = vweird.f32 %v889_v48  ;;  %v899_v10 = vand.u32 2147483647, %v889_v48 }
 0x1de   :  { %v872_v59 = vsub.f32 1.0, %v871_v53  ;;  %v902_v45 = vor.u32 1.1754944e-38, %v901_v3  ;;  %v3539_v3 = vld [vmem:[#allocation9 + $0x80] sm:$0xff] }
 0x1df   :  { %v854_v0 = vmul.f32 %v2663_v15, %v853_v54  ;;  %vm900_vm9 = vcmp.eq.f32.partialorder %v899_v10, 8.507059e+37  ;;  %v3471_v54 = vld [vmem:[#allocation9 + $0x1c0] sm:$0xff]  ;;  %v3541_v10 = vld [vmem:[#allocation9 + $0x88] sm:$0xff] }
 0x1e0   :  { %v873_v1 = vmul.f32 %v2665_v49, %v872_v59  ;;  %v3473_v59 = vld [vmem:[#allocation9 + $0x1c8] sm:$0xff]  ;;  %1196 = vmatpush.msrb.mxu0 %v3471_v54  ;;  %4341 = vst [vmem:[#allocation40_spill] sm:$0xff] %v3541_v10 }
 0x1e1   :  { %v855_v8 = vadd.f32 %v2663_v15, %v854_v0  ;;  %1216 = vmatpush.msrb.mxu1 %v3473_v59  ;;  %v3485_v0 = vld [vmem:[#allocation9 + $0x188] sm:$0xff] }
 0x1e2   :  { %v2667_v4 = vpop.eup %2666  ;;  %v874_v16 = vadd.f32 %v2665_v49, %v873_v1  ;;  %v3491_v1 = vld [vmem:[#allocation9 + $0x168] sm:$0xff] }
 0x1e3   :  { %v859_v27 = vsel %vm858_vm2, %v2663_v15, %v855_v8  ;;  %v891_v28 = vmul.f32 %v2667_v4, %v889_v48  ;;  %v2669_v31 = vpop.eup %2668  ;;  %vm896_vm6 = vweird.f32 %v2667_v4  ;;  %v3477_v48 = vld [vmem:[#allocation9 + $0x1a0] sm:$0xff]  ;;  %1217 = vmatpush.msrb.mxu1 %v3479_v60  ;;  %v3497_v8 = vpop.f32.mrf.mxu1 }
 0x1e4   :  { %v864_v32 = vsel %vm861_vm4, %v863_v5, %v859_v27  ;;  %v878_v35 = vsel %vm877_vm3, %v2665_v49, %v874_v16  ;;  %vm897_vm8 = vmor %vm895_vm7, %vm896_vm6  ;;  %1197 = vmatpush.msrb.mxu0 %v3477_v48  ;;  %4340 = vst [vmem:[#allocation39_spill] sm:$0xff] %v3497_v8  ;;  %v3501_v5 = vld [vmem:[#allocation9 + $0x148] sm:$0xff]  ;;  %v3505_v16 = vld [vmem:[#allocation9 + $0x120] sm:$0xff] }
 0x1e5   :  { %v883_v36 = vsel %vm880_vm5, %v882_v21, %v878_v35  ;;  %v906_v39 = vmul.f32 %v2669_v31, %v864_v32  ;;  %v892_v40 = vsub.f32 1.0, %v891_v28  ;;  %1218 = vmatpush.msrb.mxu1 %v3485_v0  ;;  %v3507_v21 = vld [vmem:[#allocation9 + $0x128] sm:$0xff]  ;;  %v3517_v28 = vld [vmem:[#allocation9 + $0xe0] sm:$0xff]  ;;  %v531_v32 = vadd.f32 %v3374_v17, %v3388_v25 }
 0x1e6   :  { %v905_v43 = vmul.f32 %v883_v36, %v694_v22  ;;  %1198 = vmatpush.msrb.mxu0 %v3483_v63  ;;  %v3511_v22 = vld [vmem:[#allocation9 + $0x100] sm:$0xff]  ;;  %v3513_v27 = vld [vmem:[#allocation9 + $0x108] sm:$0xff]  ;;  %v569_v35 = vadd.f32 %v3376_v18, %v3390_v26 }
 0x1e7   :  { %v893_v6 = vmul.f32 %v2667_v4, %v892_v40  ;;  %1219 = vmatpush.msrb.mxu1 %v3491_v1  ;;  %v3519_v31 = vld [vmem:[#allocation9 + $0xe8] sm:$0xff]  ;;  %v3527_v40 = vld [vmem:[#allocation9 + $0xc0] sm:$0xff] }
 0x1e8   :  { %v3462_v7 = vadd.f32 %v906_v39, %v905_v43  ;;  %1199 = vmatpush.msrb.mxu0 %v3489_v58  ;;  %v3529_v43 = vld [vmem:[#allocation9 + $0xc8] sm:$0xff]  ;;  %v3533_v17 = vld [vmem:[#allocation9 + $0xa0] sm:$0xff] }
 0x1e9   :  { %v894_v44 = vadd.f32 %v2667_v4, %v893_v6  ;;  %1220 = vmatpush.msrb.mxu1 %v3501_v5  ;;  %v3535_v25 = vld [vmem:[#allocation9 + $0xa8] sm:$0xff] }
 0x1ea   :  { %2670 = vtanh.f32 %v3462_v7 }
 0x1eb   :  { %v898_v15 = vsel %vm897_vm8, %v2667_v4, %v894_v44  ;;  %v3499_v4 = vld [vmem:[#allocation9 + $0x140] sm:$0xff]  ;;  %1221 = vmatpush.msrb.mxu1 %v3507_v21 }
 0x1ec   :  { %v903_v9 = vsel %vm900_vm9, %v902_v45, %v898_v15  ;;  %1200 = vmatpush.msrb.mxu0 %v3499_v4  ;;  %v3543_v15 = vld [vmem:[#allocation9 + $0x60] sm:$0xff]  ;;  %v3547_v45 = vld [vmem:[#allocation9 + $0x68] sm:$0xff] }
 0x1ed   :  { %1222 = vmatpush.msrb.mxu1 %v3513_v27  ;;  %4342 = vst [vmem:[#allocation41_spill] sm:$0xff] %v3543_v15 }
 0x1ee   :  { %1201 = vmatpush.msrb.mxu0 %v3505_v16  ;;  %4343 = vst [vmem:[#allocation42_spill] sm:$0xff] %v3547_v45 }
 0x1ef   :  { %1223 = vmatpush.msrb.mxu1 %v3519_v31 }
 0x1f0   :  { %v2671_v49 = vpop.eup %2670  ;;  %1202 = vmatpush.msrb.mxu0 %v3511_v22 }
 0x1f1   :  { %v3465_v53 = vmul.f32 %v2671_v49, %v903_v9  ;;  %1224 = vmatpush.msrb.mxu1 %v3529_v43  ;;  %v645_v49 = vadd.f32 %v3369_v14, %v3380_v20  ;;  %v3551_v9 = vld [vmem:[#allocation9 + $0x40] sm:$0xff]  ;;  %v607_v20 = vadd.f32 %v3367_v13, %v3378_v19 }
 0x1f2   :  { %1203 = vmatpush.msrb.mxu0 %v3517_v28  ;;  %4344 = vst [vmem:[#allocation43_spill] sm:$0xff] %v3551_v9 }
 0x1f3   :  { %4338 = vst [vmem:[#allocation37_spill] sm:$0xff] %v3465_v53  ;;  %995 = vmatmul.f32.vlgmr.msra.gmra.mxu0 %v3465_v53  ;;  %1015 = vmatmul.f32.vlgmr.msra.gmra.mxu1 %v3465_v53 }
 0x1f4   :  { %1035 = vmatmul.f32.vlgmr.msrb.gmra.mxu2 %v3465_v53  ;;  %1055 = vmatmul.f32.vlgmr.msrb.gmra.mxu3 %v3465_v53 }
 0x1f5   :  { %1204 = vmatpush.msrb.mxu0 %v3527_v40  ;;  %1225 = vmatpush.msrb.mxu1 %v3535_v25 }
 0x1f7   :  { %1205 = vmatpush.msrb.mxu0 %v3533_v17  ;;  %1226 = vmatpush.msrb.mxu1 %v3541_v10 }
 0x1f9   :  { %1206 = vmatpush.msrb.mxu0 %v3539_v3  ;;  %1227 = vmatpush.msrb.mxu1 %v3547_v45 }
 0x1fb   :  { %1207 = vmatpush.msrb.mxu0 %v3543_v15 }
 0x1fd   :  { %1208 = vmatpush.msrb.mxu0 %v3551_v9 }
 0x270   :  { %v996_v36 = vpop.f32.mrf.mxu0  ;;  %v1016_v39 = vpop.f32.mrf.mxu1 }
 0x271   :  { %v1059_v6 = vadd.f32 %v996_v36, %v531_v32  ;;  %v1060_v44 = vadd.f32 %v1016_v39, %v569_v35  ;;  %v3553_v32 = vld [vmem:[#allocation9 + $0x48] sm:$0xff]  ;;  %v3557_v39 = vld [vmem:[#allocation9 + $0x20] sm:$0xff] }
 0x272   :  { %4345 = vst [vmem:[#allocation44_spill] sm:$0xff] %v3553_v32  ;;  %1228 = vmatpush.msrb.mxu1 %v3553_v32  ;;  %1209 = vmatpush.msrb.mxu0 %v3557_v39 }
 0x273   :  { %v2619_v18 = vmul.f32 -1.442695, %v1059_v6  ;;  %v2620_v26 = vmul.f32 -1.442695, %v1060_v44  ;;  %v3559_v6 = vld [vmem:[#allocation9 + $0x28] sm:$0xff]  ;;  %v3563_v44 = vld [vmem:[#allocation9] sm:$0xff] }
 0x274   :  { %1229 = vmatpush.msrb.mxu1 %v3559_v6  ;;  %1210 = vmatpush.msrb.mxu0 %v3563_v44 }
 0x275   :  { %2672 = vpow2.f32 %v2619_v18  ;;  %v3565_v18 = vld [vmem:[#allocation9 + $0x8] sm:$0xff] }
 0x276   :  { %2674 = vpow2.f32 %v2620_v26  ;;  %1230 = vmatpush.msrb.mxu1 %v3565_v18 }
 0x277   :  { %v1056_v35 = vpop.f32.mrf.mxu3 }
 0x278   :  { %v1062_v36 = vadd.f32 %v1056_v35, %v645_v49 }
 0x27a   :  { %v2621_v14 = vmul.f32 -1.442695, %v1062_v36  ;;  %v1036_v36 = vpop.f32.mrf.mxu2 }
 0x27b   :  { %v2673_v26 = vpop.eup %2672  ;;  %v1061_v53 = vadd.f32 %v1036_v36, %v607_v20 }
 0x27c   :  { %v2675_v2 = vpop.eup %2674  ;;  %v1066_v49 = vadd.f32 1.0, %v2673_v26  ;;  %2676 = vpow2.f32 %v2621_v14 }
 0x27d   :  { %v1085_v35 = vadd.f32 1.0, %v2675_v2 }
 0x27e   :  { %2678 = vrcp.f32 %v1066_v49  ;;  %v1078_v57 = vand.u32 2147483648, %v1066_v49  ;;  %v1076_v12 = vand.u32 2147483647, %v1066_v49  ;;  %vm1072_vm12 = vweird.f32 %v1066_v49 }
 0x27f   :  { %2680 = vrcp.f32 %v1085_v35  ;;  %v1097_v55 = vand.u32 2147483648, %v1085_v35  ;;  %v1095_v46 = vand.u32 2147483647, %v1085_v35  ;;  %vm1091_vm13 = vweird.f32 %v1085_v35 }
 0x280   :  { %v1079_v20 = vor.u32 1.1754944e-38, %v1078_v57  ;;  %vm1077_vm0 = vcmp.eq.f32.partialorder %v1076_v12, 8.507059e+37 }
 0x281   :  { %vm1096_vm1 = vcmp.eq.f32.partialorder %v1095_v46, 8.507059e+37 }
 0x282   :  { %v2677_v8 = vpop.eup %2676 }
 0x283   :  { %v1105_v62 = vadd.f32 1.0, %v2677_v8 }
 0x284   :  { %v2679_v61 = vpop.eup %2678 }
 0x285   :  { %v2681_v50 = vpop.eup %2680  ;;  %v1068_v52 = vmul.f32 %v2679_v61, %v1066_v49  ;;  %2682 = vrcp.f32 %v1105_v62  ;;  %vm1073_vm10 = vweird.f32 %v2679_v61  ;;  %vm1111_vm3 = vweird.f32 %v1105_v62 }
 0x286   :  { %v1087_v26 = vmul.f32 %v2681_v50, %v1085_v35  ;;  %2684 = vtanh.f32 %v1061_v53  ;;  %vm1092_vm11 = vweird.f32 %v2681_v50  ;;  %vm1074_vm14 = vmor %vm1072_vm12, %vm1073_vm10 }
 0x287   :  { %v1069_v14 = vsub.f32 1.0, %v1068_v52  ;;  %vm1093_vm15 = vmor %vm1091_vm13, %vm1092_vm11  ;;  %v1098_v52 = vor.u32 1.1754944e-38, %v1097_v55  ;;  %v1115_v55 = vand.u32 2147483647, %v1105_v62 }
 0x288   :  { %v1088_v2 = vsub.f32 1.0, %v1087_v26 }
 0x289   :  { %v1070_v11 = vmul.f32 %v2679_v61, %v1069_v14  ;;  %vm1116_vm5 = vcmp.eq.f32.partialorder %v1115_v55, 8.507059e+37  ;;  %v3653_v55 = vld [vmem:[#allocation9 + $0xf8] sm:$0xff] }
 0x28a   :  { %v1089_v47 = vmul.f32 %v2681_v50, %v1088_v2  ;;  %4349 = vst [vmem:[#allocation48_spill] sm:$0xff] %v3653_v55 }
 0x28b   :  { %v2683_v41 = vpop.eup %2682  ;;  %v1071_v13 = vadd.f32 %v2679_v61, %v1070_v11 }
 0x28c   :  { %v1090_v8 = vadd.f32 %v2681_v50, %v1089_v47  ;;  %v1107_v36 = vmul.f32 %v2683_v41, %v1105_v62  ;;  %v2685_v53 = vpop.eup %2684  ;;  %vm1112_vm2 = vweird.f32 %v2683_v41  ;;  %v1117_v47 = vand.u32 2147483648, %v1105_v62  ;;  %v3597_v62 = vld [vmem:[#allocation9 + $0x1d8] sm:$0xff] }
 0x28d   :  { %v1075_v26 = vsel %vm1074_vm14, %v2679_v61, %v1071_v13  ;;  %vm1113_vm4 = vmor %vm1111_vm3, %vm1112_vm2  ;;  %v3605_v13 = vld [vmem:[#allocation9 + $0x1b8] sm:$0xff] }
 0x28e   :  { %v1080_v19 = vsel %vm1077_vm0, %v1079_v20, %v1075_v26  ;;  %v1094_v14 = vsel %vm1093_vm15, %v2681_v50, %v1090_v8  ;;  %v1108_v42 = vsub.f32 1.0, %v1107_v36  ;;  %v1118_v57 = vor.u32 1.1754944e-38, %v1117_v47  ;;  %v3611_v20 = vld [vmem:[#allocation9 + $0x190] sm:$0xff]  ;;  %v3613_v8 = vld [vmem:[#allocation9 + $0x198] sm:$0xff] }
 0x28f   :  { %v1099_v2 = vsel %vm1096_vm1, %v1098_v52, %v1094_v14  ;;  %v1122_v56 = vmul.f32 %v2685_v53, %v1080_v19  ;;  %v3583_v19 = vld [vmem:[#allocation9 + $0x1e0] sm:$0xff]  ;;  %v3619_v36 = vld [vmem:[#allocation9 + $0x170] sm:$0xff]  ;;  %v3621_v52 = vld [vmem:[#allocation9 + $0x178] sm:$0xff] }
 0x290   :  { %v1121_v51 = vmul.f32 %v1099_v2, %v3462_v7  ;;  %v1109_v11 = vmul.f32 %v2683_v41, %v1108_v42  ;;  %v3585_v42 = vld [vmem:[#allocation9 + $0x1e8] sm:$0xff]  ;;  %1411 = vmatpush.msra.mxu0 %v3583_v19  ;;  %v3603_v7 = vld [vmem:[#allocation9 + $0x1b0] sm:$0xff]  ;;  %v3629_v53 = vld [vmem:[#allocation9 + $0x158] sm:$0xff] }
 0x291   :  { %4347 = vst [vmem:[#allocation46_spill] sm:$0xff] %v3585_v42  ;;  %1431 = vmatpush.msra.mxu1 %v3585_v42  ;;  %v3627_v26 = vld [vmem:[#allocation9 + $0x150] sm:$0xff]  ;;  %v3637_v2 = vld [vmem:[#allocation9 + $0x138] sm:$0xff] }
 0x292   :  { %v3574_v49 = vadd.f32 %v1122_v56, %v1121_v51  ;;  %v1110_v35 = vadd.f32 %v2683_v41, %v1109_v11  ;;  %v3587_v51 = vld [vmem:[#allocation9 + $0x1f0] sm:$0xff]  ;;  %1412 = vmatpush.msra.mxu0 %v3471_v54 }
 0x293   :  { %4348 = vst [vmem:[#allocation47_spill] sm:$0xff] %v3587_v51  ;;  %1451 = vmatpush.msrb.mxu2 %v3587_v51  ;;  %v3595_v56 = vld [vmem:[#allocation9 + $0x1d0] sm:$0xff]  ;;  %1432 = vmatpush.msra.mxu1 %v3473_v59 }
 0x294   :  { %2686 = vtanh.f32 %v3574_v49  ;;  %v1114_v12 = vsel %vm1113_vm4, %v2683_v41, %v1110_v35  ;;  %v3591_v41 = vld [vmem:[#allocation9 + $0x1f8] sm:$0xff]  ;;  %1413 = vmatpush.msra.mxu0 %v3477_v48  ;;  %v3635_v14 = vld [vmem:[#allocation9 + $0x130] sm:$0xff] }
 0x295   :  { %v1119_v50 = vsel %vm1116_vm5, %v1118_v57, %v1114_v12  ;;  %1471 = vmatpush.msrb.mxu3 %v3591_v41  ;;  %1452 = vmatpush.msrb.mxu2 %v3595_v56  ;;  %v3643_v11 = vld [vmem:[#allocation9 + $0x110] sm:$0xff]  ;;  %v3645_v35 = vld [vmem:[#allocation9 + $0x118] sm:$0xff] }
 0x296   :  { %1433 = vmatpush.msra.mxu1 %v3479_v60  ;;  %1414 = vmatpush.msra.mxu0 %v3483_v63  ;;  %v3651_v47 = vld [vmem:[#allocation9 + $0xf0] sm:$0xff] }
 0x297   :  { %1472 = vmatpush.msrb.mxu3 %v3597_v62  ;;  %1453 = vmatpush.msrb.mxu2 %v3603_v7 }
 0x298   :  { %1434 = vmatpush.msra.mxu1 %v3485_v0  ;;  %1415 = vmatpush.msra.mxu0 %v3489_v58 }
 0x299   :  { %1473 = vmatpush.msrb.mxu3 %v3605_v13  ;;  %1454 = vmatpush.msrb.mxu2 %v3611_v20 }
 0x29a   :  { %v2687_v46 = vpop.eup %2686  ;;  %1435 = vmatpush.msra.mxu1 %v3491_v1  ;;  %1416 = vmatpush.msra.mxu0 %v3499_v4 }
 0x29b   :  { %v3577_v61 = vmul.f32 %v2687_v46, %v1119_v50  ;;  %1474 = vmatpush.msrb.mxu3 %v3613_v8  ;;  %1455 = vmatpush.msrb.mxu2 %v3619_v36  ;;  %v3659_v46 = vld [vmem:[#allocation9 + $0xd0] sm:$0xff]  ;;  %v3661_v50 = vld [vmem:[#allocation9 + $0xd8] sm:$0xff] }
 0x29c   :  { %1436 = vmatpush.msra.mxu1 %v3501_v5  ;;  %1417 = vmatpush.msra.mxu0 %v3505_v16 }
 0x29d   :  { %4346 = vst [vmem:[#allocation45_spill] sm:$0xff] %v3577_v61  ;;  %1211 = vmatmul.f32.vlgmr.msrb.gmra.mxu0 %v3577_v61  ;;  %1231 = vmatmul.f32.vlgmr.msrb.gmra.mxu1 %v3577_v61 }
 0x29e   :  { %1251 = vmatmul.f32.vlgmr.msra.gmra.mxu2 %v3577_v61  ;;  %1271 = vmatmul.f32.vlgmr.msra.gmra.mxu3 %v3577_v61 }
 0x29f   :  { %1475 = vmatpush.msrb.mxu3 %v3621_v52  ;;  %1456 = vmatpush.msrb.mxu2 %v3627_v26 }
 0x2a0   :  { %1437 = vmatpush.msra.mxu1 %v3507_v21  ;;  %1418 = vmatpush.msra.mxu0 %v3511_v22 }
 0x2a1   :  { %1476 = vmatpush.msrb.mxu3 %v3629_v53  ;;  %1457 = vmatpush.msrb.mxu2 %v3635_v14 }
 0x2a2   :  { %1438 = vmatpush.msra.mxu1 %v3513_v27  ;;  %1419 = vmatpush.msra.mxu0 %v3517_v28 }
 0x2a3   :  { %1477 = vmatpush.msrb.mxu3 %v3637_v2  ;;  %1458 = vmatpush.msrb.mxu2 %v3643_v11 }
 0x2a4   :  { %1439 = vmatpush.msra.mxu1 %v3519_v31  ;;  %1420 = vmatpush.msra.mxu0 %v3527_v40 }
 0x2a5   :  { %1478 = vmatpush.msrb.mxu3 %v3645_v35  ;;  %1459 = vmatpush.msrb.mxu2 %v3651_v47 }
 0x2a6   :  { %1440 = vmatpush.msra.mxu1 %v3529_v43  ;;  %1421 = vmatpush.msra.mxu0 %v3533_v17 }
 0x2a7   :  { %1479 = vmatpush.msrb.mxu3 %v3653_v55  ;;  %1460 = vmatpush.msrb.mxu2 %v3659_v46 }
 0x2a8   :  { %1441 = vmatpush.msra.mxu1 %v3535_v25  ;;  %1422 = vmatpush.msra.mxu0 %v3539_v3 }
 0x2a9   :  { %1480 = vmatpush.msrb.mxu3 %v3661_v50  ;;  %1461 = vmatpush.msrb.mxu2 %v3669_v34 }
 0x2aa   :  { %1442 = vmatpush.msra.mxu1 %v3541_v10  ;;  %1423 = vmatpush.msra.mxu0 %v3543_v15 }
 0x2ab   :  { %1481 = vmatpush.msrb.mxu3 %v3671_v38 }
 0x2ac   :  { %1443 = vmatpush.msra.mxu1 %v3547_v45  ;;  %1424 = vmatpush.msra.mxu0 %v3551_v9 }
 0x2ae   :  { %1444 = vmatpush.msra.mxu1 %v3553_v32  ;;  %1425 = vmatpush.msra.mxu0 %v3557_v39 }
 0x2b0   :  { %1445 = vmatpush.msra.mxu1 %v3559_v6  ;;  %1426 = vmatpush.msra.mxu0 %v3563_v44 }
 0x2b2   :  { %1446 = vmatpush.msra.mxu1 %v3565_v18  ;;  %1627 = vmatpush.msrb.mxu0 %v3583_v19 }
 0x2b4   :  { %1647 = vmatpush.msrb.mxu1 %v3585_v42  ;;  %1628 = vmatpush.msrb.mxu0 %v3471_v54 }
 0x2b6   :  { %1648 = vmatpush.msrb.mxu1 %v3473_v59  ;;  %1629 = vmatpush.msrb.mxu0 %v3477_v48 }
 0x2b8   :  { %1649 = vmatpush.msrb.mxu1 %v3479_v60  ;;  %1630 = vmatpush.msrb.mxu0 %v3483_v63 }
 0x2ba   :  { %1650 = vmatpush.msrb.mxu1 %v3485_v0  ;;  %1631 = vmatpush.msrb.mxu0 %v3489_v58 }
 0x2bc   :  { %1651 = vmatpush.msrb.mxu1 %v3491_v1  ;;  %1632 = vmatpush.msrb.mxu0 %v3499_v4 }
 0x2be   :  { %1652 = vmatpush.msrb.mxu1 %v3501_v5  ;;  %1633 = vmatpush.msrb.mxu0 %v3505_v16 }
 0x2c0   :  { %1653 = vmatpush.msrb.mxu1 %v3507_v21  ;;  %1634 = vmatpush.msrb.mxu0 %v3511_v22 }
 0x2c2   :  { %1654 = vmatpush.msrb.mxu1 %v3513_v27  ;;  %1635 = vmatpush.msrb.mxu0 %v3517_v28  ;;  %v4351_v27 = vld [vmem:[#allocation48_spill] sm:$0xff] }
 0x2c4   :  { %1655 = vmatpush.msrb.mxu1 %v3519_v31  ;;  %1636 = vmatpush.msrb.mxu0 %v3527_v40 }
 0x2c6   :  { %1656 = vmatpush.msrb.mxu1 %v3529_v43  ;;  %1637 = vmatpush.msrb.mxu0 %v3533_v17  ;;  %v4352_v43 = vld [vmem:[#allocation40_spill] sm:$0xff] }
 0x2c8   :  { %1657 = vmatpush.msrb.mxu1 %v3535_v25  ;;  %1638 = vmatpush.msrb.mxu0 %v3539_v3  ;;  %v4356_v3 = vld [vmem:[#allocation43_spill] sm:$0xff] }
 0x2ca   :  { %1658 = vmatpush.msrb.mxu1 %v4352_v43 }
 0x31a   :  { %v1212_v12 = vpop.f32.mrf.mxu0  ;;  %v1232_v57 = vpop.f32.mrf.mxu1 }
 0x31b   :  { %v1275_v61 = vadd.f32 %v1212_v12, %v3393_v29  ;;  %v1276_v33 = vadd.f32 %v1232_v57, %v3396_v30  ;;  %v3677_v29 = vld [vmem:[#allocation9 + $0x90] sm:$0xff]  ;;  %v3679_v30 = vld [vmem:[#allocation9 + $0x98] sm:$0xff] }
 0x31c   :  { %4350 = vst [vmem:[#allocation49_spill] sm:$0xff] %v3679_v30  ;;  %v3683_v12 = vld [vmem:[#allocation9 + $0x70] sm:$0xff]  ;;  %1462 = vmatpush.msrb.mxu2 %v3677_v29  ;;  %1482 = vmatpush.msrb.mxu3 %v3679_v30  ;;  %v3702_v30 = vld [vmem:[#allocation9 + $0x38] sm:$0xff] }
 0x31d   :  { %v2622_v37 = vmul.f32 -1.442695, %v1275_v61  ;;  %v2623_v55 = vmul.f32 -1.442695, %v1276_v33  ;;  %v3685_v33 = vld [vmem:[#allocation9 + $0x78] sm:$0xff]  ;;  %v3691_v57 = vld [vmem:[#allocation9 + $0x50] sm:$0xff] }
 0x31e   :  { %1463 = vmatpush.msrb.mxu2 %v3683_v12  ;;  %1483 = vmatpush.msrb.mxu3 %v3685_v33 }
 0x31f   :  { %2688 = vpow2.f32 %v2622_v37  ;;  %v3693_v37 = vld [vmem:[#allocation9 + $0x58] sm:$0xff] }
 0x320   :  { %2690 = vpow2.f32 %v2623_v55  ;;  %v3700_v55 = vld [vmem:[#allocation9 + $0x30] sm:$0xff]  ;;  %1464 = vmatpush.msrb.mxu2 %v3691_v57  ;;  %1484 = vmatpush.msrb.mxu3 %v3693_v37 }
 0x321   :  { %v1272_v61 = vpop.f32.mrf.mxu3 }
 0x322   :  { %v1278_v10 = vadd.f32 %v1272_v61, %v3386_v24  ;;  %v3708_v24 = vld [vmem:[#allocation9 + $0x10] sm:$0xff]  ;;  %v3710_v61 = vld [vmem:[#allocation9 + $0x18] sm:$0xff]  ;;  %1465 = vmatpush.msrb.mxu2 %v3700_v55  ;;  %1485 = vmatpush.msrb.mxu3 %v3702_v30 }
 0x323   :  { %v4353_v17 = vld [vmem:[#allocation49_spill] sm:$0xff] }
 0x324   :  { %v2624_v15 = vmul.f32 -1.442695, %v1278_v10  ;;  %1466 = vmatpush.msrb.mxu2 %v3708_v24  ;;  %1486 = vmatpush.msrb.mxu3 %v3710_v61 }
 0x325   :  { %v2689_v45 = vpop.eup %2688 }
 0x326   :  { %v2691_v9 = vpop.eup %2690  ;;  %v3712_v32 = vadd.f32 1.0, %v2689_v45  ;;  %2692 = vpow2.f32 %v2624_v15  ;;  %1667 = vmatpush.msra.mxu2 %v3587_v51  ;;  %1687 = vmatpush.msra.mxu3 %v3591_v41  ;;  %v1252_v15 = vpop.f32.mrf.mxu2 }
 0x327   :  { %v3716_v10 = vadd.f32 1.0, %v2691_v9  ;;  %v1277_v51 = vadd.f32 %v1252_v15, %v3383_v23 }
 0x328   :  { %2694 = vrcp.f32 %v3712_v32  ;;  %1668 = vmatpush.msra.mxu2 %v3595_v56  ;;  %1688 = vmatpush.msra.mxu3 %v3597_v62  ;;  %v1294_v15 = vand.u32 2147483648, %v3712_v32  ;;  %vm1288_vm8 = vweird.f32 %v3712_v32 }
 0x329   :  { %2696 = vrcp.f32 %v3716_v10  ;;  %v1313_v63 = vand.u32 2147483648, %v3716_v10  ;;  %v1311_v1 = vand.u32 2147483647, %v3716_v10  ;;  %vm1307_vm9 = vweird.f32 %v3716_v10 }
 0x32a   :  { %1669 = vmatpush.msra.mxu2 %v3603_v7  ;;  %1689 = vmatpush.msra.mxu3 %v3605_v13  ;;  %v1295_v4 = vor.u32 1.1754944e-38, %v1294_v15 }
 0x32b   :  { %vm1312_vm13 = vcmp.eq.f32.partialorder %v1311_v1, 8.507059e+37 }
 0x32c   :  { %v2693_v45 = vpop.eup %2692  ;;  %1670 = vmatpush.msra.mxu2 %v3611_v20  ;;  %1690 = vmatpush.msra.mxu3 %v3613_v8 }
 0x32d   :  { %v3732_v9 = vadd.f32 1.0, %v2693_v45  ;;  %v1292_v45 = vand.u32 2147483647, %v3712_v32 }
 0x32e   :  { %v2695_v42 = vpop.eup %2694  ;;  %1671 = vmatpush.msra.mxu2 %v3619_v36  ;;  %1691 = vmatpush.msra.mxu3 %v3621_v52 }
 0x32f   :  { %v2697_v54 = vpop.eup %2696  ;;  %v1284_v59 = vmul.f32 %v2695_v42, %v3712_v32  ;;  %2698 = vrcp.f32 %v3732_v9  ;;  %vm1289_vm6 = vweird.f32 %v2695_v42  ;;  %v1314_v32 = vor.u32 1.1754944e-38, %v1313_v63  ;;  %v4355_v63 = vld [vmem:[#allocation42_spill] sm:$0xff] }
 0x330   :  { %v1303_v48 = vmul.f32 %v2697_v54, %v3716_v10  ;;  %2700 = vtanh.f32 %v1277_v51  ;;  %vm1308_vm7 = vweird.f32 %v2697_v54  ;;  %1672 = vmatpush.msra.mxu2 %v3627_v26  ;;  %1692 = vmatpush.msra.mxu3 %v3629_v53  ;;  %vm1290_vm10 = vmor %vm1288_vm8, %vm1289_vm6  ;;  %vm1293_vm12 = vcmp.eq.f32.partialorder %v1292_v45, 8.507059e+37 }
 0x331   :  { %v1285_v23 = vsub.f32 1.0, %v1284_v59  ;;  %vm1309_vm11 = vmor %vm1307_vm9, %vm1308_vm7  ;;  %v1333_v31 = vand.u32 2147483648, %v3732_v9  ;;  %vm1327_vm15 = vweird.f32 %v3732_v9  ;;  %v1331_v40 = vand.u32 2147483647, %v3732_v9  ;;  %1659 = vmatpush.msrb.mxu1 %v4355_v63 }
 0x332   :  { %v1304_v60 = vsub.f32 1.0, %v1303_v48  ;;  %1673 = vmatpush.msra.mxu2 %v3635_v14  ;;  %1693 = vmatpush.msra.mxu3 %v3637_v2 }
 0x333   :  { %v1286_v0 = vmul.f32 %v2695_v42, %v1285_v23  ;;  %v1334_v45 = vor.u32 1.1754944e-38, %v1333_v31  ;;  %vm1332_vm1 = vcmp.eq.f32.partialorder %v1331_v40, 8.507059e+37 }
 0x334   :  { %v1305_v58 = vmul.f32 %v2697_v54, %v1304_v60  ;;  %1674 = vmatpush.msra.mxu2 %v3643_v11  ;;  %1694 = vmatpush.msra.mxu3 %v3645_v35 }
 0x335   :  { %v3758_v51 = vpop.eup %2698  ;;  %v1287_v59 = vadd.f32 %v2695_v42, %v1286_v0 }
 0x336   :  { %v1306_v5 = vadd.f32 %v2697_v54, %v1305_v58  ;;  %v1323_v48 = vmul.f32 %v3758_v51, %v3732_v9  ;;  %v2701_v16 = vpop.eup %2700  ;;  %1675 = vmatpush.msra.mxu2 %v3651_v47  ;;  %1695 = vmatpush.msra.mxu3 %v4351_v27  ;;  %vm1328_vm14 = vweird.f32 %v3758_v51  ;;  %v4357_v9 = vld [vmem:[#allocation44_spill] sm:$0xff] }
 0x337   :  { %v1291_v23 = vsel %vm1290_vm10, %v2695_v42, %v1287_v59  ;;  %vm1329_vm0 = vmor %vm1327_vm15, %vm1328_vm14  ;;  %1660 = vmatpush.msrb.mxu1 %v4357_v9  ;;  %v3873_v9 = vld [vmem:[#allocation9 + $0x1c8] sm:$0xff] }
 0x338   :  { %v1296_v21 = vsel %vm1293_vm12, %v1295_v4, %v1291_v23  ;;  %v1310_v10 = vsel %vm1309_vm11, %v2697_v54, %v1306_v5  ;;  %v1324_v60 = vsub.f32 1.0, %v1323_v48  ;;  %1676 = vmatpush.msra.mxu2 %v3659_v46  ;;  %1696 = vmatpush.msra.mxu3 %v3661_v50 }
 0x339   :  { %v1315_v15 = vsel %vm1312_vm13, %v1314_v32, %v1310_v10  ;;  %v1338_v0 = vmul.f32 %v2701_v16, %v1296_v21  ;;  %1661 = vmatpush.msrb.mxu1 %v3559_v6  ;;  %v4360_v6 = vld [vmem:[#allocation47_spill] sm:$0xff] }
 0x33a   :  { %v1337_v42 = vmul.f32 %v1315_v15, %v3574_v49  ;;  %v1325_v22 = vmul.f32 %v3758_v51, %v1324_v60  ;;  %1677 = vmatpush.msra.mxu2 %v3669_v34  ;;  %1697 = vmatpush.msra.mxu3 %v3671_v38  ;;  %v4354_v49 = vld [vmem:[#allocation41_spill] sm:$0xff] }
 0x33b   :  { %1639 = vmatpush.msrb.mxu0 %v4354_v49  ;;  %1662 = vmatpush.msrb.mxu1 %v3565_v18 }
 0x33c   :  { %v3782_v54 = vadd.f32 %v1338_v0, %v1337_v42  ;;  %v1326_v28 = vadd.f32 %v3758_v51, %v1325_v22  ;;  %1678 = vmatpush.msra.mxu2 %v3677_v29  ;;  %1698 = vmatpush.msra.mxu3 %v4353_v17 }
 0x33d   :  { %1640 = vmatpush.msrb.mxu0 %v4356_v3 }
 0x33e   :  { %2702 = vtanh.f32 %v3782_v54  ;;  %v1330_v25 = vsel %vm1329_vm0, %v3758_v51, %v1326_v28  ;;  %1679 = vmatpush.msra.mxu2 %v3683_v12  ;;  %1699 = vmatpush.msra.mxu3 %v3685_v33 }
 0x33f   :  { %v1335_v1 = vsel %vm1332_vm1, %v1334_v45, %v1330_v25  ;;  %1641 = vmatpush.msrb.mxu0 %v3557_v39  ;;  %v4359_v39 = vld [vmem:[#allocation46_spill] sm:$0xff] }
 0x340   :  { %1680 = vmatpush.msra.mxu2 %v3691_v57  ;;  %1700 = vmatpush.msra.mxu3 %v3693_v37 }
 0x341   :  { %1642 = vmatpush.msrb.mxu0 %v3563_v44  ;;  %v4361_v44 = vld [vmem:[#allocation21_spill] sm:$0xff] }
 0x342   :  { %1681 = vmatpush.msra.mxu2 %v3700_v55  ;;  %1701 = vmatpush.msra.mxu3 %v3702_v30 }
 0x344   :  { %v2703_v58 = vpop.eup %2702  ;;  %1682 = vmatpush.msra.mxu2 %v3708_v24  ;;  %1702 = vmatpush.msra.mxu3 %v3710_v61 }
 0x345   :  { %v3809_v51 = vmul.f32 %v2703_v58, %v1335_v1  ;;  %v3877_v58 = vld [vmem:[#allocation9 + $0x1a0] sm:$0xff]  ;;  %v3879_v1 = vld [vmem:[#allocation9 + $0x1a8] sm:$0xff] }
 0x347   :  { %4358 = vst [vmem:[#allocation48_spill] sm:$0xff] %v3809_v51  ;;  %1427 = vmatmul.f32.vlgmr.msra.gmra.mxu0 %v3809_v51  ;;  %1447 = vmatmul.f32.vlgmr.msra.gmra.mxu1 %v3809_v51 }
 0x348   :  { %1467 = vmatmul.f32.vlgmr.msrb.gmra.mxu2 %v3809_v51  ;;  %1487 = vmatmul.f32.vlgmr.msrb.gmra.mxu3 %v3809_v51  ;;  %v4379_v51 = vld [vmem:[#allocation28_spill] sm:$0xff] }
 0x349   :  { %1843 = vmatpush.msra.mxu0 %v3583_v19  ;;  %1863 = vmatpush.msra.mxu1 %v4359_v39  ;;  %v4362_v19 = vld [vmem:[#allocation22_spill] sm:$0xff]  ;;  %v3883_v39 = vld [vmem:[#allocation9 + $0x180] sm:$0xff] }
 0x34a   :  { %1883 = vmatpush.msrb.mxu2 %v4360_v6  ;;  %1903 = vmatpush.msrb.mxu3 %v3591_v41  ;;  %v3885_v6 = vld [vmem:[#allocation9 + $0x188] sm:$0xff] }
 0x34b   :  { %1864 = vmatpush.msra.mxu1 %v3873_v9 }
 0x34c   :  { %1884 = vmatpush.msrb.mxu2 %v3595_v56  ;;  %1904 = vmatpush.msrb.mxu3 %v3597_v62 }
 0x34d   :  { %1865 = vmatpush.msra.mxu1 %v3879_v1 }
 0x34e   :  { %1885 = vmatpush.msrb.mxu2 %v3603_v7  ;;  %1905 = vmatpush.msrb.mxu3 %v3605_v13  ;;  %v4363_v13 = vld [vmem:[#allocation20_spill] sm:$0xff] }
 0x34f   :  { %1866 = vmatpush.msra.mxu1 %v3885_v6 }
 0x350   :  { %1886 = vmatpush.msrb.mxu2 %v3611_v20  ;;  %1906 = vmatpush.msrb.mxu3 %v3613_v8 }
 0x352   :  { %1887 = vmatpush.msrb.mxu2 %v3619_v36  ;;  %1907 = vmatpush.msrb.mxu3 %v3621_v52 }
 0x354   :  { %1888 = vmatpush.msrb.mxu2 %v3627_v26  ;;  %1908 = vmatpush.msrb.mxu3 %v3629_v53 }
 0x356   :  { %1889 = vmatpush.msrb.mxu2 %v3635_v14  ;;  %1909 = vmatpush.msrb.mxu3 %v3637_v2 }
 0x358   :  { %1890 = vmatpush.msrb.mxu2 %v3643_v11  ;;  %1910 = vmatpush.msrb.mxu3 %v3645_v35 }
 0x35a   :  { %1891 = vmatpush.msrb.mxu2 %v3651_v47  ;;  %1911 = vmatpush.msrb.mxu3 %v4351_v27  ;;  %v4364_v47 = vld [vmem:[#allocation19_spill] sm:$0xff] }
 0x35c   :  { %1892 = vmatpush.msrb.mxu2 %v3659_v46  ;;  %1912 = vmatpush.msrb.mxu3 %v3661_v50 }
 0x35e   :  { %1893 = vmatpush.msrb.mxu2 %v3669_v34  ;;  %1913 = vmatpush.msrb.mxu3 %v3671_v38 }
 0x360   :  { %1894 = vmatpush.msrb.mxu2 %v3677_v29  ;;  %1914 = vmatpush.msrb.mxu3 %v4353_v17 }
 0x362   :  { %1895 = vmatpush.msrb.mxu2 %v3683_v12  ;;  %1915 = vmatpush.msrb.mxu3 %v3685_v33 }
 0x364   :  { %1896 = vmatpush.msrb.mxu2 %v3691_v57  ;;  %1916 = vmatpush.msrb.mxu3 %v3693_v37 }
 0x366   :  { %1897 = vmatpush.msrb.mxu2 %v3700_v55  ;;  %1917 = vmatpush.msrb.mxu3 %v3702_v30 }
 0x368   :  { %1898 = vmatpush.msrb.mxu2 %v3708_v24  ;;  %1918 = vmatpush.msrb.mxu3 %v3710_v61 }
 0x3c4   :  { %v1428_v34 = vpop.f32.mrf.mxu0  ;;  %v1448_v38 = vpop.f32.mrf.mxu1 }
 0x3c5   :  { %v1491_v18 = vadd.f32 %v1428_v34, %v4361_v44  ;;  %v1492_v41 = vadd.f32 %v1448_v38, %v4362_v19  ;;  %v3889_v34 = vld [vmem:[#allocation9 + $0x160] sm:$0xff]  ;;  %v3891_v38 = vld [vmem:[#allocation9 + $0x168] sm:$0xff] }
 0x3c6   :  { %1867 = vmatpush.msra.mxu1 %v3891_v38  ;;  %v3895_v44 = vld [vmem:[#allocation9 + $0x140] sm:$0xff] }
 0x3c7   :  { %v2625_v56 = vmul.f32 -1.442695, %v1491_v18  ;;  %v2626_v62 = vmul.f32 -1.442695, %v1492_v41  ;;  %v3897_v18 = vld [vmem:[#allocation9 + $0x148] sm:$0xff]  ;;  %v3901_v19 = vld [vmem:[#allocation9 + $0x120] sm:$0xff] }
 0x3c8   :  { %1868 = vmatpush.msra.mxu1 %v3897_v18  ;;  %v3903_v41 = vld [vmem:[#allocation9 + $0x128] sm:$0xff] }
 0x3c9   :  { %2704 = vpow2.f32 %v2625_v56  ;;  %v3907_v56 = vld [vmem:[#allocation9 + $0x100] sm:$0xff] }
 0x3ca   :  { %2706 = vpow2.f32 %v2626_v62  ;;  %1869 = vmatpush.msra.mxu1 %v3903_v41  ;;  %v3909_v62 = vld [vmem:[#allocation9 + $0x108] sm:$0xff] }
 0x3cb   :  { %v1488_v7 = vpop.f32.mrf.mxu3  ;;  %v1468_v14 = vpop.f32.mrf.mxu2 }
 0x3cc   :  { %v1494_v20 = vadd.f32 %v1488_v7, %v4363_v13  ;;  %v1493_v46 = vadd.f32 %v1468_v14, %v4364_v47  ;;  %1870 = vmatpush.msra.mxu1 %v3909_v62  ;;  %v3913_v7 = vld [vmem:[#allocation9 + $0xe0] sm:$0xff]  ;;  %v3915_v13 = vld [vmem:[#allocation9 + $0xe8] sm:$0xff] }
 0x3cd   :  { %v4367_v14 = vld [vmem:[#allocation26_spill] sm:$0xff] }
 0x3ce   :  { %v2627_v8 = vmul.f32 -1.442695, %v1494_v20  ;;  %1871 = vmatpush.msra.mxu1 %v3915_v13 }
 0x3cf   :  { %v2705_v36 = vpop.eup %2704 }
 0x3d0   :  { %v2707_v52 = vpop.eup %2706  ;;  %v1498_v26 = vadd.f32 1.0, %v2705_v36  ;;  %2708 = vpow2.f32 %v2627_v8  ;;  %v3919_v36 = vld [vmem:[#allocation9 + $0xc0] sm:$0xff] }
 0x3d1   :  { %v1517_v53 = vadd.f32 1.0, %v2707_v52  ;;  %v3921_v52 = vld [vmem:[#allocation9 + $0xc8] sm:$0xff] }
 0x3d2   :  { %2710 = vrcp.f32 %v1498_v26  ;;  %v1510_v57 = vand.u32 2147483648, %v1498_v26  ;;  %v1508_v24 = vand.u32 2147483647, %v1498_v26  ;;  %vm1504_vm4 = vweird.f32 %v1498_v26  ;;  %1872 = vmatpush.msra.mxu1 %v3921_v52 }
 0x3d3   :  { %2712 = vrcp.f32 %v1517_v53  ;;  %v1529_v37 = vand.u32 2147483648, %v1517_v53  ;;  %v1527_v59 = vand.u32 2147483647, %v1517_v53  ;;  %vm1523_vm5 = vweird.f32 %v1517_v53 }
 0x3d4   :  { %v1511_v48 = vor.u32 1.1754944e-38, %v1510_v57  ;;  %vm1509_vm8 = vcmp.eq.f32.partialorder %v1508_v24, 8.507059e+37  ;;  %v3945_v57 = vld [vmem:[#allocation9 + $0x48] sm:$0xff] }
 0x3d5   :  { %v1530_v16 = vor.u32 1.1754944e-38, %v1529_v37  ;;  %vm1528_vm9 = vcmp.eq.f32.partialorder %v1527_v59, 8.507059e+37  ;;  %4372 = vst [vmem:[#allocation44_spill] sm:$0xff] %v3945_v57  ;;  %v3952_v59 = vld [vmem:[#allocation9 + $0x28] sm:$0xff] }
 0x3d6   :  { %v2709_v2 = vpop.eup %2708 }
 0x3d7   :  { %v1537_v11 = vadd.f32 1.0, %v2709_v2 }
 0x3d8   :  { %v2711_v35 = vpop.eup %2710 }
 0x3d9   :  { %v2713_v50 = vpop.eup %2712  ;;  %v1500_v29 = vmul.f32 %v2711_v35, %v1498_v26  ;;  %2714 = vrcp.f32 %v1537_v11  ;;  %vm1505_vm2 = vweird.f32 %v2711_v35  ;;  %v1549_v43 = vand.u32 2147483648, %v1537_v11  ;;  %v4366_v26 = vld [vmem:[#allocation25_spill] sm:$0xff] }
 0x3da   :  { %v1519_v30 = vmul.f32 %v2713_v50, %v1517_v53  ;;  %2716 = vtanh.f32 %v1493_v46  ;;  %vm1524_vm3 = vweird.f32 %v2713_v50  ;;  %vm1506_vm6 = vmor %vm1504_vm4, %vm1505_vm2  ;;  %vm1543_vm11 = vweird.f32 %v1537_v11 }
 0x3db   :  { %v1501_v12 = vsub.f32 1.0, %v1500_v29  ;;  %vm1525_vm7 = vmor %vm1523_vm5, %vm1524_vm3  ;;  %v1547_v17 = vand.u32 2147483647, %v1537_v11  ;;  %v1550_v49 = vor.u32 1.1754944e-38, %v1549_v43  ;;  %v3935_v29 = vld [vmem:[#allocation9 + $0x88] sm:$0xff] }
 0x3dc   :  { %v1520_v33 = vsub.f32 1.0, %v1519_v30  ;;  %4368 = vst [vmem:[#allocation49_spill] sm:$0xff] %v3935_v29  ;;  %v3937_v30 = vld [vmem:[#allocation9 + $0x60] sm:$0xff] }
 0x3dd   :  { %v1502_v55 = vmul.f32 %v2711_v35, %v1501_v12  ;;  %vm1548_vm13 = vcmp.eq.f32.partialorder %v1547_v17, 8.507059e+37  ;;  %4369 = vst [vmem:[#allocation41_spill] sm:$0xff] %v3937_v30  ;;  %v3941_v12 = vld [vmem:[#allocation9 + $0x68] sm:$0xff] }
 0x3de   :  { %v1521_v61 = vmul.f32 %v2713_v50, %v1520_v33  ;;  %4370 = vst [vmem:[#allocation42_spill] sm:$0xff] %v3941_v12  ;;  %v3943_v33 = vld [vmem:[#allocation9 + $0x40] sm:$0xff] }
 0x3df   :  { %v2715_v4 = vpop.eup %2714  ;;  %v1503_v5 = vadd.f32 %v2711_v35, %v1502_v55  ;;  %4371 = vst [vmem:[#allocation43_spill] sm:$0xff] %v3943_v33  ;;  %v4373_v55 = vld [vmem:[#allocation24_spill] sm:$0xff] }
 0x3e0   :  { %v1522_v32 = vadd.f32 %v2713_v50, %v1521_v61  ;;  %v1539_v23 = vmul.f32 %v2715_v4, %v1537_v11  ;;  %v2717_v10 = vpop.eup %2716  ;;  %vm1544_vm10 = vweird.f32 %v2715_v4  ;;  %v3927_v11 = vld [vmem:[#allocation9 + $0xa0] sm:$0xff] }
 0x3e1   :  { %v1507_v21 = vsel %vm1506_vm6, %v2711_v35, %v1503_v5  ;;  %vm1545_vm12 = vmor %vm1543_vm11, %vm1544_vm10  ;;  %v3929_v35 = vld [vmem:[#allocation9 + $0xa8] sm:$0xff]  ;;  %v3950_v61 = vld [vmem:[#allocation9 + $0x20] sm:$0xff] }
 0x3e2   :  { %v1512_v60 = vsel %vm1509_vm8, %v1511_v48, %v1507_v21  ;;  %v1526_v15 = vsel %vm1525_vm7, %v2713_v50, %v1522_v32  ;;  %v1540_v0 = vsub.f32 1.0, %v1539_v23  ;;  %1873 = vmatpush.msra.mxu1 %v3929_v35  ;;  %v3933_v50 = vld [vmem:[#allocation9 + $0x80] sm:$0xff]  ;;  %v3958_v48 = vld [vmem:[#allocation9 + $0x8] sm:$0xff] }
 0x3e3   :  { %v1531_v42 = vsel %vm1528_vm9, %v1530_v16, %v1526_v15  ;;  %v1554_v22 = vmul.f32 %v2717_v10, %v1512_v60  ;;  %v3956_v5 = vld [vmem:[#allocation9] sm:$0xff] }
 0x3e4   :  { %v1553_v27 = vmul.f32 %v1531_v42, %v3782_v54  ;;  %v1541_v28 = vmul.f32 %v2715_v4, %v1540_v0  ;;  %v3871_v54 = vld [vmem:[#allocation9 + $0x1c0] sm:$0xff]  ;;  %1874 = vmatpush.msra.mxu1 %v3935_v29  ;;  %v4374_v42 = vld [vmem:[#allocation23_spill] sm:$0xff] }
 0x3e5   :  { %1844 = vmatpush.msra.mxu0 %v3871_v54 }
 0x3e6   :  { %v3862_v31 = vadd.f32 %v1554_v22, %v1553_v27  ;;  %v1542_v40 = vadd.f32 %v2715_v4, %v1541_v28  ;;  %1875 = vmatpush.msra.mxu1 %v3941_v12 }
 0x3e7   :  { %1845 = vmatpush.msra.mxu0 %v3877_v58 }
 0x3e8   :  { %2718 = vtanh.f32 %v3862_v31  ;;  %v1546_v25 = vsel %vm1545_vm12, %v2715_v4, %v1542_v40  ;;  %1876 = vmatpush.msra.mxu1 %v3945_v57 }
 0x3e9   :  { %v1551_v45 = vsel %vm1548_vm13, %v1550_v49, %v1546_v25  ;;  %1846 = vmatpush.msra.mxu0 %v3883_v39 }
 0x3ea   :  { %1877 = vmatpush.msra.mxu1 %v3952_v59 }
 0x3eb   :  { %1847 = vmatpush.msra.mxu0 %v3889_v34 }
 0x3ec   :  { %1878 = vmatpush.msra.mxu1 %v3958_v48 }
 0x3ed   :  { %1848 = vmatpush.msra.mxu0 %v3895_v44 }
 0x3ee   :  { %v2719_v63 = vpop.eup %2718 }
 0x3ef   :  { %v3865_v3 = vmul.f32 %v2719_v63, %v1551_v45  ;;  %1849 = vmatpush.msra.mxu0 %v3901_v19 }
 0x3f1   :  { %4365 = vst [vmem:[#allocation40_spill] sm:$0xff] %v3865_v3  ;;  %1643 = vmatmul.f32.vlgmr.msrb.gmra.mxu0 %v3865_v3  ;;  %1663 = vmatmul.f32.vlgmr.msrb.gmra.mxu1 %v3865_v3 }
 0x3f2   :  { %1683 = vmatmul.f32.vlgmr.msra.gmra.mxu2 %v3865_v3  ;;  %1703 = vmatmul.f32.vlgmr.msra.gmra.mxu3 %v3865_v3 }
 0x3f3   :  { %1850 = vmatpush.msra.mxu0 %v3907_v56 }
 0x3f5   :  { %1851 = vmatpush.msra.mxu0 %v3913_v7 }
 0x3f7   :  { %1852 = vmatpush.msra.mxu0 %v3919_v36 }
 0x3f9   :  { %1853 = vmatpush.msra.mxu0 %v3927_v11 }
 0x3fb   :  { %1854 = vmatpush.msra.mxu0 %v3933_v50 }
 0x3fd   :  { %1855 = vmatpush.msra.mxu0 %v3937_v30 }
 0x3ff   :  { %1856 = vmatpush.msra.mxu0 %v3943_v33 }
 0x401   :  { %1857 = vmatpush.msra.mxu0 %v3950_v61 }
 0x403   :  { %1858 = vmatpush.msra.mxu0 %v3956_v5 }
 0x46e   :  { %v1644_v20 = vpop.f32.mrf.mxu0  ;;  %v1664_v8 = vpop.f32.mrf.mxu1 }
 0x46f   :  { %v1707_v53 = vadd.f32 %v1644_v20, %v4366_v26  ;;  %v1708_v2 = vadd.f32 %v1664_v8, %v4367_v14 }
 0x471   :  { %v2628_v47 = vmul.f32 -1.442695, %v1707_v53  ;;  %v2629_v46 = vmul.f32 -1.442695, %v1708_v2 }
 0x473   :  { %2720 = vpow2.f32 %v2628_v47 }
 0x474   :  { %2722 = vpow2.f32 %v2629_v46 }
 0x475   :  { %v1704_v37 = vpop.f32.mrf.mxu3  ;;  %v1684_v10 = vpop.f32.mrf.mxu2 }
 0x476   :  { %v1710_v24 = vadd.f32 %v1704_v37, %v4373_v55  ;;  %v1709_v22 = vadd.f32 %v1684_v10, %v4374_v42 }
 0x478   :  { %v2630_v4 = vmul.f32 -1.442695, %v1710_v24 }
 0x479   :  { %v2721_v32 = vpop.eup %2720 }
 0x47a   :  { %v2723_v23 = vpop.eup %2722  ;;  %v1714_v16 = vadd.f32 1.0, %v2721_v32  ;;  %2724 = vpow2.f32 %v2630_v4 }
 0x47b   :  { %v1733_v21 = vadd.f32 1.0, %v2723_v23 }
 0x47c   :  { %2726 = vrcp.f32 %v1714_v16  ;;  %v1726_v25 = vand.u32 2147483648, %v1714_v16  ;;  %v1724_v45 = vand.u32 2147483647, %v1714_v16  ;;  %vm1720_vm0 = vweird.f32 %v1714_v16 }
 0x47d   :  { %2728 = vrcp.f32 %v1733_v21  ;;  %v1745_v49 = vand.u32 2147483648, %v1733_v21  ;;  %v1743_v8 = vand.u32 2147483647, %v1733_v21  ;;  %vm1739_vm1 = vweird.f32 %v1733_v21 }
 0x47e   :  { %v1727_v14 = vor.u32 1.1754944e-38, %v1726_v25  ;;  %vm1725_vm4 = vcmp.eq.f32.partialorder %v1724_v45, 8.507059e+37  ;;  %v3977_v25 = vld [vmem:[#allocation9 + $0x1e8] sm:$0xff]  ;;  %v3989_v45 = vld [vmem:[#allocation9 + $0x1d8] sm:$0xff] }
 0x47f   :  { %v1746_v46 = vor.u32 1.1754944e-38, %v1745_v49  ;;  %vm1744_vm5 = vcmp.eq.f32.partialorder %v1743_v8, 8.507059e+37  ;;  %2079 = vmatpush.msrb.mxu1 %v3977_v25  ;;  %v3983_v49 = vld [vmem:[#allocation9 + $0x1f8] sm:$0xff] }
 0x480   :  { %v2725_v60 = vpop.eup %2724  ;;  %2119 = vmatpush.msra.mxu3 %v3983_v49  ;;  %v3997_v8 = vld [vmem:[#allocation9 + $0x1b8] sm:$0xff] }
 0x481   :  { %v1753_v15 = vadd.f32 1.0, %v2725_v60  ;;  %2080 = vmatpush.msrb.mxu1 %v3873_v9 }
 0x482   :  { %v2727_v0 = vpop.eup %2726  ;;  %2120 = vmatpush.msra.mxu3 %v3989_v45 }
 0x483   :  { %v2729_v27 = vpop.eup %2728  ;;  %v1716_v28 = vmul.f32 %v2727_v0, %v1714_v16  ;;  %2730 = vrcp.f32 %v1753_v15  ;;  %vm1721_vm14 = vweird.f32 %v2727_v0  ;;  %vm1759_vm7 = vweird.f32 %v1753_v15  ;;  %2081 = vmatpush.msrb.mxu1 %v3879_v1 }
 0x484   :  { %v1735_v40 = vmul.f32 %v2729_v27, %v1733_v21  ;;  %2732 = vtanh.f32 %v1709_v22  ;;  %vm1740_vm15 = vweird.f32 %v2729_v27  ;;  %vm1722_vm2 = vmor %vm1720_vm0, %vm1721_vm14  ;;  %v1765_v22 = vand.u32 2147483648, %v1753_v15  ;;  %2121 = vmatpush.msra.mxu3 %v3997_v8 }
 0x485   :  { %v1717_v43 = vsub.f32 1.0, %v1716_v28  ;;  %vm1741_vm3 = vmor %vm1739_vm1, %vm1740_vm15  ;;  %2082 = vmatpush.msrb.mxu1 %v3885_v6 }
 0x486   :  { %v1736_v17 = vsub.f32 1.0, %v1735_v40  ;;  %v1766_v40 = vor.u32 1.1754944e-38, %v1765_v22  ;;  %v4376_v22 = vld [vmem:[#allocation29_spill] sm:$0xff] }
 0x487   :  { %v1718_v63 = vmul.f32 %v2727_v0, %v1717_v43  ;;  %2083 = vmatpush.msrb.mxu1 %v3891_v38 }
 0x488   :  { %v1737_v20 = vmul.f32 %v2729_v27, %v1736_v17 }
 0x489   :  { %v2731_v26 = vpop.eup %2730  ;;  %v1719_v53 = vadd.f32 %v2727_v0, %v1718_v63  ;;  %v3987_v63 = vld [vmem:[#allocation9 + $0x1d0] sm:$0xff]  ;;  %2084 = vmatpush.msrb.mxu1 %v3897_v18 }
 0x48a   :  { %v1738_v2 = vadd.f32 %v2729_v27, %v1737_v20  ;;  %v1755_v47 = vmul.f32 %v2731_v26, %v1753_v15  ;;  %v2733_v55 = vpop.eup %2732  ;;  %vm1760_vm6 = vweird.f32 %v2731_v26  ;;  %v3995_v20 = vld [vmem:[#allocation9 + $0x1b0] sm:$0xff] }
 0x48b   :  { %v1723_v37 = vsel %vm1722_vm2, %v2727_v0, %v1719_v53  ;;  %v1763_v0 = vand.u32 2147483647, %v1753_v15  ;;  %vm1761_vm8 = vmor %vm1759_vm7, %vm1760_vm6  ;;  %v3979_v15 = vld [vmem:[#allocation9 + $0x1f0] sm:$0xff]  ;;  %v4005_v53 = vld [vmem:[#allocation9 + $0x198] sm:$0xff]  ;;  %2085 = vmatpush.msrb.mxu1 %v3903_v41 }
 0x48c   :  { %v1728_v24 = vsel %vm1725_vm4, %v1727_v14, %v1723_v37  ;;  %v1742_v4 = vsel %vm1741_vm3, %v2729_v27, %v1738_v2  ;;  %v1756_v32 = vsub.f32 1.0, %v1755_v47  ;;  %2099 = vmatpush.msra.mxu2 %v3979_v15  ;;  %2122 = vmatpush.msra.mxu3 %v4005_v53  ;;  %v4011_v14 = vld [vmem:[#allocation9 + $0x170] sm:$0xff]  ;;  %v4013_v2 = vld [vmem:[#allocation9 + $0x178] sm:$0xff] }
 0x48d   :  { %v1747_v23 = vsel %vm1744_vm5, %v1746_v46, %v1742_v4  ;;  %v1770_v10 = vmul.f32 %v2733_v55, %v1728_v24  ;;  %vm1764_vm9 = vcmp.eq.f32.partialorder %v1763_v0, 8.507059e+37  ;;  %v4019_v47 = vld [vmem:[#allocation9 + $0x150] sm:$0xff]  ;;  %v4021_v46 = vld [vmem:[#allocation9 + $0x158] sm:$0xff]  ;;  %2086 = vmatpush.msrb.mxu1 %v3909_v62 }
 0x48e   :  { %v1769_v60 = vmul.f32 %v1747_v23, %v3862_v31  ;;  %v1757_v42 = vmul.f32 %v2731_v26, %v1756_v32  ;;  %v3975_v31 = vld [vmem:[#allocation9 + $0x1e0] sm:$0xff]  ;;  %2100 = vmatpush.msra.mxu2 %v3987_v63  ;;  %2123 = vmatpush.msra.mxu3 %v4013_v2  ;;  %v4027_v37 = vld [vmem:[#allocation9 + $0x130] sm:$0xff]  ;;  %v4029_v55 = vld [vmem:[#allocation9 + $0x138] sm:$0xff] }
 0x48f   :  { %2059 = vmatpush.msrb.mxu0 %v3975_v31  ;;  %v4035_v24 = vld [vmem:[#allocation9 + $0x110] sm:$0xff]  ;;  %v4037_v4 = vld [vmem:[#allocation9 + $0x118] sm:$0xff]  ;;  %2087 = vmatpush.msrb.mxu1 %v3915_v13 }
 0x490   :  { %v3966_v16 = vadd.f32 %v1770_v10, %v1769_v60  ;;  %v1758_v21 = vadd.f32 %v2731_v26, %v1757_v42  ;;  %2101 = vmatpush.msra.mxu2 %v3995_v20  ;;  %2124 = vmatpush.msra.mxu3 %v4021_v46  ;;  %v4043_v32 = vld [vmem:[#allocation9 + $0xf0] sm:$0xff]  ;;  %v4045_v23 = vld [vmem:[#allocation9 + $0xf8] sm:$0xff] }
 0x491   :  { %2060 = vmatpush.msrb.mxu0 %v3871_v54  ;;  %v4051_v42 = vld [vmem:[#allocation9 + $0xd0] sm:$0xff]  ;;  %2088 = vmatpush.msrb.mxu1 %v3921_v52 }
 0x492   :  { %2734 = vtanh.f32 %v3966_v16  ;;  %v1762_v28 = vsel %vm1761_vm8, %v2731_v26, %v1758_v21  ;;  %v4003_v26 = vld [vmem:[#allocation9 + $0x190] sm:$0xff]  ;;  %2125 = vmatpush.msra.mxu3 %v4029_v55  ;;  %v4053_v21 = vld [vmem:[#allocation9 + $0xd8] sm:$0xff] }
 0x493   :  { %v1767_v43 = vsel %vm1764_vm9, %v1766_v40, %v1762_v28  ;;  %2061 = vmatpush.msrb.mxu0 %v3877_v58  ;;  %2102 = vmatpush.msra.mxu2 %v4003_v26  ;;  %v4377_v28 = vld [vmem:[#allocation30_spill] sm:$0xff] }
 0x494   :  { %2126 = vmatpush.msra.mxu3 %v4037_v4  ;;  %2089 = vmatpush.msrb.mxu1 %v3929_v35 }
 0x495   :  { %2062 = vmatpush.msrb.mxu0 %v3883_v39  ;;  %2103 = vmatpush.msra.mxu2 %v4011_v14 }
 0x496   :  { %2127 = vmatpush.msra.mxu3 %v4045_v23  ;;  %2090 = vmatpush.msrb.mxu1 %v3935_v29 }
 0x497   :  { %2063 = vmatpush.msrb.mxu0 %v3889_v34  ;;  %2104 = vmatpush.msra.mxu2 %v4019_v47 }
 0x498   :  { %v2735_v27 = vpop.eup %2734  ;;  %2128 = vmatpush.msra.mxu3 %v4053_v21  ;;  %2091 = vmatpush.msrb.mxu1 %v3941_v12 }
 0x499   :  { %v3969_v17 = vmul.f32 %v2735_v27, %v1767_v43  ;;  %2064 = vmatpush.msrb.mxu0 %v3895_v44  ;;  %2105 = vmatpush.msra.mxu2 %v4027_v37  ;;  %v4061_v27 = vld [vmem:[#allocation9 + $0xb0] sm:$0xff]  ;;  %v4063_v43 = vld [vmem:[#allocation9 + $0xb8] sm:$0xff] }
 0x49a   :  { %2129 = vmatpush.msra.mxu3 %v4063_v43  ;;  %2092 = vmatpush.msrb.mxu1 %v3945_v57 }
 0x49b   :  { %4375 = vst [vmem:[#allocation46_spill] sm:$0xff] %v3969_v17  ;;  %1859 = vmatmul.f32.vlgmr.msra.gmra.mxu0 %v3969_v17  ;;  %1879 = vmatmul.f32.vlgmr.msra.gmra.mxu1 %v3969_v17 }
 0x49c   :  { %1899 = vmatmul.f32.vlgmr.msrb.gmra.mxu2 %v3969_v17  ;;  %1919 = vmatmul.f32.vlgmr.msrb.gmra.mxu3 %v3969_v17 }
 0x49d   :  { %2065 = vmatpush.msrb.mxu0 %v3901_v19  ;;  %2106 = vmatpush.msra.mxu2 %v4035_v24 }
 0x49e   :  { %2093 = vmatpush.msrb.mxu1 %v3952_v59 }
 0x49f   :  { %2066 = vmatpush.msrb.mxu0 %v3907_v56  ;;  %2107 = vmatpush.msra.mxu2 %v4043_v32 }
 0x4a0   :  { %2094 = vmatpush.msrb.mxu1 %v3958_v48 }
 0x4a1   :  { %2067 = vmatpush.msrb.mxu0 %v3913_v7  ;;  %2108 = vmatpush.msra.mxu2 %v4051_v42 }
 0x4a2   :  { %2295 = vmatpush.msra.mxu1 %v3977_v25  ;;  %v4380_v25 = vld [vmem:[#allocation27_spill] sm:$0xff] }
 0x4a3   :  { %2068 = vmatpush.msrb.mxu0 %v3919_v36  ;;  %2109 = vmatpush.msra.mxu2 %v4061_v27 }
 0x4a4   :  { %2296 = vmatpush.msra.mxu1 %v3873_v9 }
 0x4a5   :  { %2069 = vmatpush.msrb.mxu0 %v3927_v11 }
 0x4a6   :  { %2297 = vmatpush.msra.mxu1 %v3879_v1 }
 0x4a7   :  { %2070 = vmatpush.msrb.mxu0 %v3933_v50 }
 0x4a8   :  { %2298 = vmatpush.msra.mxu1 %v3885_v6 }
 0x4a9   :  { %2071 = vmatpush.msrb.mxu0 %v3937_v30 }
 0x4aa   :  { %2299 = vmatpush.msra.mxu1 %v3891_v38 }
 0x4ab   :  { %2072 = vmatpush.msrb.mxu0 %v3943_v33 }
 0x4ac   :  { %2300 = vmatpush.msra.mxu1 %v3897_v18 }
 0x4ad   :  { %2073 = vmatpush.msrb.mxu0 %v3950_v61 }
 0x4ae   :  { %2301 = vmatpush.msra.mxu1 %v3903_v41 }
 0x4af   :  { %2074 = vmatpush.msrb.mxu0 %v3956_v5 }
 0x4b0   :  { %2302 = vmatpush.msra.mxu1 %v3909_v62 }
 0x4b1   :  { %2275 = vmatpush.msra.mxu0 %v3975_v31 }
 0x4b2   :  { %2303 = vmatpush.msra.mxu1 %v3915_v13 }
 0x4b3   :  { %2276 = vmatpush.msra.mxu0 %v3871_v54 }
 0x4b4   :  { %2304 = vmatpush.msra.mxu1 %v3921_v52  ;;  %v4381_v52 = vld [vmem:[#allocation49_spill] sm:$0xff] }
 0x4b5   :  { %2277 = vmatpush.msra.mxu0 %v3877_v58 }
 0x4b6   :  { %2305 = vmatpush.msra.mxu1 %v3929_v35 }
 0x4b7   :  { %2278 = vmatpush.msra.mxu0 %v3883_v39 }
 0x4b8   :  { %2306 = vmatpush.msra.mxu1 %v4381_v52  ;;  %v4390_v52 = vld [vmem:[#allocation31_spill] sm:$0xff] }
 0x4b9   :  { %2279 = vmatpush.msra.mxu0 %v3889_v34 }
 0x4bb   :  { %2280 = vmatpush.msra.mxu0 %v3895_v44 }
 0x4bd   :  { %2281 = vmatpush.msra.mxu0 %v3901_v19 }
 0x4bf   :  { %2282 = vmatpush.msra.mxu0 %v3907_v56 }
 0x4c1   :  { %2283 = vmatpush.msra.mxu0 %v3913_v7 }
 0x4c3   :  { %2284 = vmatpush.msra.mxu0 %v3919_v36 }
 0x4c5   :  { %2285 = vmatpush.msra.mxu0 %v3927_v11 }
 0x4c7   :  { %2286 = vmatpush.msra.mxu0 %v3933_v50  ;;  %v4385_v50 = vld [vmem:[#allocation43_spill] sm:$0xff] }
 0x518   :  { %v1860_v10 = vpop.f32.mrf.mxu0  ;;  %v1880_v60 = vpop.f32.mrf.mxu1 }
 0x519   :  { %v1923_v0 = vadd.f32 %v1860_v10, %v4376_v22  ;;  %v1924_v40 = vadd.f32 %v1880_v60, %v4377_v28  ;;  %v4069_v10 = vld [vmem:[#allocation9 + $0x90] sm:$0xff]  ;;  %v4071_v60 = vld [vmem:[#allocation9 + $0x98] sm:$0xff] }
 0x51a   :  { %4378 = vst [vmem:[#allocation47_spill] sm:$0xff] %v4071_v60  ;;  %v4075_v22 = vld [vmem:[#allocation9 + $0x70] sm:$0xff]  ;;  %2110 = vmatpush.msra.mxu2 %v4069_v10  ;;  %2130 = vmatpush.msra.mxu3 %v4071_v60  ;;  %v4094_v60 = vld [vmem:[#allocation9 + $0x38] sm:$0xff] }
 0x51b   :  { %v2631_v17 = vmul.f32 -1.442695, %v1923_v0  ;;  %v2632_v3 = vmul.f32 -1.442695, %v1924_v40  ;;  %v4077_v0 = vld [vmem:[#allocation9 + $0x78] sm:$0xff]  ;;  %v4083_v40 = vld [vmem:[#allocation9 + $0x50] sm:$0xff] }
 0x51c   :  { %2111 = vmatpush.msra.mxu2 %v4075_v22  ;;  %2131 = vmatpush.msra.mxu3 %v4077_v0 }
 0x51d   :  { %2736 = vpow2.f32 %v2631_v17  ;;  %v4085_v17 = vld [vmem:[#allocation9 + $0x58] sm:$0xff] }
 0x51e   :  { %2738 = vpow2.f32 %v2632_v3  ;;  %v4092_v3 = vld [vmem:[#allocation9 + $0x30] sm:$0xff]  ;;  %2112 = vmatpush.msra.mxu2 %v4083_v40  ;;  %2132 = vmatpush.msra.mxu3 %v4085_v17 }
 0x51f   :  { %v1920_v28 = vpop.f32.mrf.mxu3 }
 0x520   :  { %v1926_v29 = vadd.f32 %v1920_v28, %v4379_v51  ;;  %v4100_v51 = vld [vmem:[#allocation9 + $0x10] sm:$0xff]  ;;  %v4102_v28 = vld [vmem:[#allocation9 + $0x18] sm:$0xff]  ;;  %2113 = vmatpush.msra.mxu2 %v4092_v3  ;;  %2133 = vmatpush.msra.mxu3 %v4094_v60 }
 0x521   :  { %v4382_v11 = vld [vmem:[#allocation47_spill] sm:$0xff] }
 0x522   :  { %v2633_v30 = vmul.f32 -1.442695, %v1926_v29  ;;  %2114 = vmatpush.msra.mxu2 %v4100_v51  ;;  %2134 = vmatpush.msra.mxu3 %v4102_v28 }
 0x523   :  { %v2737_v12 = vpop.eup %2736 }
 0x524   :  { %v2739_v33 = vpop.eup %2738  ;;  %v4104_v57 = vadd.f32 1.0, %v2737_v12  ;;  %2740 = vpow2.f32 %v2633_v30  ;;  %2315 = vmatpush.msrb.mxu2 %v3979_v15  ;;  %2335 = vmatpush.msrb.mxu3 %v3983_v49  ;;  %v1900_v30 = vpop.f32.mrf.mxu2 }
 0x525   :  { %v4108_v29 = vadd.f32 1.0, %v2739_v33  ;;  %v1925_v15 = vadd.f32 %v1900_v30, %v4380_v25 }
 0x526   :  { %2742 = vrcp.f32 %v4104_v57  ;;  %2316 = vmatpush.msrb.mxu2 %v3987_v63  ;;  %2336 = vmatpush.msrb.mxu3 %v3989_v45  ;;  %v1942_v63 = vand.u32 2147483648, %v4104_v57  ;;  %v1940_v45 = vand.u32 2147483647, %v4104_v57  ;;  %vm1936_vm12 = vweird.f32 %v4104_v57 }
 0x527   :  { %2744 = vrcp.f32 %v4108_v29  ;;  %v1961_v39 = vand.u32 2147483648, %v4108_v29  ;;  %v1959_v38 = vand.u32 2147483647, %v4108_v29  ;;  %vm1955_vm13 = vweird.f32 %v4108_v29 }
 0x528   :  { %2317 = vmatpush.msrb.mxu2 %v3995_v20  ;;  %2337 = vmatpush.msrb.mxu3 %v3997_v8  ;;  %v1943_v44 = vor.u32 1.1754944e-38, %v1942_v63  ;;  %vm1941_vm0 = vcmp.eq.f32.partialorder %v1940_v45, 8.507059e+37  ;;  %v2441_v45 = vld [vmem:[#allocation10 + $0x50] sm:$0xff] }
 0x529   :  { %vm1960_vm1 = vcmp.eq.f32.partialorder %v1959_v38, 8.507059e+37 }
 0x52a   :  { %v2741_v12 = vpop.eup %2740  ;;  %2318 = vmatpush.msrb.mxu2 %v4003_v26  ;;  %2338 = vmatpush.msrb.mxu3 %v4005_v53 }
 0x52b   :  { %v4124_v33 = vadd.f32 1.0, %v2741_v12  ;;  %v2449_v12 = vld [vmem:[#allocation10 + $0x90] sm:$0xff] }
 0x52c   :  { %v2743_v31 = vpop.eup %2742  ;;  %2319 = vmatpush.msrb.mxu2 %v4011_v14  ;;  %2339 = vmatpush.msrb.mxu3 %v4013_v2 }
 0x52d   :  { %v2745_v54 = vpop.eup %2744  ;;  %v1932_v9 = vmul.f32 %v2743_v31, %v4104_v57  ;;  %2746 = vrcp.f32 %v4124_v33  ;;  %vm1937_vm10 = vweird.f32 %v2743_v31  ;;  %v1962_v57 = vor.u32 1.1754944e-38, %v1961_v39  ;;  %v4389_v39 = vld [vmem:[#allocation32_spill] sm:$0xff] }
 0x52e   :  { %v1951_v58 = vmul.f32 %v2745_v54, %v4108_v29  ;;  %2748 = vtanh.f32 %v1925_v15  ;;  %vm1956_vm11 = vweird.f32 %v2745_v54  ;;  %2320 = vmatpush.msrb.mxu2 %v4019_v47  ;;  %2340 = vmatpush.msrb.mxu3 %v4021_v46  ;;  %vm1938_vm14 = vmor %vm1936_vm12, %vm1937_vm10  ;;  %v1981_v13 = vand.u32 2147483648, %v4124_v33  ;;  %v4388_v29 = vld [vmem:[#allocation34_spill] sm:$0xff]  ;;  %v2447_v15 = vld [vmem:[#allocation10 + $0x80] sm:$0xff] }
 0x52f   :  { %v1933_v1 = vsub.f32 1.0, %v1932_v9  ;;  %vm1957_vm15 = vmor %vm1955_vm13, %vm1956_vm11  ;;  %vm1975_vm3 = vweird.f32 %v4124_v33  ;;  %v1979_v36 = vand.u32 2147483647, %v4124_v33  ;;  %v2445_v9 = vld [vmem:[#allocation10 + $0x70] sm:$0xff] }
 0x530   :  { %v1952_v49 = vsub.f32 1.0, %v1951_v58  ;;  %2321 = vmatpush.msrb.mxu2 %v4027_v37  ;;  %2341 = vmatpush.msrb.mxu3 %v4029_v55  ;;  %v4384_v55 = vld [vmem:[#allocation42_spill] sm:$0xff]  ;;  %v2446_v58 = vld [vmem:[#allocation10 + $0x78] sm:$0xff] }
 0x531   :  { %v1934_v6 = vmul.f32 %v2743_v31, %v1933_v1  ;;  %2307 = vmatpush.msra.mxu1 %v4384_v55  ;;  %vm1980_vm5 = vcmp.eq.f32.partialorder %v1979_v36, 8.507059e+37  ;;  %v2443_v1 = vld [vmem:[#allocation10 + $0x60] sm:$0xff] }
 0x532   :  { %v1953_v34 = vmul.f32 %v2745_v54, %v1952_v49  ;;  %2322 = vmatpush.msrb.mxu2 %v4035_v24  ;;  %2342 = vmatpush.msrb.mxu3 %v4037_v4  ;;  %v1982_v24 = vor.u32 1.1754944e-38, %v1981_v13  ;;  %v4386_v4 = vld [vmem:[#allocation44_spill] sm:$0xff]  ;;  %v2444_v49 = vld [vmem:[#allocation10 + $0x68] sm:$0xff] }
 0x533   :  { %v4150_v20 = vpop.eup %2746  ;;  %v1935_v8 = vadd.f32 %v2743_v31, %v1934_v6  ;;  %2308 = vmatpush.msra.mxu1 %v4386_v4 }
 0x534   :  { %v1954_v18 = vadd.f32 %v2745_v54, %v1953_v34  ;;  %v1971_v26 = vmul.f32 %v4150_v20, %v4124_v33  ;;  %v2749_v19 = vpop.eup %2748  ;;  %2323 = vmatpush.msrb.mxu2 %v4043_v32  ;;  %2343 = vmatpush.msrb.mxu3 %v4045_v23  ;;  %vm1976_vm2 = vweird.f32 %v4150_v20  ;;  %v2450_v33 = vld [vmem:[#allocation10 + $0x98] sm:$0xff] }
 0x535   :  { %v1939_v53 = vsel %vm1938_vm14, %v2743_v31, %v1935_v8  ;;  %vm1977_vm4 = vmor %vm1975_vm3, %vm1976_vm2  ;;  %2309 = vmatpush.msra.mxu1 %v3952_v59  ;;  %v2462_v59 = vld [vmem:[#allocation10 + $0xf8] sm:$0xff]  ;;  %v2440_v8 = vld [vmem:[#allocation10 + $0x48] sm:$0xff] }
 0x536   :  { %v1944_v41 = vsel %vm1941_vm0, %v1943_v44, %v1939_v53  ;;  %v1958_v14 = vsel %vm1957_vm15, %v2745_v54, %v1954_v18  ;;  %v1972_v2 = vsub.f32 1.0, %v1971_v26  ;;  %2324 = vmatpush.msrb.mxu2 %v4051_v42  ;;  %2344 = vmatpush.msrb.mxu3 %v4053_v21  ;;  %v2459_v21 = vld [vmem:[#allocation10 + $0xe0] sm:$0xff]  ;;  %v2448_v54 = vld [vmem:[#allocation10 + $0x88] sm:$0xff]  ;;  %v2442_v34 = vld [vmem:[#allocation10 + $0x58] sm:$0xff] }
 0x537   :  { %v1963_v47 = vsel %vm1960_vm1, %v1962_v57, %v1958_v14  ;;  %v1986_v46 = vmul.f32 %v2749_v19, %v1944_v41  ;;  %2310 = vmatpush.msra.mxu1 %v3958_v48  ;;  %v2453_v48 = vld [vmem:[#allocation10 + $0xb0] sm:$0xff]  ;;  %v2438_v19 = vld [vmem:[#allocation10 + $0x38] sm:$0xff]  ;;  %v2435_v41 = vld [vmem:[#allocation10 + $0x20] sm:$0xff] }
 0x538   :  { %v1985_v37 = vmul.f32 %v1963_v47, %v3966_v16  ;;  %v1973_v56 = vmul.f32 %v4150_v20, %v1972_v2  ;;  %2325 = vmatpush.msrb.mxu2 %v4061_v27  ;;  %2345 = vmatpush.msrb.mxu3 %v4063_v43  ;;  %v4383_v16 = vld [vmem:[#allocation41_spill] sm:$0xff]  ;;  %v2460_v27 = vld [vmem:[#allocation10 + $0xe8] sm:$0xff]  ;;  %v2457_v43 = vld [vmem:[#allocation10 + $0xd0] sm:$0xff] }
 0x539   :  { %2287 = vmatpush.msra.mxu0 %v4383_v16  ;;  %v2437_v53 = vld [vmem:[#allocation10 + $0x30] sm:$0xff]  ;;  %v2436_v14 = vld [vmem:[#allocation10 + $0x28] sm:$0xff]  ;;  %v2434_v47 = vld [vmem:[#allocation10 + $0x18] sm:$0xff] }
 0x53a   :  { %v4174_v62 = vadd.f32 %v1986_v46, %v1985_v37  ;;  %v1974_v7 = vadd.f32 %v4150_v20, %v1973_v56  ;;  %2326 = vmatpush.msrb.mxu2 %v4069_v10  ;;  %2346 = vmatpush.msrb.mxu3 %v4382_v11  ;;  %v2458_v10 = vld [vmem:[#allocation10 + $0xd8] sm:$0xff]  ;;  %v2433_v2 = vld [vmem:[#allocation10 + $0x10] sm:$0xff]  ;;  %v2431_v56 = vld [vmem:[#allocation10] sm:$0xff] }
 0x53b   :  { %2288 = vmatpush.msra.mxu0 %v4385_v50 }
 0x53c   :  { %2750 = vtanh.f32 %v4174_v62  ;;  %v1978_v35 = vsel %vm1977_vm4, %v4150_v20, %v1974_v7  ;;  %2327 = vmatpush.msrb.mxu2 %v4075_v22  ;;  %2347 = vmatpush.msrb.mxu3 %v4077_v0  ;;  %v2454_v22 = vld [vmem:[#allocation10 + $0xb8] sm:$0xff]  ;;  %v2439_v20 = vld [vmem:[#allocation10 + $0x40] sm:$0xff]  ;;  %v2432_v7 = vld [vmem:[#allocation10 + $0x8] sm:$0xff] }
 0x53d   :  { %v1983_v23 = vsel %vm1980_vm5, %v1982_v24, %v1978_v35  ;;  %2289 = vmatpush.msra.mxu0 %v3950_v61  ;;  %v2461_v61 = vld [vmem:[#allocation10 + $0xf0] sm:$0xff] }
 0x53e   :  { %2328 = vmatpush.msrb.mxu2 %v4083_v40  ;;  %2348 = vmatpush.msrb.mxu3 %v4085_v17  ;;  %v2451_v17 = vld [vmem:[#allocation10 + $0xa0] sm:$0xff] }
 0x53f   :  { %2290 = vmatpush.msra.mxu0 %v3956_v5  ;;  %v2456_v5 = vld [vmem:[#allocation10 + $0xc8] sm:$0xff] }
 0x540   :  { %2329 = vmatpush.msrb.mxu2 %v4092_v3  ;;  %2349 = vmatpush.msrb.mxu3 %v4094_v60  ;;  %v2455_v60 = vld [vmem:[#allocation10 + $0xc0] sm:$0xff]  ;;  %v2452_v3 = vld [vmem:[#allocation10 + $0xa8] sm:$0xff] }
 0x542   :  { %v2751_v32 = vpop.eup %2750  ;;  %2330 = vmatpush.msrb.mxu2 %v4100_v51  ;;  %2350 = vmatpush.msrb.mxu3 %v4102_v28  ;;  %v4387_v51 = vld [vmem:[#allocation33_spill] sm:$0xff] }
 0x543   :  { %v4201_v42 = vmul.f32 %v2751_v32, %v1983_v23 }
 0x545   :  { %2075 = vmatmul.f32.vlgmr.msrb.gmra.mxu0 %v4201_v42  ;;  %2095 = vmatmul.f32.vlgmr.msrb.gmra.mxu1 %v4201_v42 }
 0x546   :  { %2115 = vmatmul.f32.vlgmr.msra.gmra.mxu2 %v4201_v42  ;;  %2135 = vmatmul.f32.vlgmr.msra.gmra.mxu3 %v4201_v42 }
 0x547   :  { %2469 = vmatpush.msrb.mxu0 %v2461_v61  ;;  %2510 = vmatpush.msrb.mxu1 %v2462_v59 }
 0x549   :  { %2470 = vmatpush.msrb.mxu0 %v2459_v21  ;;  %2511 = vmatpush.msrb.mxu1 %v2460_v27 }
 0x54b   :  { %2471 = vmatpush.msrb.mxu0 %v2457_v43  ;;  %2512 = vmatpush.msrb.mxu1 %v2458_v10 }
 0x54d   :  { %2472 = vmatpush.msrb.mxu0 %v2455_v60  ;;  %2513 = vmatpush.msrb.mxu1 %v2456_v5 }
 0x54f   :  { %2473 = vmatpush.msrb.mxu0 %v2453_v48  ;;  %2514 = vmatpush.msrb.mxu1 %v2454_v22 }
 0x551   :  { %2474 = vmatpush.msrb.mxu0 %v2451_v17  ;;  %2515 = vmatpush.msrb.mxu1 %v2452_v3 }
 0x553   :  { %2475 = vmatpush.msrb.mxu0 %v2449_v12  ;;  %2516 = vmatpush.msrb.mxu1 %v2450_v33 }
 0x555   :  { %2476 = vmatpush.msrb.mxu0 %v2447_v15  ;;  %2517 = vmatpush.msrb.mxu1 %v2448_v54 }
 0x557   :  { %2477 = vmatpush.msrb.mxu0 %v2445_v9  ;;  %2518 = vmatpush.msrb.mxu1 %v2446_v58 }
 0x559   :  { %2478 = vmatpush.msrb.mxu0 %v2443_v1  ;;  %2519 = vmatpush.msrb.mxu1 %v2444_v49  ;;  %v4392_v49 = vld [vmem:[#allocation45_spill] sm:$0xff] }
 0x55b   :  { %2479 = vmatpush.msrb.mxu0 %v2441_v45  ;;  %2520 = vmatpush.msrb.mxu1 %v2442_v34 }
 0x55d   :  { %2480 = vmatpush.msrb.mxu0 %v2439_v20  ;;  %2521 = vmatpush.msrb.mxu1 %v2440_v8  ;;  %v4397_v8 = vld [vmem:[#allocation36_spill] sm:$0xff] }
 0x55f   :  { %2481 = vmatpush.msrb.mxu0 %v2437_v53  ;;  %2522 = vmatpush.msrb.mxu1 %v2438_v19 }
 0x561   :  { %2482 = vmatpush.msrb.mxu0 %v2435_v41  ;;  %2523 = vmatpush.msrb.mxu1 %v2436_v14  ;;  %v4399_v41 = vld [vmem:[#allocation39_spill] sm:$0xff] }
 0x563   :  { %2483 = vmatpush.msrb.mxu0 %v2433_v2  ;;  %2524 = vmatpush.msrb.mxu1 %v2434_v47 }
 0x565   :  { %2484 = vmatpush.msrb.mxu0 %v2431_v56  ;;  %2525 = vmatpush.msrb.mxu1 %v2432_v7 }
 0x5c2   :  { %v2076_v0 = vpop.f32.mrf.mxu0  ;;  %v2096_v40 = vpop.f32.mrf.mxu1 }
 0x5c3   :  { %v2139_v28 = vadd.f32 %v2076_v0, %v4387_v51  ;;  %v2140_v30 = vadd.f32 %v2096_v40, %v4388_v29 }
 0x5c5   :  { %v2634_v31 = vmul.f32 -1.442695, %v2139_v28  ;;  %v2635_v25 = vmul.f32 -1.442695, %v2140_v30 }
 0x5c7   :  { %2752 = vpow2.f32 %v2634_v31 }
 0x5c8   :  { %2754 = vpow2.f32 %v2635_v25 }
 0x5c9   :  { %v2136_v63 = vpop.f32.mrf.mxu3  ;;  %v2116_v46 = vpop.f32.mrf.mxu2 }
 0x5ca   :  { %v2142_v6 = vadd.f32 %v2136_v63, %v4389_v39  ;;  %v2141_v11 = vadd.f32 %v2116_v46, %v4390_v52  ;;  %v4393_v63 = vld [vmem:[#allocation48_spill] sm:$0xff] }
 0x5cb   :  { %v4394_v39 = vld [vmem:[#allocation40_spill] sm:$0xff] }
 0x5cc   :  { %v2636_v38 = vmul.f32 -1.442695, %v2142_v6  ;;  %v4395_v6 = vld [vmem:[#allocation46_spill] sm:$0xff] }
 0x5cd   :  { %v2753_v44 = vpop.eup %2752 }
 0x5ce   :  { %v2755_v18 = vpop.eup %2754  ;;  %v2146_v26 = vadd.f32 1.0, %v2753_v44  ;;  %2756 = vpow2.f32 %v2636_v38  ;;  %v4396_v38 = vld [vmem:[#allocation35_spill] sm:$0xff] }
 0x5cf   :  { %v2165_v57 = vadd.f32 1.0, %v2755_v18  ;;  %v2463_v18 = vld [vmem:[%s4287_s9] sm:$0x3]  ;;  %s2924_s9 = smov [#allocation12]  }
 0x5d0   :  { %2758 = vrcp.f32 %v2146_v26  ;;  %v2158_v4 = vand.u32 2147483648, %v2146_v26  ;;  %v2156_v61 = vand.u32 2147483647, %v2146_v26  ;;  %vm2152_vm8 = vweird.f32 %v2146_v26  ;;  %s2571_s14 = sshll.u32 %s2924_s9, 4  ;;  %s2572_s14 = int_to_ptr.vmem [resolvable:$true] %s2571_s14 }
 0x5d1   :  { %2760 = vrcp.f32 %v2165_v57  ;;  %v2177_v32 = vand.u32 2147483648, %v2165_v57  ;;  %v2175_v21 = vand.u32 2147483647, %v2165_v57  ;;  %vm2171_vm9 = vweird.f32 %v2165_v57 }
 0x5d2   :  { %v2159_v10 = vor.u32 1.1754944e-38, %v2158_v4  ;;  %vm2157_vm12 = vcmp.eq.f32.partialorder %v2156_v61, 8.507059e+37  ;;  %v4240_v53 = vperm.slane %v2463_v18, 0  ;;  %v4242_v19 = vperm.slane %v2463_v18, 1  ;;  %v4401_v4 = vld [vmem:[#allocation38_spill] sm:$0xff] }
 0x5d3   :  { %v2178_v48 = vor.u32 1.1754944e-38, %v2177_v32  ;;  %vm2176_vm13 = vcmp.eq.f32.partialorder %v2175_v21, 8.507059e+37 }
 0x5d4   :  { %v2757_v37 = vpop.eup %2756 }
 0x5d5   :  { %v2185_v13 = vadd.f32 1.0, %v2757_v37 }
 0x5d6   :  { %v2759_v36 = vpop.eup %2758 }
 0x5d7   :  { %v2761_v35 = vpop.eup %2760  ;;  %v2148_v16 = vmul.f32 %v2759_v36, %v2146_v26  ;;  %2762 = vrcp.f32 %v2185_v13  ;;  %vm2153_vm6 = vweird.f32 %v2759_v36  ;;  %v2197_v31 = vand.u32 2147483648, %v2185_v13 }
 0x5d8   :  { %v2167_v55 = vmul.f32 %v2761_v35, %v2165_v57  ;;  %2764 = vtanh.f32 %v2141_v11  ;;  %vm2172_vm7 = vweird.f32 %v2761_v35  ;;  %vm2154_vm10 = vmor %vm2152_vm8, %vm2153_vm6  ;;  %vm2191_vm15 = vweird.f32 %v2185_v13 }
 0x5d9   :  { %v2149_v24 = vsub.f32 1.0, %v2148_v16  ;;  %vm2173_vm11 = vmor %vm2171_vm9, %vm2172_vm7  ;;  %v2195_v25 = vand.u32 2147483647, %v2185_v13  ;;  %v2198_v54 = vor.u32 1.1754944e-38, %v2197_v31 }
 0x5da   :  { %v2168_v50 = vsub.f32 1.0, %v2167_v55 }
 0x5db   :  { %v2150_v23 = vmul.f32 %v2759_v36, %v2149_v24  ;;  %vm2196_vm1 = vcmp.eq.f32.partialorder %v2195_v25, 8.507059e+37 }
 0x5dc   :  { %v2169_v59 = vmul.f32 %v2761_v35, %v2168_v50  ;;  %v4400_v50 = vld [vmem:[#allocation17_spill] sm:$0xff] }
 0x5dd   :  { %v2763_v27 = vpop.eup %2762  ;;  %v2151_v43 = vadd.f32 %v2759_v36, %v2150_v23  ;;  %v625_v32 = vadd.f32 %v4401_v4, %v4400_v50 }
 0x5de   :  { %v2170_v60 = vadd.f32 %v2761_v35, %v2169_v59  ;;  %v2187_v5 = vmul.f32 %v2763_v27, %v2185_v13  ;;  %v2765_v0 = vpop.eup %2764  ;;  %vm2192_vm14 = vweird.f32 %v2763_v27 }
 0x5df   :  { %v2155_v22 = vsel %vm2154_vm10, %v2759_v36, %v2151_v43  ;;  %vm2193_vm0 = vmor %vm2191_vm15, %vm2192_vm14 }
 0x5e0   :  { %v2160_v40 = vsel %vm2157_vm12, %v2159_v10, %v2155_v22  ;;  %v2174_v17 = vsel %vm2173_vm11, %v2761_v35, %v2170_v60  ;;  %v2188_v3 = vsub.f32 1.0, %v2187_v5 }
 0x5e1   :  { %v2179_v51 = vsel %vm2176_vm13, %v2178_v48, %v2174_v17  ;;  %v2202_v28 = vmul.f32 %v2765_v0, %v2160_v40 }
 0x5e2   :  { %v2201_v29 = vmul.f32 %v2179_v51, %v4174_v62  ;;  %v2189_v30 = vmul.f32 %v2763_v27, %v2188_v3  ;;  %v4391_v62 = vld [vmem:[#allocation37_spill] sm:$0xff] }
 0x5e4   :  { %v4220_v12 = vadd.f32 %v2202_v28, %v2201_v29  ;;  %v2190_v33 = vadd.f32 %v2763_v27, %v2189_v30 }
 0x5e6   :  { %2766 = vtanh.f32 %v4220_v12  ;;  %v2194_v15 = vsel %vm2193_vm0, %v2763_v27, %v2190_v33 }
 0x5e7   :  { %v2199_v58 = vsel %vm2196_vm1, %v2198_v54, %v2194_v15 }
 0x5ec   :  { %v2767_v9 = vpop.eup %2766 }
 0x5ed   :  { %v2205_v1 = vmul.f32 %v2767_v9, %v2199_v58 }
 0x5ef   :  { %2291 = vmatmul.f32.vlgmr.msra.gmra.mxu0 %v2205_v1  ;;  %2311 = vmatmul.f32.vlgmr.msra.gmra.mxu1 %v2205_v1 }
 0x5f0   :  { %2331 = vmatmul.f32.vlgmr.msrb.gmra.mxu2 %v2205_v1  ;;  %2351 = vmatmul.f32.vlgmr.msrb.gmra.mxu3 %v2205_v1 }
 0x5f7   :  { %2485 = vmatmul.f32.vlgmr.msrb.gmra.mxu0 %v4391_v62  ;;  %2526 = vmatmul.f32.vlgmr.msrb.gmra.mxu1 %v4391_v62 }
 0x5ff   :  { %2488 = vmatmul.f32.gmra.mxu0 %v4392_v49  ;;  %2529 = vmatmul.f32.gmra.mxu1 %v4392_v49 }
 0x607   :  { %2491 = vmatmul.f32.gmra.mxu0 %v4393_v63  ;;  %2532 = vmatmul.f32.gmra.mxu1 %v4393_v63 }
 0x60f   :  { %2494 = vmatmul.f32.gmra.mxu0 %v4394_v39  ;;  %2535 = vmatmul.f32.gmra.mxu1 %v4394_v39 }
 0x617   :  { %2497 = vmatmul.f32.gmra.mxu0 %v4395_v6  ;;  %2538 = vmatmul.f32.gmra.mxu1 %v4395_v6 }
 0x61f   :  { %2500 = vmatmul.f32.gmra.mxu0 %v4201_v42  ;;  %2541 = vmatmul.f32.gmra.mxu1 %v4201_v42  ;;  %v4398_v42 = vld [vmem:[#allocation18_spill] sm:$0xff] }
 0x620   :  { %v663_v14 = vadd.f32 %v4399_v41, %v4398_v42 }
 0x627   :  { %2503 = vmatmul.f32.gmra.mxu0 %v2205_v1  ;;  %2544 = vmatmul.f32.gmra.mxu1 %v2205_v1 }
 0x66c   :  { %v2292_v45 = vpop.f32.mrf.mxu0  ;;  %v2312_v34 = vpop.f32.mrf.mxu1 }
 0x66d   :  { %v2355_v20 = vadd.f32 %v2292_v45, %v4396_v38  ;;  %v2356_v44 = vadd.f32 %v2312_v34, %v4397_v8 }
 0x66f   :  { %v2637_v26 = vmul.f32 -1.442695, %v2355_v20  ;;  %v2638_v57 = vmul.f32 -1.442695, %v2356_v44 }
 0x671   :  { %2768 = vpow2.f32 %v2637_v26 }
 0x672   :  { %2770 = vpow2.f32 %v2638_v57 }
 0x673   :  { %v2352_v2 = vpop.f32.mrf.mxu3  ;;  %v2332_v16 = vpop.f32.mrf.mxu2 }
 0x674   :  { %v2358_v47 = vadd.f32 %v2352_v2, %v663_v14  ;;  %v2486_v46 = vpop.f32.mrf.mxu0  ;;  %v2527_v37 = vpop.f32.mrf.mxu1  ;;  %v2357_v21 = vadd.f32 %v2332_v16, %v625_v32 }
 0x675   :  { %v2487_v56 = vadd.f32 %v2486_v46, %v4240_v53  ;;  %v2528_v7 = vadd.f32 %v2527_v37, %v4242_v19 }
 0x676   :  { %v2639_v13 = vmul.f32 -1.442695, %v2358_v47 }
 0x677   :  { %v2769_v36 = vpop.eup %2768  ;;  %2551 = vst [vmem:[#allocation12] sm:$0xff] %v2487_v56 }
 0x678   :  { %v2771_v52 = vpop.eup %2770  ;;  %v2362_v11 = vadd.f32 1.0, %v2769_v36  ;;  %2772 = vpow2.f32 %v2639_v13  ;;  %2552 = vst [vmem:[#allocation12 + $0x8] sm:$0xff] %v2528_v7 }
 0x679   :  { %v2381_v35 = vadd.f32 1.0, %v2771_v52 }
 0x67a   :  { %2774 = vrcp.f32 %v2362_v11  ;;  %v2372_v40 = vand.u32 2147483647, %v2362_v11  ;;  %v2374_v17 = vand.u32 2147483648, %v2362_v11  ;;  %vm2368_vm4 = vweird.f32 %v2362_v11 }
 0x67b   :  { %2776 = vrcp.f32 %v2381_v35  ;;  %v2393_v0 = vand.u32 2147483648, %v2381_v35  ;;  %v2391_v31 = vand.u32 2147483647, %v2381_v35  ;;  %vm2387_vm5 = vweird.f32 %v2381_v35 }
 0x67c   :  { %v2489_v55 = vpop.f32.mrf.mxu0  ;;  %v2530_v24 = vpop.f32.mrf.mxu1  ;;  %v2375_v54 = vor.u32 1.1754944e-38, %v2374_v17  ;;  %vm2373_vm8 = vcmp.eq.f32.partialorder %v2372_v40, 8.507059e+37 }
 0x67d   :  { %v2490_v23 = vadd.f32 %v2489_v55, %v4240_v53  ;;  %v2531_v61 = vadd.f32 %v2530_v24, %v4242_v19  ;;  %v2394_v62 = vor.u32 1.1754944e-38, %v2393_v0  ;;  %vm2392_vm9 = vcmp.eq.f32.partialorder %v2391_v31, 8.507059e+37 }
 0x67e   :  { %v2773_v59 = vpop.eup %2772 }
 0x67f   :  { %v4252_v27 = vadd.f32 1.0, %v2773_v59  ;;  %2553 = vst [vmem:[#allocation12 + $0x10] sm:$0xff] %v2490_v23 }
 0x680   :  { %v2775_v43 = vpop.eup %2774  ;;  %2554 = vst [vmem:[#allocation12 + $0x18] sm:$0xff] %v2531_v61 }
 0x681   :  { %v2777_v10 = vpop.eup %2776  ;;  %v2364_v60 = vmul.f32 %v2775_v43, %v2362_v11  ;;  %2778 = vrcp.f32 %v4252_v27  ;;  %vm2369_vm2 = vweird.f32 %v2775_v43  ;;  %v2413_v41 = vand.u32 2147483648, %v4252_v27 }
 0x682   :  { %v2383_v5 = vmul.f32 %v2777_v10, %v2381_v35  ;;  %2780 = vtanh.f32 %v2357_v21  ;;  %vm2388_vm3 = vweird.f32 %v2777_v10  ;;  %vm2370_vm6 = vmor %vm2368_vm4, %vm2369_vm2  ;;  %vm2407_vm11 = vweird.f32 %v4252_v27 }
 0x683   :  { %v2365_v48 = vsub.f32 1.0, %v2364_v60  ;;  %vm2389_vm7 = vmor %vm2387_vm5, %vm2388_vm3  ;;  %v2411_v14 = vand.u32 2147483647, %v4252_v27  ;;  %v2414_v46 = vor.u32 1.1754944e-38, %v2413_v41 }
 0x684   :  { %v2384_v22 = vsub.f32 1.0, %v2383_v5  ;;  %v2492_v3 = vpop.f32.mrf.mxu0  ;;  %v2533_v51 = vpop.f32.mrf.mxu1 }
 0x685   :  { %v2366_v28 = vmul.f32 %v2775_v43, %v2365_v48  ;;  %v2493_v29 = vadd.f32 %v2492_v3, %v4240_v53  ;;  %v2534_v30 = vadd.f32 %v2533_v51, %v4242_v19  ;;  %vm2412_vm13 = vcmp.eq.f32.partialorder %v2411_v14, 8.507059e+37 }
 0x686   :  { %v2385_v33 = vmul.f32 %v2777_v10, %v2384_v22 }
 0x687   :  { %v2779_v25 = vpop.eup %2778  ;;  %v2367_v15 = vadd.f32 %v2775_v43, %v2366_v28  ;;  %2555 = vst [vmem:[#allocation12 + $0x20] sm:$0xff] %v2493_v29 }
 0x688   :  { %v2386_v9 = vadd.f32 %v2777_v10, %v2385_v33  ;;  %v2403_v58 = vmul.f32 %v2779_v25, %v4252_v27  ;;  %2556 = vst [vmem:[#allocation12 + $0x28] sm:$0xff] %v2534_v30  ;;  %v2781_v1 = vpop.eup %2780  ;;  %vm2408_vm10 = vweird.f32 %v2779_v25 }
 0x689   :  { %v2371_v49 = vsel %vm2370_vm6, %v2775_v43, %v2367_v15  ;;  %vm2409_vm12 = vmor %vm2407_vm11, %vm2408_vm10 }
 0x68a   :  { %v2376_v63 = vsel %vm2373_vm8, %v2375_v54, %v2371_v49  ;;  %v2390_v39 = vsel %vm2389_vm7, %v2777_v10, %v2386_v9  ;;  %v2404_v6 = vsub.f32 1.0, %v2403_v58 }
 0x68b   :  { %v2395_v45 = vsel %vm2392_vm9, %v2394_v62, %v2390_v39  ;;  %v2418_v34 = vmul.f32 %v2781_v1, %v2376_v63 }
 0x68c   :  { %v2417_v38 = vmul.f32 %v2395_v45, %v4220_v12  ;;  %v2495_v20 = vpop.f32.mrf.mxu0  ;;  %v2536_v8 = vpop.f32.mrf.mxu1  ;;  %v2405_v44 = vmul.f32 %v2779_v25, %v2404_v6 }
 0x68d   :  { %v2496_v18 = vadd.f32 %v2495_v20, %v4240_v53  ;;  %v2537_v26 = vadd.f32 %v2536_v8, %v4242_v19 }
 0x68e   :  { %v2419_v57 = vadd.f32 %v2418_v34, %v2417_v38  ;;  %v2406_v42 = vadd.f32 %v2779_v25, %v2405_v44 }
 0x68f   :  { %2557 = vst [vmem:[#allocation12 + $0x30] sm:$0xff] %v2496_v18 }
 0x690   :  { %2782 = vtanh.f32 %v2419_v57  ;;  %2558 = vst [vmem:[#allocation12 + $0x38] sm:$0xff] %v2537_v26  ;;  %v2410_v12 = vsel %vm2409_vm12, %v2779_v25, %v2406_v42 }
 0x691   :  { %v2415_v13 = vsel %vm2412_vm13, %v2414_v46, %v2410_v12 }
 0x694   :  { %v2498_v2 = vpop.f32.mrf.mxu0  ;;  %v2539_v47 = vpop.f32.mrf.mxu1 }
 0x695   :  { %v2499_v37 = vadd.f32 %v2498_v2, %v4240_v53  ;;  %v2540_v56 = vadd.f32 %v2539_v47, %v4242_v19 }
 0x696   :  { %v2783_v7 = vpop.eup %2782 }
 0x697   :  { %2559 = vst [vmem:[#allocation12 + $0x40] sm:$0xff] %v2499_v37  ;;  %v2421_v36 = vmul.f32 %v2783_v7, %v2415_v13 }
 0x698   :  { %2560 = vst [vmem:[#allocation12 + $0x48] sm:$0xff] %v2540_v56 }
 0x699   :  { %2506 = vmatmul.f32.gmra.mxu0 %v2421_v36  ;;  %2547 = vmatmul.f32.gmra.mxu1 %v2421_v36 }
 0x69c   :  { %v2501_v52 = vpop.f32.mrf.mxu0  ;;  %v2542_v11 = vpop.f32.mrf.mxu1 }
 0x69d   :  { %v2502_v35 = vadd.f32 %v2501_v52, %v4240_v53  ;;  %v2543_v16 = vadd.f32 %v2542_v11, %v4242_v19 }
 0x69f   :  { %2561 = vst [vmem:[#allocation12 + $0x50] sm:$0xff] %v2502_v35 }
 0x6a0   :  { %2562 = vst [vmem:[#allocation12 + $0x58] sm:$0xff] %v2543_v16 }
 0x6a4   :  { %v2504_v55 = vpop.f32.mrf.mxu0  ;;  %v2545_v24 = vpop.f32.mrf.mxu1 }
 0x6a5   :  { %v2505_v50 = vadd.f32 %v2504_v55, %v4240_v53  ;;  %v2546_v4 = vadd.f32 %v2545_v24, %v4242_v19 }
 0x6a7   :  { %2563 = vst [vmem:[#allocation12 + $0x60] sm:$0xff] %v2505_v50 }
 0x6a8   :  { %2564 = vst [vmem:[#allocation12 + $0x68] sm:$0xff] %v2546_v4 }
 0x716   :  { %v2507_v32 = vpop.f32.mrf.mxu0  ;;  %v2548_v23 = vpop.f32.mrf.mxu1 }
 0x717   :  { %v2508_v61 = vadd.f32 %v2507_v32, %v4240_v53  ;;  %v2549_v59 = vadd.f32 %v2548_v23, %v4242_v19 }
 0x719   :  { %2565 = vst [vmem:[#allocation12 + $0x70] sm:$0xff] %v2508_v61 }
 0x71a   :  { %2566 = vst [vmem:[#allocation12 + $0x78] sm:$0xff] %v2549_v59 }
 0x71b   :  { %2579 = dma.vmem_to_hbm [thread:$0]  %s2572_s14, 2048, %s2574_s17, [#allocation6], %s2920_s15, %s2920_s15, %s2921_s16  }
 0x71c   :  { %2910 = dma.done.wait [#allocation6], 2048  }
 0x71d   :  { %2911 = vsyncadd [#allocation6], 4294965248 }
 0x71e   :  { %2584 = vsyncpa [#allocation5], 1 }
 0x71f   :  { %2585 = vsyncpa [#allocation8], 1 }
 0x720   :  { %2586 = vsyncpa [#allocation11], 1 }
 0x721   :  { %2587 = vsyncpa [#allocation6], 1 }

</bundles_post_ra>
